<compile_context>
chip_gen: v7x
topology: tpu7x:2x2x1
jax: 0.10.0
libtpu: 0.0.40
codegen_flags: <defaults>
</compile_context>

<pallas_src>
import functools
import math

import jax
import jax.numpy as jnp
from jax.experimental import pallas as pl
from jax.experimental.pallas import tpu as pltpu


# ----------------------------------------------------------------------------
# Conv 3x3, stride 1, pad 1, fused bias + ReLU.
# Grid: (N, H // TILE_H).  Per step: 3 MXU dots, M = TILE_H*W, K = 3*Cin.
# ----------------------------------------------------------------------------
def conv3x3_relu_kernel(x3_ref, w_ref, b_ref, o_ref, *, tile_rows, width,
                        row_blocks):
    # x3_ref: (1, (H+2)*W, 3*Cin)  dx-packed, H/W-padded sample (resident)
    # w_ref:  (3, 3*Cin, Cout)     per-dy packed weights
    # b_ref:  (1, Cout)
    # o_ref:  (1, TILE_H*W, Cout)  flat row block (== NHWC rows of the output)
    m = tile_rows * width
    c_out = o_ref.shape[-1]
    if row_blocks == 1:
        base = 0                                          # static offsets
    else:
        base = pl.multiple_of(pl.program_id(1) * tile_rows * width, width)
    acc = jnp.zeros((m, c_out), jnp.float32)
    for dy in range(3):
        slab = x3_ref[0, pl.ds(base + dy * width, m), :]  # (M, 3*Cin)
        acc = acc + jnp.dot(slab, w_ref[dy],
                            preferred_element_type=jnp.float32)
    acc = acc + b_ref[...]                                # (1, Cout) broadcast
    o_ref[0] = jnp.maximum(acc, 0.0).astype(o_ref.dtype)


def _pick_row_tile(h, max_rows=16):
    if h <= max_rows:
        return h
    for t in range(max_rows, 0, -1):
        if h % t == 0:
            return t
    return h


def conv3x3_relu(x_nhwc, w3, b):
    n, h, w_dim, c_in = x_nhwc.shape
    c_out = w3.shape[-1]
    tv = _pick_row_tile(h)
    row_blocks = h // tv

    # dx-packing (im2col-lite): x3[n, r, w, dx*Cin + c] = xpad[n, r, w + dx, c]
    xp = jnp.pad(x_nhwc, ((0, 0), (1, 1), (1, 1), (0, 0)))
    x3 = jnp.concatenate([xp[:, :, dx:dx + w_dim, :] for dx in range(3)],
                         axis=-1)                          # (N, H+2, W, 3Cin)
    x3f = x3.reshape(n, (h + 2) * w_dim, 3 * c_in)         # free reshape

    out = pl.pallas_call(
        functools.partial(conv3x3_relu_kernel, tile_rows=tv, width=w_dim,
                          row_blocks=row_blocks),
        out_shape=jax.ShapeDtypeStruct((n, h * w_dim, c_out), x_nhwc.dtype),
        grid=(n, row_blocks),
        in_specs=[
            pl.BlockSpec((1, (h + 2) * w_dim, 3 * c_in), lambda i, j: (i, 0, 0)),
            pl.BlockSpec((3, 3 * c_in, c_out), lambda i, j: (0, 0, 0)),
            pl.BlockSpec((1, c_out), lambda i, j: (0, 0)),
        ],
        out_specs=pl.BlockSpec((1, tv * w_dim, c_out), lambda i, j: (i, j, 0)),
        compiler_params=pltpu.CompilerParams(
            dimension_semantics=("parallel", "parallel"),
            vmem_limit_bytes=64 * 1024 * 1024),
    )(x3f, w3, b)
    # (N, H*W, Cout) is row-major identical to NHWC.
    return out.reshape(n, h, w_dim, c_out)


# ----------------------------------------------------------------------------
# MaxPool 2x2, stride 2.  One grid step per sample; the wrapper reshapes
# (N, H, W, C) -> (N, H, W//2, 2C) (free, row-major) so the W-direction max is
# a lane-half compare; the H-direction max only touches leading dims.
# ----------------------------------------------------------------------------
def maxpool2x2_kernel(x_ref, o_ref):
    # x_ref: (1, H, W//2, 2C)    o_ref: (1, H//2, W//2, C)
    h2, w2, c = o_ref.shape[1], o_ref.shape[2], o_ref.shape[3]
    v = x_ref[0]                                           # (H, W//2, 2C)
    m = jnp.maximum(v[:, :, :c], v[:, :, c:])              # max over W pairs
    m = m.reshape(h2, 2, w2, c)                            # split leading H
    o_ref[0] = jnp.maximum(m[:, 0], m[:, 1]).astype(o_ref.dtype)


def maxpool2x2(x_nhwc):
    n, h, w_dim, c = x_nhwc.shape
    xr = x_nhwc.reshape(n, h, w_dim // 2, 2 * c)
    return pl.pallas_call(
        maxpool2x2_kernel,
        out_shape=jax.ShapeDtypeStruct((n, h // 2, w_dim // 2, c), x_nhwc.dtype),
        grid=(n,),
        in_specs=[pl.BlockSpec((1, h, w_dim // 2, 2 * c),
                               lambda i: (i, 0, 0, 0))],
        out_specs=pl.BlockSpec((1, h // 2, w_dim // 2, c),
                               lambda i: (i, 0, 0, 0)),
        compiler_params=pltpu.CompilerParams(
            dimension_semantics=("parallel",),
            vmem_limit_bytes=64 * 1024 * 1024),
    )(xr)


# ----------------------------------------------------------------------------
# Linear (y = x @ W + b), optional fused ReLU: tiled matmul with a K-loop and
# an f32 VMEM accumulator (K axis last, "arbitrary").
# ----------------------------------------------------------------------------
def linear_kernel(x_ref, w_ref, b_ref, o_ref, acc_ref, *, apply_relu):
    k = pl.program_id(2)

    @pl.when(k == 0)
    def _():
        acc_ref[...] = jnp.zeros_like(acc_ref)

    acc_ref[...] += jnp.dot(x_ref[...], w_ref[...],
                            preferred_element_type=jnp.float32)

    @pl.when(k == pl.num_programs(2) - 1)
    def _():
        y = acc_ref[...] + b_ref[...]
        if apply_relu:
            y = jnp.maximum(y, 0.0)
        o_ref[...] = y.astype(o_ref.dtype)


def _pick_tile(dim, max_tile, align):
    if dim <= max_tile:
        return dim
    t = (max_tile // align) * align
    while t >= align:
        if dim % t == 0:
            return t
        t -= align
    return dim


def linear(x, w, b, apply_relu=False):
    m, k_dim = x.shape
    n_out = w.shape[1]
    tm = _pick_tile(m, 256, 8)
    tn = _pick_tile(n_out, 256, 128)
    tk = _pick_tile(k_dim, 512, 128)
    return pl.pallas_call(
        functools.partial(linear_kernel, apply_relu=apply_relu),
        out_shape=jax.ShapeDtypeStruct((m, n_out), x.dtype),
        grid=(m // tm, n_out // tn, k_dim // tk),
        in_specs=[
            pl.BlockSpec((tm, tk), lambda i, j, k: (i, k)),
            pl.BlockSpec((tk, tn), lambda i, j, k: (k, j)),
            pl.BlockSpec((1, tn), lambda i, j, k: (0, j)),
        ],
        out_specs=pl.BlockSpec((tm, tn), lambda i, j, k: (i, j)),
        scratch_shapes=[pltpu.VMEM((tm, tn), jnp.float32)],
        compiler_params=pltpu.CompilerParams(
            dimension_semantics=("parallel", "parallel", "arbitrary"),
            vmem_limit_bytes=64 * 1024 * 1024),
    )(x, w, b)


# ----------------------------------------------------------------------------
# Parameter init (xavier_uniform weights, zero biases — matches _init_weights).
# Conv weights are stored pre-packed as (3, 3*Cin, Cout); W1's rows are
# permuted so that the NHWC-flattened features match torch.flatten on NCHW.
# ----------------------------------------------------------------------------
def xavier_uniform(key, shape, fan_in, fan_out):
    lim = math.sqrt(6.0 / (fan_in + fan_out))
    return jax.random.uniform(key, shape, jnp.float32, -lim, lim)


def init_params(key, cfg, in_channels, hidden, class_num, feat_hw):
    params = {"features": [], "classifier": []}
    cin = in_channels
    for v in cfg:
        if v == "M":
            continue
        key, kw = jax.random.split(key)
        w = xavier_uniform(kw, (3, 3, cin, v), 9 * cin, 9 * v)
        params["features"].append((w.reshape(3, 3 * cin, v),
                                   jnp.zeros((1, v), jnp.float32)))
        cin = v
    flat = cin * feat_hw * feat_hw
    dims = [(flat, hidden), (hidden, hidden), (hidden, class_num)]
    for li, (d_in, d_out) in enumerate(dims):
        key, kw = jax.random.split(key)
        w = xavier_uniform(kw, (d_in, d_out), d_in, d_out)
        if li == 0:
            # one-time row permutation: torch flattens NCHW in (C, H, W) order,
            # the kernels flatten NHWC in (H, W, C) order.
            perm = jnp.arange(d_in).reshape(cin, feat_hw, feat_hw)
            perm = perm.transpose(1, 2, 0).reshape(-1)
            w = w[perm]
        params["classifier"].append((w, jnp.zeros((1, d_out), jnp.float32)))
    return params


# ----------------------------------------------------------------------------
# Full forward pass (mirrors VGG.forward).
# ----------------------------------------------------------------------------
def vgg_forward(params, x_nchw, cfg):
    n = x_nchw.shape[0]
    x = jnp.transpose(x_nchw, (0, 2, 3, 1))       # NCHW -> NHWC for the kernels
    ci = 0
    for v in cfg:                                  # self.feature(x)
        if v == "M":
            x = maxpool2x2(x)
        else:
            w3, b = params["features"][ci]
            x = conv3x3_relu(x, w3, b)
            ci += 1
    # torch.flatten(x, start_dim=1): W1 rows were permuted at init, so a plain
    # NHWC flatten (no per-forward transpose) is bit-equivalent.
    x = x.reshape(n, -1)
    # TODO(synk): nn.Dropout is identity in eval mode; training-mode stochastic
    # dropout is not implemented.
    (w1, b1), (w2, b2), (w3_, b3) = params["classifier"]
    x = linear(x, w1, b1, apply_relu=True)
    x = linear(x, w2, b2, apply_relu=True)
    x = linear(x, w3_, b3, apply_relu=False)
    return x


if __name__ == "__main__":
    # Scaled-down VGG16-style feature config for a small test
    # (full VGG16 would be 64,64,'M',128,128,'M',256x3,'M',512x3,'M',512x3,'M'
    #  with hidden=4096, class_num=1000 at 224x224 input).
    cfg = (8, 8, "M", 16, "M", 32, "M")
    N, Cin, H, W = 2, 3, 16, 16
    hidden, class_num = 64, 10
    n_pool = sum(1 for v in cfg if v == "M")
    feat_hw = H // (2 ** n_pool)

    key = jax.random.PRNGKey(0)
    kp, kx = jax.random.split(key)
    params = init_params(kp, cfg, Cin, hidden, class_num, feat_hw)
    x = jax.random.normal(kx, (N, Cin, H, W), jnp.float32)   # PyTorch-style NCHW

    fwd = jax.jit(lambda p, xx: vgg_forward(p, xx, cfg))
    out = jax.block_until_ready(fwd(params, x))

    assert out.shape == (N, class_num), out.shape
    assert bool(jnp.all(jnp.isfinite(out)))
    print("KERNEL_OK")
</pallas_src>

<mosaic_0001>
module attributes {stable_mosaic.version = 11 : i64} {
  func.func @conv3x3_relu_kernel(%arg0: i32, %arg1: i32, %arg2: memref<1x288x9xf32, #tpu.memory_space<vmem>>, %arg3: memref<3x9x8xf32, #tpu.memory_space<vmem>>, %arg4: memref<1x8xf32, #tpu.memory_space<vmem>>, %arg5: memref<1x256x8xf32, #tpu.memory_space<vmem>>) attributes {dimension_semantics = [#tpu.dimension_semantics<parallel>, #tpu.dimension_semantics<parallel>], iteration_bounds = array<i64: 2, 1>, scalar_prefetch = 0 : i64, scratch_operands = 0 : i64, tpu.core_type = #tpu.core_type<tc>, window_params = [{transform_indices = @transform_0, window_bounds = array<i64: 1, 288, 9>}, {pipeline_mode = #tpu.pipeline_mode<synchronous>, transform_indices = @transform_1, window_bounds = array<i64: 3, 9, 8>}, {pipeline_mode = #tpu.pipeline_mode<synchronous>, transform_indices = @transform_2, window_bounds = array<i64: 1, 8>}, {transform_indices = @transform_3, window_bounds = array<i64: 1, 256, 8>}]} {
    %cst = arith.constant 0.000000e+00 : f32
    %0 = vector.broadcast %cst : f32 to vector<256x8xf32>
    %c0 = arith.constant 0 : index
    %c0_0 = arith.constant 0 : index
    %c0_1 = arith.constant 0 : index
    %1 = vector.load %arg2[%c0, %c0_0, %c0_1] : memref<1x288x9xf32, #tpu.memory_space<vmem>>, vector<1x256x9xf32>
    %2 = vector.shape_cast %1 : vector<1x256x9xf32> to vector<256x9xf32>
    %c0_2 = arith.constant 0 : index
    %c0_3 = arith.constant 0 : index
    %c0_4 = arith.constant 0 : index
    %3 = vector.load %arg3[%c0_2, %c0_3, %c0_4] : memref<3x9x8xf32, #tpu.memory_space<vmem>>, vector<1x9x8xf32>
    %4 = vector.shape_cast %3 : vector<1x9x8xf32> to vector<9x8xf32>
    %cst_5 = arith.constant dense<0.000000e+00> : vector<256x8xf32>
    %5 = tpu.matmul %2, %4, %cst_5 {dimension_numbers = #tpu.dot_dimension_numbers<[1], [0], [0], [1], [0, 0, 1, 1], [], []>} : vector<256x9xf32>, vector<9x8xf32>, vector<256x8xf32> -> vector<256x8xf32>
    %6 = arith.addf %0, %5 : vector<256x8xf32>
    %c0_6 = arith.constant 0 : index
    %c16 = arith.constant 16 : index
    %c0_7 = arith.constant 0 : index
    %7 = vector.load %arg2[%c0_6, %c16, %c0_7] : memref<1x288x9xf32, #tpu.memory_space<vmem>>, vector<1x256x9xf32>
    %8 = vector.shape_cast %7 : vector<1x256x9xf32> to vector<256x9xf32>
    %c1 = arith.constant 1 : index
    %c0_8 = arith.constant 0 : index
    %c0_9 = arith.constant 0 : index
    %9 = vector.load %arg3[%c1, %c0_8, %c0_9] : memref<3x9x8xf32, #tpu.memory_space<vmem>>, vector<1x9x8xf32>
    %10 = vector.shape_cast %9 : vector<1x9x8xf32> to vector<9x8xf32>
    %cst_10 = arith.constant dense<0.000000e+00> : vector<256x8xf32>
    %11 = tpu.matmul %8, %10, %cst_10 {dimension_numbers = #tpu.dot_dimension_numbers<[1], [0], [0], [1], [0, 0, 1, 1], [], []>} : vector<256x9xf32>, vector<9x8xf32>, vector<256x8xf32> -> vector<256x8xf32>
    %12 = arith.addf %6, %11 : vector<256x8xf32>
    %c0_11 = arith.constant 0 : index
    %c32 = arith.constant 32 : index
    %c0_12 = arith.constant 0 : index
    %13 = vector.load %arg2[%c0_11, %c32, %c0_12] : memref<1x288x9xf32, #tpu.memory_space<vmem>>, vector<1x256x9xf32>
    %14 = vector.shape_cast %13 : vector<1x256x9xf32> to vector<256x9xf32>
    %c2 = arith.constant 2 : index
    %c0_13 = arith.constant 0 : index
    %c0_14 = arith.constant 0 : index
    %15 = vector.load %arg3[%c2, %c0_13, %c0_14] : memref<3x9x8xf32, #tpu.memory_space<vmem>>, vector<1x9x8xf32>
    %16 = vector.shape_cast %15 : vector<1x9x8xf32> to vector<9x8xf32>
    %cst_15 = arith.constant dense<0.000000e+00> : vector<256x8xf32>
    %17 = tpu.matmul %14, %16, %cst_15 {dimension_numbers = #tpu.dot_dimension_numbers<[1], [0], [0], [1], [0, 0, 1, 1], [], []>} : vector<256x9xf32>, vector<9x8xf32>, vector<256x8xf32> -> vector<256x8xf32>
    %18 = arith.addf %12, %17 : vector<256x8xf32>
    %c0_16 = arith.constant 0 : index
    %c0_17 = arith.constant 0 : index
    %19 = vector.load %arg4[%c0_16, %c0_17] : memref<1x8xf32, #tpu.memory_space<vmem>>, vector<1x8xf32>
    %20 = vector.broadcast %19 : vector<1x8xf32> to vector<256x8xf32>
    %21 = arith.addf %18, %20 : vector<256x8xf32>
    %cst_18 = arith.constant 0.000000e+00 : f32
    %22 = vector.broadcast %cst_18 : f32 to vector<256x8xf32>
    %23 = arith.maximumf %21, %22 : vector<256x8xf32>
    %c0_19 = arith.constant 0 : index
    %c0_20 = arith.constant 0 : index
    %c0_21 = arith.constant 0 : index
    %24 = vector.load %arg5[%c0_19, %c0_20, %c0_21] : memref<1x256x8xf32, #tpu.memory_space<vmem>>, vector<1x256x8xf32>
    %25 = vector.shape_cast %24 : vector<1x256x8xf32> to vector<256x8xf32>
    %26 = vector.shape_cast %23 : vector<256x8xf32> to vector<1x256x8xf32>
    tpu.vector_store %arg5[%c0_19, %c0_20, %c0_21], %26 {strides = array<i32>} : memref<1x256x8xf32, #tpu.memory_space<vmem>>, vector<1x256x8xf32>,
    return
  }
  func.func @transform_0(%arg0: i32, %arg1: i32) -> (i32, i32, i32) {
    %c0_i32 = arith.constant 0 : i32
    %c0_i32_0 = arith.constant 0 : i32
    %c0_i32_1 = arith.constant 0 : i32
    return %arg0, %c0_i32, %c0_i32_0 : i32, i32, i32
  }
  func.func @transform_1(%arg0: i32, %arg1: i32) -> (i32, i32, i32) {
    %c0_i32 = arith.constant 0 : i32
    %c0_i32_0 = arith.constant 0 : i32
    %c0_i32_1 = arith.constant 0 : i32
    %c0_i32_2 = arith.constant 0 : i32
    return %c0_i32, %c0_i32_0, %c0_i32_1 : i32, i32, i32
  }
  func.func @transform_2(%arg0: i32, %arg1: i32) -> (i32, i32) {
    %c0_i32 = arith.constant 0 : i32
    %c0_i32_0 = arith.constant 0 : i32
    %c0_i32_1 = arith.constant 0 : i32
    return %c0_i32, %c0_i32_0 : i32, i32
  }
  func.func @transform_3(%arg0: i32, %arg1: i32) -> (i32, i32, i32) {
    %c0_i32 = arith.constant 0 : i32
    %c0_i32_0 = arith.constant 0 : i32
    return %arg0, %arg1, %c0_i32 : i32, i32, i32
  }
}

module attributes {stable_mosaic.version = 11 : i64} {
  func.func @conv3x3_relu_kernel(%arg0: i32, %arg1: i32, %arg2: memref<1x288x24xf32, #tpu.memory_space<vmem>>, %arg3: memref<3x24x8xf32, #tpu.memory_space<vmem>>, %arg4: memref<1x8xf32, #tpu.memory_space<vmem>>, %arg5: memref<1x256x8xf32, #tpu.memory_space<vmem>>) attributes {dimension_semantics = [#tpu.dimension_semantics<parallel>, #tpu.dimension_semantics<parallel>], iteration_bounds = array<i64: 2, 1>, scalar_prefetch = 0 : i64, scratch_operands = 0 : i64, tpu.core_type = #tpu.core_type<tc>, window_params = [{transform_indices = @transform_0, window_bounds = array<i64: 1, 288, 24>}, {pipeline_mode = #tpu.pipeline_mode<synchronous>, transform_indices = @transform_1, window_bounds = array<i64: 3, 24, 8>}, {pipeline_mode = #tpu.pipeline_mode<synchronous>, transform_indices = @transform_2, window_bounds = array<i64: 1, 8>}, {transform_indices = @transform_3, window_bounds = array<i64: 1, 256, 8>}]} {
    %cst = arith.constant 0.000000e+00 : f32
    %0 = vector.broadcast %cst : f32 to vector<256x8xf32>
    %c0 = arith.constant 0 : index
    %c0_0 = arith.constant 0 : index
    %c0_1 = arith.constant 0 : index
    %1 = vector.load %arg2[%c0, %c0_0, %c0_1] : memref<1x288x24xf32, #tpu.memory_space<vmem>>, vector<1x256x24xf32>
    %2 = vector.shape_cast %1 : vector<1x256x24xf32> to vector<256x24xf32>
    %c0_2 = arith.constant 0 : index
    %c0_3 = arith.constant 0 : index
    %c0_4 = arith.constant 0 : index
    %3 = vector.load %arg3[%c0_2, %c0_3, %c0_4] : memref<3x24x8xf32, #tpu.memory_space<vmem>>, vector<1x24x8xf32>
    %4 = vector.shape_cast %3 : vector<1x24x8xf32> to vector<24x8xf32>
    %cst_5 = arith.constant dense<0.000000e+00> : vector<256x8xf32>
    %5 = tpu.matmul %2, %4, %cst_5 {dimension_numbers = #tpu.dot_dimension_numbers<[1], [0], [0], [1], [0, 0, 1, 1], [], []>} : vector<256x24xf32>, vector<24x8xf32>, vector<256x8xf32> -> vector<256x8xf32>
    %6 = arith.addf %0, %5 : vector<256x8xf32>
    %c0_6 = arith.constant 0 : index
    %c16 = arith.constant 16 : index
    %c0_7 = arith.constant 0 : index
    %7 = vector.load %arg2[%c0_6, %c16, %c0_7] : memref<1x288x24xf32, #tpu.memory_space<vmem>>, vector<1x256x24xf32>
    %8 = vector.shape_cast %7 : vector<1x256x24xf32> to vector<256x24xf32>
    %c1 = arith.constant 1 : index
    %c0_8 = arith.constant 0 : index
    %c0_9 = arith.constant 0 : index
    %9 = vector.load %arg3[%c1, %c0_8, %c0_9] : memref<3x24x8xf32, #tpu.memory_space<vmem>>, vector<1x24x8xf32>
    %10 = vector.shape_cast %9 : vector<1x24x8xf32> to vector<24x8xf32>
    %cst_10 = arith.constant dense<0.000000e+00> : vector<256x8xf32>
    %11 = tpu.matmul %8, %10, %cst_10 {dimension_numbers = #tpu.dot_dimension_numbers<[1], [0], [0], [1], [0, 0, 1, 1], [], []>} : vector<256x24xf32>, vector<24x8xf32>, vector<256x8xf32> -> vector<256x8xf32>
    %12 = arith.addf %6, %11 : vector<256x8xf32>
    %c0_11 = arith.constant 0 : index
    %c32 = arith.constant 32 : index
    %c0_12 = arith.constant 0 : index
    %13 = vector.load %arg2[%c0_11, %c32, %c0_12] : memref<1x288x24xf32, #tpu.memory_space<vmem>>, vector<1x256x24xf32>
    %14 = vector.shape_cast %13 : vector<1x256x24xf32> to vector<256x24xf32>
    %c2 = arith.constant 2 : index
    %c0_13 = arith.constant 0 : index
    %c0_14 = arith.constant 0 : index
    %15 = vector.load %arg3[%c2, %c0_13, %c0_14] : memref<3x24x8xf32, #tpu.memory_space<vmem>>, vector<1x24x8xf32>
    %16 = vector.shape_cast %15 : vector<1x24x8xf32> to vector<24x8xf32>
    %cst_15 = arith.constant dense<0.000000e+00> : vector<256x8xf32>
    %17 = tpu.matmul %14, %16, %cst_15 {dimension_numbers = #tpu.dot_dimension_numbers<[1], [0], [0], [1], [0, 0, 1, 1], [], []>} : vector<256x24xf32>, vector<24x8xf32>, vector<256x8xf32> -> vector<256x8xf32>
    %18 = arith.addf %12, %17 : vector<256x8xf32>
    %c0_16 = arith.constant 0 : index
    %c0_17 = arith.constant 0 : index
    %19 = vector.load %arg4[%c0_16, %c0_17] : memref<1x8xf32, #tpu.memory_space<vmem>>, vector<1x8xf32>
    %20 = vector.broadcast %19 : vector<1x8xf32> to vector<256x8xf32>
    %21 = arith.addf %18, %20 : vector<256x8xf32>
    %cst_18 = arith.constant 0.000000e+00 : f32
    %22 = vector.broadcast %cst_18 : f32 to vector<256x8xf32>
    %23 = arith.maximumf %21, %22 : vector<256x8xf32>
    %c0_19 = arith.constant 0 : index
    %c0_20 = arith.constant 0 : index
    %c0_21 = arith.constant 0 : index
    %24 = vector.load %arg5[%c0_19, %c0_20, %c0_21] : memref<1x256x8xf32, #tpu.memory_space<vmem>>, vector<1x256x8xf32>
    %25 = vector.shape_cast %24 : vector<1x256x8xf32> to vector<256x8xf32>
    %26 = vector.shape_cast %23 : vector<256x8xf32> to vector<1x256x8xf32>
    tpu.vector_store %arg5[%c0_19, %c0_20, %c0_21], %26 {strides = array<i32>} : memref<1x256x8xf32, #tpu.memory_space<vmem>>, vector<1x256x8xf32>,
    return
  }
  func.func @transform_0(%arg0: i32, %arg1: i32) -> (i32, i32, i32) {
    %c0_i32 = arith.constant 0 : i32
    %c0_i32_0 = arith.constant 0 : i32
    %c0_i32_1 = arith.constant 0 : i32
    return %arg0, %c0_i32, %c0_i32_0 : i32, i32, i32
  }
  func.func @transform_1(%arg0: i32, %arg1: i32) -> (i32, i32, i32) {
    %c0_i32 = arith.constant 0 : i32
    %c0_i32_0 = arith.constant 0 : i32
    %c0_i32_1 = arith.constant 0 : i32
    %c0_i32_2 = arith.constant 0 : i32
    return %c0_i32, %c0_i32_0, %c0_i32_1 : i32, i32, i32
  }
  func.func @transform_2(%arg0: i32, %arg1: i32) -> (i32, i32) {
    %c0_i32 = arith.constant 0 : i32
    %c0_i32_0 = arith.constant 0 : i32
    %c0_i32_1 = arith.constant 0 : i32
    return %c0_i32, %c0_i32_0 : i32, i32
  }
  func.func @transform_3(%arg0: i32, %arg1: i32) -> (i32, i32, i32) {
    %c0_i32 = arith.constant 0 : i32
    %c0_i32_0 = arith.constant 0 : i32
    return %arg0, %arg1, %c0_i32 : i32, i32, i32
  }
}

module attributes {stable_mosaic.version = 11 : i64} {
  func.func @maxpool2x2_kernel(%arg0: i32, %arg1: memref<1x16x8x16xf32, #tpu.memory_space<vmem>>, %arg2: memref<1x8x8x8xf32, #tpu.memory_space<vmem>>) attributes {dimension_semantics = [#tpu.dimension_semantics<parallel>], iteration_bounds = array<i64: 2>, scalar_prefetch = 0 : i64, scratch_operands = 0 : i64, tpu.core_type = #tpu.core_type<tc>, window_params = [{transform_indices = @transform_0, window_bounds = array<i64: 1, 16, 8, 16>}, {transform_indices = @transform_1, window_bounds = array<i64: 1, 8, 8, 8>}]} {
    %c0 = arith.constant 0 : index
    %c0_0 = arith.constant 0 : index
    %c0_1 = arith.constant 0 : index
    %c0_2 = arith.constant 0 : index
    %0 = vector.load %arg1[%c0, %c0_0, %c0_1, %c0_2] : memref<1x16x8x16xf32, #tpu.memory_space<vmem>>, vector<1x16x8x16xf32>
    %1 = vector.shape_cast %0 : vector<1x16x8x16xf32> to vector<16x8x16xf32>
    %2 = vector.extract_strided_slice %1 {offsets = [0, 0, 0], sizes = [16, 8, 8], strides = [1, 1, 1]} : vector<16x8x16xf32> to vector<16x8x8xf32>
    %3 = vector.extract_strided_slice %1 {offsets = [0, 0, 8], sizes = [16, 8, 8], strides = [1, 1, 1]} : vector<16x8x16xf32> to vector<16x8x8xf32>
    %4 = arith.maximumf %2, %3 : vector<16x8x8xf32>
    %5 = vector.shape_cast %4 : vector<16x8x8xf32> to vector<8x2x8x8xf32>
    %6 = vector.extract_strided_slice %5 {offsets = [0, 0, 0, 0], sizes = [8, 1, 8, 8], strides = [1, 1, 1, 1]} : vector<8x2x8x8xf32> to vector<8x1x8x8xf32>
    %7 = vector.shape_cast %6 : vector<8x1x8x8xf32> to vector<8x8x8xf32>
    %8 = vector.extract_strided_slice %5 {offsets = [0, 1, 0, 0], sizes = [8, 1, 8, 8], strides = [1, 1, 1, 1]} : vector<8x2x8x8xf32> to vector<8x1x8x8xf32>
    %9 = vector.shape_cast %8 : vector<8x1x8x8xf32> to vector<8x8x8xf32>
    %10 = arith.maximumf %7, %9 : vector<8x8x8xf32>
    %c0_3 = arith.constant 0 : index
    %c0_4 = arith.constant 0 : index
    %c0_5 = arith.constant 0 : index
    %c0_6 = arith.constant 0 : index
    %11 = vector.load %arg2[%c0_3, %c0_4, %c0_5, %c0_6] : memref<1x8x8x8xf32, #tpu.memory_space<vmem>>, vector<1x8x8x8xf32>
    %12 = vector.shape_cast %11 : vector<1x8x8x8xf32> to vector<8x8x8xf32>
    %13 = vector.shape_cast %10 : vector<8x8x8xf32> to vector<1x8x8x8xf32>
    tpu.vector_store %arg2[%c0_3, %c0_4, %c0_5, %c0_6], %13 {strides = array<i32>} : memref<1x8x8x8xf32, #tpu.memory_space<vmem>>, vector<1x8x8x8xf32>,
    return
  }
  func.func @transform_0(%arg0: i32) -> (i32, i32, i32, i32) {
    %c0_i32 = arith.constant 0 : i32
    %c0_i32_0 = arith.constant 0 : i32
    %c0_i32_1 = arith.constant 0 : i32
    %c0_i32_2 = arith.constant 0 : i32
    return %arg0, %c0_i32, %c0_i32_0, %c0_i32_1 : i32, i32, i32, i32
  }
  func.func @transform_1(%arg0: i32) -> (i32, i32, i32, i32) {
    %c0_i32 = arith.constant 0 : i32
    %c0_i32_0 = arith.constant 0 : i32
    %c0_i32_1 = arith.constant 0 : i32
    %c0_i32_2 = arith.constant 0 : i32
    return %arg0, %c0_i32, %c0_i32_0, %c0_i32_1 : i32, i32, i32, i32
  }
}

module attributes {stable_mosaic.version = 11 : i64} {
  func.func @conv3x3_relu_kernel(%arg0: i32, %arg1: i32, %arg2: memref<1x80x24xf32, #tpu.memory_space<vmem>>, %arg3: memref<3x24x16xf32, #tpu.memory_space<vmem>>, %arg4: memref<1x16xf32, #tpu.memory_space<vmem>>, %arg5: memref<1x64x16xf32, #tpu.memory_space<vmem>>) attributes {dimension_semantics = [#tpu.dimension_semantics<parallel>, #tpu.dimension_semantics<parallel>], iteration_bounds = array<i64: 2, 1>, scalar_prefetch = 0 : i64, scratch_operands = 0 : i64, tpu.core_type = #tpu.core_type<tc>, window_params = [{transform_indices = @transform_0, window_bounds = array<i64: 1, 80, 24>}, {pipeline_mode = #tpu.pipeline_mode<synchronous>, transform_indices = @transform_1, window_bounds = array<i64: 3, 24, 16>}, {pipeline_mode = #tpu.pipeline_mode<synchronous>, transform_indices = @transform_2, window_bounds = array<i64: 1, 16>}, {transform_indices = @transform_3, window_bounds = array<i64: 1, 64, 16>}]} {
    %cst = arith.constant 0.000000e+00 : f32
    %0 = vector.broadcast %cst : f32 to vector<64x16xf32>
    %c0 = arith.constant 0 : index
    %c0_0 = arith.constant 0 : index
    %c0_1 = arith.constant 0 : index
    %1 = vector.load %arg2[%c0, %c0_0, %c0_1] : memref<1x80x24xf32, #tpu.memory_space<vmem>>, vector<1x64x24xf32>
    %2 = vector.shape_cast %1 : vector<1x64x24xf32> to vector<64x24xf32>
    %c0_2 = arith.constant 0 : index
    %c0_3 = arith.constant 0 : index
    %c0_4 = arith.constant 0 : index
    %3 = vector.load %arg3[%c0_2, %c0_3, %c0_4] : memref<3x24x16xf32, #tpu.memory_space<vmem>>, vector<1x24x16xf32>
    %4 = vector.shape_cast %3 : vector<1x24x16xf32> to vector<24x16xf32>
    %cst_5 = arith.constant dense<0.000000e+00> : vector<64x16xf32>
    %5 = tpu.matmul %2, %4, %cst_5 {dimension_numbers = #tpu.dot_dimension_numbers<[1], [0], [0], [1], [0, 0, 1, 1], [], []>} : vector<64x24xf32>, vector<24x16xf32>, vector<64x16xf32> -> vector<64x16xf32>
    %6 = arith.addf %0, %5 : vector<64x16xf32>
    %c0_6 = arith.constant 0 : index
    %c8 = arith.constant 8 : index
    %c0_7 = arith.constant 0 : index
    %7 = vector.load %arg2[%c0_6, %c8, %c0_7] : memref<1x80x24xf32, #tpu.memory_space<vmem>>, vector<1x64x24xf32>
    %8 = vector.shape_cast %7 : vector<1x64x24xf32> to vector<64x24xf32>
    %c1 = arith.constant 1 : index
    %c0_8 = arith.constant 0 : index
    %c0_9 = arith.constant 0 : index
    %9 = vector.load %arg3[%c1, %c0_8, %c0_9] : memref<3x24x16xf32, #tpu.memory_space<vmem>>, vector<1x24x16xf32>
    %10 = vector.shape_cast %9 : vector<1x24x16xf32> to vector<24x16xf32>
    %cst_10 = arith.constant dense<0.000000e+00> : vector<64x16xf32>
    %11 = tpu.matmul %8, %10, %cst_10 {dimension_numbers = #tpu.dot_dimension_numbers<[1], [0], [0], [1], [0, 0, 1, 1], [], []>} : vector<64x24xf32>, vector<24x16xf32>, vector<64x16xf32> -> vector<64x16xf32>
    %12 = arith.addf %6, %11 : vector<64x16xf32>
    %c0_11 = arith.constant 0 : index
    %c16 = arith.constant 16 : index
    %c0_12 = arith.constant 0 : index
    %13 = vector.load %arg2[%c0_11, %c16, %c0_12] : memref<1x80x24xf32, #tpu.memory_space<vmem>>, vector<1x64x24xf32>
    %14 = vector.shape_cast %13 : vector<1x64x24xf32> to vector<64x24xf32>
    %c2 = arith.constant 2 : index
    %c0_13 = arith.constant 0 : index
    %c0_14 = arith.constant 0 : index
    %15 = vector.load %arg3[%c2, %c0_13, %c0_14] : memref<3x24x16xf32, #tpu.memory_space<vmem>>, vector<1x24x16xf32>
    %16 = vector.shape_cast %15 : vector<1x24x16xf32> to vector<24x16xf32>
    %cst_15 = arith.constant dense<0.000000e+00> : vector<64x16xf32>
    %17 = tpu.matmul %14, %16, %cst_15 {dimension_numbers = #tpu.dot_dimension_numbers<[1], [0], [0], [1], [0, 0, 1, 1], [], []>} : vector<64x24xf32>, vector<24x16xf32>, vector<64x16xf32> -> vector<64x16xf32>
    %18 = arith.addf %12, %17 : vector<64x16xf32>
    %c0_16 = arith.constant 0 : index
    %c0_17 = arith.constant 0 : index
    %19 = vector.load %arg4[%c0_16, %c0_17] : memref<1x16xf32, #tpu.memory_space<vmem>>, vector<1x16xf32>
    %20 = vector.broadcast %19 : vector<1x16xf32> to vector<64x16xf32>
    %21 = arith.addf %18, %20 : vector<64x16xf32>
    %cst_18 = arith.constant 0.000000e+00 : f32
    %22 = vector.broadcast %cst_18 : f32 to vector<64x16xf32>
    %23 = arith.maximumf %21, %22 : vector<64x16xf32>
    %c0_19 = arith.constant 0 : index
    %c0_20 = arith.constant 0 : index
    %c0_21 = arith.constant 0 : index
    %24 = vector.load %arg5[%c0_19, %c0_20, %c0_21] : memref<1x64x16xf32, #tpu.memory_space<vmem>>, vector<1x64x16xf32>
    %25 = vector.shape_cast %24 : vector<1x64x16xf32> to vector<64x16xf32>
    %26 = vector.shape_cast %23 : vector<64x16xf32> to vector<1x64x16xf32>
    tpu.vector_store %arg5[%c0_19, %c0_20, %c0_21], %26 {strides = array<i32>} : memref<1x64x16xf32, #tpu.memory_space<vmem>>, vector<1x64x16xf32>,
    return
  }
  func.func @transform_0(%arg0: i32, %arg1: i32) -> (i32, i32, i32) {
    %c0_i32 = arith.constant 0 : i32
    %c0_i32_0 = arith.constant 0 : i32
    %c0_i32_1 = arith.constant 0 : i32
    return %arg0, %c0_i32, %c0_i32_0 : i32, i32, i32
  }
  func.func @transform_1(%arg0: i32, %arg1: i32) -> (i32, i32, i32) {
    %c0_i32 = arith.constant 0 : i32
    %c0_i32_0 = arith.constant 0 : i32
    %c0_i32_1 = arith.constant 0 : i32
    %c0_i32_2 = arith.constant 0 : i32
    return %c0_i32, %c0_i32_0, %c0_i32_1 : i32, i32, i32
  }
  func.func @transform_2(%arg0: i32, %arg1: i32) -> (i32, i32) {
    %c0_i32 = arith.constant 0 : i32
    %c0_i32_0 = arith.constant 0 : i32
    %c0_i32_1 = arith.constant 0 : i32
    return %c0_i32, %c0_i32_0 : i32, i32
  }
  func.func @transform_3(%arg0: i32, %arg1: i32) -> (i32, i32, i32) {
    %c0_i32 = arith.constant 0 : i32
    %c0_i32_0 = arith.constant 0 : i32
    return %arg0, %arg1, %c0_i32 : i32, i32, i32
  }
}

module attributes {stable_mosaic.version = 11 : i64} {
  func.func @maxpool2x2_kernel(%arg0: i32, %arg1: memref<1x8x4x32xf32, #tpu.memory_space<vmem>>, %arg2: memref<1x4x4x16xf32, #tpu.memory_space<vmem>>) attributes {dimension_semantics = [#tpu.dimension_semantics<parallel>], iteration_bounds = array<i64: 2>, scalar_prefetch = 0 : i64, scratch_operands = 0 : i64, tpu.core_type = #tpu.core_type<tc>, window_params = [{transform_indices = @transform_0, window_bounds = array<i64: 1, 8, 4, 32>}, {transform_indices = @transform_1, window_bounds = array<i64: 1, 4, 4, 16>}]} {
    %c0 = arith.constant 0 : index
    %c0_0 = arith.constant 0 : index
    %c0_1 = arith.constant 0 : index
    %c0_2 = arith.constant 0 : index
    %0 = vector.load %arg1[%c0, %c0_0, %c0_1, %c0_2] : memref<1x8x4x32xf32, #tpu.memory_space<vmem>>, vector<1x8x4x32xf32>
    %1 = vector.shape_cast %0 : vector<1x8x4x32xf32> to vector<8x4x32xf32>
    %2 = vector.extract_strided_slice %1 {offsets = [0, 0, 0], sizes = [8, 4, 16], strides = [1, 1, 1]} : vector<8x4x32xf32> to vector<8x4x16xf32>
    %3 = vector.extract_strided_slice %1 {offsets = [0, 0, 16], sizes = [8, 4, 16], strides = [1, 1, 1]} : vector<8x4x32xf32> to vector<8x4x16xf32>
    %4 = arith.maximumf %2, %3 : vector<8x4x16xf32>
    %5 = vector.shape_cast %4 : vector<8x4x16xf32> to vector<4x2x4x16xf32>
    %6 = vector.extract_strided_slice %5 {offsets = [0, 0, 0, 0], sizes = [4, 1, 4, 16], strides = [1, 1, 1, 1]} : vector<4x2x4x16xf32> to vector<4x1x4x16xf32>
    %7 = vector.shape_cast %6 : vector<4x1x4x16xf32> to vector<4x4x16xf32>
    %8 = vector.extract_strided_slice %5 {offsets = [0, 1, 0, 0], sizes = [4, 1, 4, 16], strides = [1, 1, 1, 1]} : vector<4x2x4x16xf32> to vector<4x1x4x16xf32>
    %9 = vector.shape_cast %8 : vector<4x1x4x16xf32> to vector<4x4x16xf32>
    %10 = arith.maximumf %7, %9 : vector<4x4x16xf32>
    %c0_3 = arith.constant 0 : index
    %c0_4 = arith.constant 0 : index
    %c0_5 = arith.constant 0 : index
    %c0_6 = arith.constant 0 : index
    %11 = vector.load %arg2[%c0_3, %c0_4, %c0_5, %c0_6] : memref<1x4x4x16xf32, #tpu.memory_space<vmem>>, vector<1x4x4x16xf32>
    %12 = vector.shape_cast %11 : vector<1x4x4x16xf32> to vector<4x4x16xf32>
    %13 = vector.shape_cast %10 : vector<4x4x16xf32> to vector<1x4x4x16xf32>
    tpu.vector_store %arg2[%c0_3, %c0_4, %c0_5, %c0_6], %13 {strides = array<i32>} : memref<1x4x4x16xf32, #tpu.memory_space<vmem>>, vector<1x4x4x16xf32>,
    return
  }
  func.func @transform_0(%arg0: i32) -> (i32, i32, i32, i32) {
    %c0_i32 = arith.constant 0 : i32
    %c0_i32_0 = arith.constant 0 : i32
    %c0_i32_1 = arith.constant 0 : i32
    %c0_i32_2 = arith.constant 0 : i32
    return %arg0, %c0_i32, %c0_i32_0, %c0_i32_1 : i32, i32, i32, i32
  }
  func.func @transform_1(%arg0: i32) -> (i32, i32, i32, i32) {
    %c0_i32 = arith.constant 0 : i32
    %c0_i32_0 = arith.constant 0 : i32
    %c0_i32_1 = arith.constant 0 : i32
    %c0_i32_2 = arith.constant 0 : i32
    return %arg0, %c0_i32, %c0_i32_0, %c0_i32_1 : i32, i32, i32, i32
  }
}

module attributes {stable_mosaic.version = 11 : i64} {
  func.func @conv3x3_relu_kernel(%arg0: i32, %arg1: i32, %arg2: memref<1x24x48xf32, #tpu.memory_space<vmem>>, %arg3: memref<3x48x32xf32, #tpu.memory_space<vmem>>, %arg4: memref<1x32xf32, #tpu.memory_space<vmem>>, %arg5: memref<1x16x32xf32, #tpu.memory_space<vmem>>) attributes {dimension_semantics = [#tpu.dimension_semantics<parallel>, #tpu.dimension_semantics<parallel>], iteration_bounds = array<i64: 2, 1>, scalar_prefetch = 0 : i64, scratch_operands = 0 : i64, tpu.core_type = #tpu.core_type<tc>, window_params = [{transform_indices = @transform_0, window_bounds = array<i64: 1, 24, 48>}, {pipeline_mode = #tpu.pipeline_mode<synchronous>, transform_indices = @transform_1, window_bounds = array<i64: 3, 48, 32>}, {pipeline_mode = #tpu.pipeline_mode<synchronous>, transform_indices = @transform_2, window_bounds = array<i64: 1, 32>}, {transform_indices = @transform_3, window_bounds = array<i64: 1, 16, 32>}]} {
    %cst = arith.constant 0.000000e+00 : f32
    %0 = vector.broadcast %cst : f32 to vector<16x32xf32>
    %c0 = arith.constant 0 : index
    %c0_0 = arith.constant 0 : index
    %c0_1 = arith.constant 0 : index
    %1 = vector.load %arg2[%c0, %c0_0, %c0_1] : memref<1x24x48xf32, #tpu.memory_space<vmem>>, vector<1x16x48xf32>
    %2 = vector.shape_cast %1 : vector<1x16x48xf32> to vector<16x48xf32>
    %c0_2 = arith.constant 0 : index
    %c0_3 = arith.constant 0 : index
    %c0_4 = arith.constant 0 : index
    %3 = vector.load %arg3[%c0_2, %c0_3, %c0_4] : memref<3x48x32xf32, #tpu.memory_space<vmem>>, vector<1x48x32xf32>
    %4 = vector.shape_cast %3 : vector<1x48x32xf32> to vector<48x32xf32>
    %cst_5 = arith.constant dense<0.000000e+00> : vector<16x32xf32>
    %5 = tpu.matmul %2, %4, %cst_5 {dimension_numbers = #tpu.dot_dimension_numbers<[1], [0], [0], [1], [0, 0, 1, 1], [], []>} : vector<16x48xf32>, vector<48x32xf32>, vector<16x32xf32> -> vector<16x32xf32>
    %6 = arith.addf %0, %5 : vector<16x32xf32>
    %c0_6 = arith.constant 0 : index
    %c4 = arith.constant 4 : index
    %c0_7 = arith.constant 0 : index
    %7 = vector.load %arg2[%c0_6, %c4, %c0_7] : memref<1x24x48xf32, #tpu.memory_space<vmem>>, vector<1x16x48xf32>
    %8 = vector.shape_cast %7 : vector<1x16x48xf32> to vector<16x48xf32>
    %c1 = arith.constant 1 : index
    %c0_8 = arith.constant 0 : index
    %c0_9 = arith.constant 0 : index
    %9 = vector.load %arg3[%c1, %c0_8, %c0_9] : memref<3x48x32xf32, #tpu.memory_space<vmem>>, vector<1x48x32xf32>
    %10 = vector.shape_cast %9 : vector<1x48x32xf32> to vector<48x32xf32>
    %cst_10 = arith.constant dense<0.000000e+00> : vector<16x32xf32>
    %11 = tpu.matmul %8, %10, %cst_10 {dimension_numbers = #tpu.dot_dimension_numbers<[1], [0], [0], [1], [0, 0, 1, 1], [], []>} : vector<16x48xf32>, vector<48x32xf32>, vector<16x32xf32> -> vector<16x32xf32>
    %12 = arith.addf %6, %11 : vector<16x32xf32>
    %c0_11 = arith.constant 0 : index
    %c8 = arith.constant 8 : index
    %c0_12 = arith.constant 0 : index
    %13 = vector.load %arg2[%c0_11, %c8, %c0_12] : memref<1x24x48xf32, #tpu.memory_space<vmem>>, vector<1x16x48xf32>
    %14 = vector.shape_cast %13 : vector<1x16x48xf32> to vector<16x48xf32>
    %c2 = arith.constant 2 : index
    %c0_13 = arith.constant 0 : index
    %c0_14 = arith.constant 0 : index
    %15 = vector.load %arg3[%c2, %c0_13, %c0_14] : memref<3x48x32xf32, #tpu.memory_space<vmem>>, vector<1x48x32xf32>
    %16 = vector.shape_cast %15 : vector<1x48x32xf32> to vector<48x32xf32>
    %cst_15 = arith.constant dense<0.000000e+00> : vector<16x32xf32>
    %17 = tpu.matmul %14, %16, %cst_15 {dimension_numbers = #tpu.dot_dimension_numbers<[1], [0], [0], [1], [0, 0, 1, 1], [], []>} : vector<16x48xf32>, vector<48x32xf32>, vector<16x32xf32> -> vector<16x32xf32>
    %18 = arith.addf %12, %17 : vector<16x32xf32>
    %c0_16 = arith.constant 0 : index
    %c0_17 = arith.constant 0 : index
    %19 = vector.load %arg4[%c0_16, %c0_17] : memref<1x32xf32, #tpu.memory_space<vmem>>, vector<1x32xf32>
    %20 = vector.broadcast %19 : vector<1x32xf32> to vector<16x32xf32>
    %21 = arith.addf %18, %20 : vector<16x32xf32>
    %cst_18 = arith.constant 0.000000e+00 : f32
    %22 = vector.broadcast %cst_18 : f32 to vector<16x32xf32>
    %23 = arith.maximumf %21, %22 : vector<16x32xf32>
    %c0_19 = arith.constant 0 : index
    %c0_20 = arith.constant 0 : index
    %c0_21 = arith.constant 0 : index
    %24 = vector.load %arg5[%c0_19, %c0_20, %c0_21] : memref<1x16x32xf32, #tpu.memory_space<vmem>>, vector<1x16x32xf32>
    %25 = vector.shape_cast %24 : vector<1x16x32xf32> to vector<16x32xf32>
    %26 = vector.shape_cast %23 : vector<16x32xf32> to vector<1x16x32xf32>
    tpu.vector_store %arg5[%c0_19, %c0_20, %c0_21], %26 {strides = array<i32>} : memref<1x16x32xf32, #tpu.memory_space<vmem>>, vector<1x16x32xf32>,
    return
  }
  func.func @transform_0(%arg0: i32, %arg1: i32) -> (i32, i32, i32) {
    %c0_i32 = arith.constant 0 : i32
    %c0_i32_0 = arith.constant 0 : i32
    %c0_i32_1 = arith.constant 0 : i32
    return %arg0, %c0_i32, %c0_i32_0 : i32, i32, i32
  }
  func.func @transform_1(%arg0: i32, %arg1: i32) -> (i32, i32, i32) {
    %c0_i32 = arith.constant 0 : i32
    %c0_i32_0 = arith.constant 0 : i32
    %c0_i32_1 = arith.constant 0 : i32
    %c0_i32_2 = arith.constant 0 : i32
    return %c0_i32, %c0_i32_0, %c0_i32_1 : i32, i32, i32
  }
  func.func @transform_2(%arg0: i32, %arg1: i32) -> (i32, i32) {
    %c0_i32 = arith.constant 0 : i32
    %c0_i32_0 = arith.constant 0 : i32
    %c0_i32_1 = arith.constant 0 : i32
    return %c0_i32, %c0_i32_0 : i32, i32
  }
  func.func @transform_3(%arg0: i32, %arg1: i32) -> (i32, i32, i32) {
    %c0_i32 = arith.constant 0 : i32
    %c0_i32_0 = arith.constant 0 : i32
    return %arg0, %arg1, %c0_i32 : i32, i32, i32
  }
}

module attributes {stable_mosaic.version = 11 : i64} {
  func.func @maxpool2x2_kernel(%arg0: i32, %arg1: memref<1x4x2x64xf32, #tpu.memory_space<vmem>>, %arg2: memref<1x2x2x32xf32, #tpu.memory_space<vmem>>) attributes {dimension_semantics = [#tpu.dimension_semantics<parallel>], iteration_bounds = array<i64: 2>, scalar_prefetch = 0 : i64, scratch_operands = 0 : i64, tpu.core_type = #tpu.core_type<tc>, window_params = [{transform_indices = @transform_0, window_bounds = array<i64: 1, 4, 2, 64>}, {transform_indices = @transform_1, window_bounds = array<i64: 1, 2, 2, 32>}]} {
    %c0 = arith.constant 0 : index
    %c0_0 = arith.constant 0 : index
    %c0_1 = arith.constant 0 : index
    %c0_2 = arith.constant 0 : index
    %0 = vector.load %arg1[%c0, %c0_0, %c0_1, %c0_2] : memref<1x4x2x64xf32, #tpu.memory_space<vmem>>, vector<1x4x2x64xf32>
    %1 = vector.shape_cast %0 : vector<1x4x2x64xf32> to vector<4x2x64xf32>
    %2 = vector.extract_strided_slice %1 {offsets = [0, 0, 0], sizes = [4, 2, 32], strides = [1, 1, 1]} : vector<4x2x64xf32> to vector<4x2x32xf32>
    %3 = vector.extract_strided_slice %1 {offsets = [0, 0, 32], sizes = [4, 2, 32], strides = [1, 1, 1]} : vector<4x2x64xf32> to vector<4x2x32xf32>
    %4 = arith.maximumf %2, %3 : vector<4x2x32xf32>
    %5 = vector.shape_cast %4 : vector<4x2x32xf32> to vector<2x2x2x32xf32>
    %6 = vector.extract_strided_slice %5 {offsets = [0, 0, 0, 0], sizes = [2, 1, 2, 32], strides = [1, 1, 1, 1]} : vector<2x2x2x32xf32> to vector<2x1x2x32xf32>
    %7 = vector.shape_cast %6 : vector<2x1x2x32xf32> to vector<2x2x32xf32>
    %8 = vector.extract_strided_slice %5 {offsets = [0, 1, 0, 0], sizes = [2, 1, 2, 32], strides = [1, 1, 1, 1]} : vector<2x2x2x32xf32> to vector<2x1x2x32xf32>
    %9 = vector.shape_cast %8 : vector<2x1x2x32xf32> to vector<2x2x32xf32>
    %10 = arith.maximumf %7, %9 : vector<2x2x32xf32>
    %c0_3 = arith.constant 0 : index
    %c0_4 = arith.constant 0 : index
    %c0_5 = arith.constant 0 : index
    %c0_6 = arith.constant 0 : index
    %11 = vector.load %arg2[%c0_3, %c0_4, %c0_5, %c0_6] : memref<1x2x2x32xf32, #tpu.memory_space<vmem>>, vector<1x2x2x32xf32>
    %12 = vector.shape_cast %11 : vector<1x2x2x32xf32> to vector<2x2x32xf32>
    %13 = vector.shape_cast %10 : vector<2x2x32xf32> to vector<1x2x2x32xf32>
    tpu.vector_store %arg2[%c0_3, %c0_4, %c0_5, %c0_6], %13 {strides = array<i32>} : memref<1x2x2x32xf32, #tpu.memory_space<vmem>>, vector<1x2x2x32xf32>,
    return
  }
  func.func @transform_0(%arg0: i32) -> (i32, i32, i32, i32) {
    %c0_i32 = arith.constant 0 : i32
    %c0_i32_0 = arith.constant 0 : i32
    %c0_i32_1 = arith.constant 0 : i32
    %c0_i32_2 = arith.constant 0 : i32
    return %arg0, %c0_i32, %c0_i32_0, %c0_i32_1 : i32, i32, i32, i32
  }
  func.func @transform_1(%arg0: i32) -> (i32, i32, i32, i32) {
    %c0_i32 = arith.constant 0 : i32
    %c0_i32_0 = arith.constant 0 : i32
    %c0_i32_1 = arith.constant 0 : i32
    %c0_i32_2 = arith.constant 0 : i32
    return %arg0, %c0_i32, %c0_i32_0, %c0_i32_1 : i32, i32, i32, i32
  }
}

module attributes {stable_mosaic.version = 11 : i64} {
  func.func @linear_kernel(%arg0: i32, %arg1: i32, %arg2: i32, %arg3: memref<2x128xf32, #tpu.memory_space<vmem>>, %arg4: memref<128x64xf32, #tpu.memory_space<vmem>>, %arg5: memref<1x64xf32, #tpu.memory_space<vmem>>, %arg6: memref<2x64xf32, #tpu.memory_space<vmem>>, %arg7: memref<2x64xf32, #tpu.memory_space<vmem>>) attributes {dimension_semantics = [#tpu.dimension_semantics<parallel>, #tpu.dimension_semantics<parallel>, #tpu.dimension_semantics<arbitrary>], iteration_bounds = array<i64: 1, 1, 1>, scalar_prefetch = 0 : i64, scratch_operands = 1 : i64, tpu.core_type = #tpu.core_type<tc>, window_params = [{transform_indices = @transform_0, window_bounds = array<i64: 2, 128>}, {transform_indices = @transform_1, window_bounds = array<i64: 128, 64>}, {transform_indices = @transform_2, window_bounds = array<i64: 1, 64>}, {transform_indices = @transform_3, window_bounds = array<i64: 2, 64>}]} {
    %c0_i32 = arith.constant 0 : i32
    %0 = arith.cmpi eq, %arg2, %c0_i32 : i32
    %1 = arith.extui %0 : i1 to i32
    %c0_i32_0 = arith.constant 0 : i32
    %2 = arith.cmpi ne, %1, %c0_i32_0 : i32
    scf.if %2 {
      %cst_10 = arith.constant 0.000000e+00 : f32
      %12 = vector.broadcast %cst_10 : f32 to vector<2x64xf32>
      %c0_11 = arith.constant 0 : index
      %c0_12 = arith.constant 0 : index
      %13 = vector.load %arg7[%c0_11, %c0_12] : memref<2x64xf32, #tpu.memory_space<vmem>>, vector<2x64xf32>
      tpu.vector_store %arg7[%c0_11, %c0_12], %12 {strides = array<i32>} : memref<2x64xf32, #tpu.memory_space<vmem>>, vector<2x64xf32>,
    } else {
    }
    %c0 = arith.constant 0 : index
    %c0_1 = arith.constant 0 : index
    %3 = vector.load %arg7[%c0, %c0_1] : memref<2x64xf32, #tpu.memory_space<vmem>>, vector<2x64xf32>
    %c0_2 = arith.constant 0 : index
    %c0_3 = arith.constant 0 : index
    %4 = vector.load %arg3[%c0_2, %c0_3] : memref<2x128xf32, #tpu.memory_space<vmem>>, vector<2x128xf32>
    %c0_4 = arith.constant 0 : index
    %c0_5 = arith.constant 0 : index
    %5 = vector.load %arg4[%c0_4, %c0_5] : memref<128x64xf32, #tpu.memory_space<vmem>>, vector<128x64xf32>
    %cst = arith.constant dense<0.000000e+00> : vector<2x64xf32>
    %6 = tpu.matmul %4, %5, %cst {dimension_numbers = #tpu.dot_dimension_numbers<[1], [0], [0], [1], [0, 0, 1, 1], [], []>} : vector<2x128xf32>, vector<128x64xf32>, vector<2x64xf32> -> vector<2x64xf32>
    %7 = arith.addf %3, %6 : vector<2x64xf32>
    %c0_6 = arith.constant 0 : index
    %c0_7 = arith.constant 0 : index
    %8 = vector.load %arg7[%c0_6, %c0_7] : memref<2x64xf32, #tpu.memory_space<vmem>>, vector<2x64xf32>
    tpu.vector_store %arg7[%c0_6, %c0_7], %7 {strides = array<i32>} : memref<2x64xf32, #tpu.memory_space<vmem>>, vector<2x64xf32>,
    %c0_i32_8 = arith.constant 0 : i32
    %9 = arith.cmpi eq, %arg2, %c0_i32_8 : i32
    %10 = arith.extui %9 : i1 to i32
    %c0_i32_9 = arith.constant 0 : i32
    %11 = arith.cmpi ne, %10, %c0_i32_9 : i32
    scf.if %11 {
      %c0_10 = arith.constant 0 : index
      %c0_11 = arith.constant 0 : index
      %12 = vector.load %arg7[%c0_10, %c0_11] : memref<2x64xf32, #tpu.memory_space<vmem>>, vector<2x64xf32>
      %c0_12 = arith.constant 0 : index
      %c0_13 = arith.constant 0 : index
      %13 = vector.load %arg5[%c0_12, %c0_13] : memref<1x64xf32, #tpu.memory_space<vmem>>, vector<1x64xf32>
      %14 = vector.broadcast %13 : vector<1x64xf32> to vector<2x64xf32>
      %15 = arith.addf %12, %14 : vector<2x64xf32>
      %cst_14 = arith.constant 0.000000e+00 : f32
      %16 = vector.broadcast %cst_14 : f32 to vector<2x64xf32>
      %17 = arith.maximumf %15, %16 : vector<2x64xf32>
      %c0_15 = arith.constant 0 : index
      %c0_16 = arith.constant 0 : index
      %18 = vector.load %arg6[%c0_15, %c0_16] : memref<2x64xf32, #tpu.memory_space<vmem>>, vector<2x64xf32>
      tpu.vector_store %arg6[%c0_15, %c0_16], %17 {strides = array<i32>} : memref<2x64xf32, #tpu.memory_space<vmem>>, vector<2x64xf32>,
    } else {
    }
    return
  }
  func.func @transform_0(%arg0: i32, %arg1: i32, %arg2: i32) -> (i32, i32) {
    %c0_i32 = arith.constant 0 : i32
    return %arg0, %arg2 : i32, i32
  }
  func.func @transform_1(%arg0: i32, %arg1: i32, %arg2: i32) -> (i32, i32) {
    %c0_i32 = arith.constant 0 : i32
    return %arg2, %arg1 : i32, i32
  }
  func.func @transform_2(%arg0: i32, %arg1: i32, %arg2: i32) -> (i32, i32) {
    %c0_i32 = arith.constant 0 : i32
    %c0_i32_0 = arith.constant 0 : i32
    return %c0_i32, %arg1 : i32, i32
  }
  func.func @transform_3(%arg0: i32, %arg1: i32, %arg2: i32) -> (i32, i32) {
    %c0_i32 = arith.constant 0 : i32
    return %arg0, %arg1 : i32, i32
  }
}

module attributes {stable_mosaic.version = 11 : i64} {
  func.func @linear_kernel(%arg0: i32, %arg1: i32, %arg2: i32, %arg3: memref<2x64xf32, #tpu.memory_space<vmem>>, %arg4: memref<64x64xf32, #tpu.memory_space<vmem>>, %arg5: memref<1x64xf32, #tpu.memory_space<vmem>>, %arg6: memref<2x64xf32, #tpu.memory_space<vmem>>, %arg7: memref<2x64xf32, #tpu.memory_space<vmem>>) attributes {dimension_semantics = [#tpu.dimension_semantics<parallel>, #tpu.dimension_semantics<parallel>, #tpu.dimension_semantics<arbitrary>], iteration_bounds = array<i64: 1, 1, 1>, scalar_prefetch = 0 : i64, scratch_operands = 1 : i64, tpu.core_type = #tpu.core_type<tc>, window_params = [{transform_indices = @transform_0, window_bounds = array<i64: 2, 64>}, {transform_indices = @transform_1, window_bounds = array<i64: 64, 64>}, {transform_indices = @transform_2, window_bounds = array<i64: 1, 64>}, {transform_indices = @transform_3, window_bounds = array<i64: 2, 64>}]} {
    %c0_i32 = arith.constant 0 : i32
    %0 = arith.cmpi eq, %arg2, %c0_i32 : i32
    %1 = arith.extui %0 : i1 to i32
    %c0_i32_0 = arith.constant 0 : i32
    %2 = arith.cmpi ne, %1, %c0_i32_0 : i32
    scf.if %2 {
      %cst_10 = arith.constant 0.000000e+00 : f32
      %12 = vector.broadcast %cst_10 : f32 to vector<2x64xf32>
      %c0_11 = arith.constant 0 : index
      %c0_12 = arith.constant 0 : index
      %13 = vector.load %arg7[%c0_11, %c0_12] : memref<2x64xf32, #tpu.memory_space<vmem>>, vector<2x64xf32>
      tpu.vector_store %arg7[%c0_11, %c0_12], %12 {strides = array<i32>} : memref<2x64xf32, #tpu.memory_space<vmem>>, vector<2x64xf32>,
    } else {
    }
    %c0 = arith.constant 0 : index
    %c0_1 = arith.constant 0 : index
    %3 = vector.load %arg7[%c0, %c0_1] : memref<2x64xf32, #tpu.memory_space<vmem>>, vector<2x64xf32>
    %c0_2 = arith.constant 0 : index
    %c0_3 = arith.constant 0 : index
    %4 = vector.load %arg3[%c0_2, %c0_3] : memref<2x64xf32, #tpu.memory_space<vmem>>, vector<2x64xf32>
    %c0_4 = arith.constant 0 : index
    %c0_5 = arith.constant 0 : index
    %5 = vector.load %arg4[%c0_4, %c0_5] : memref<64x64xf32, #tpu.memory_space<vmem>>, vector<64x64xf32>
    %cst = arith.constant dense<0.000000e+00> : vector<2x64xf32>
    %6 = tpu.matmul %4, %5, %cst {dimension_numbers = #tpu.dot_dimension_numbers<[1], [0], [0], [1], [0, 0, 1, 1], [], []>} : vector<2x64xf32>, vector<64x64xf32>, vector<2x64xf32> -> vector<2x64xf32>
    %7 = arith.addf %3, %6 : vector<2x64xf32>
    %c0_6 = arith.constant 0 : index
    %c0_7 = arith.constant 0 : index
    %8 = vector.load %arg7[%c0_6, %c0_7] : memref<2x64xf32, #tpu.memory_space<vmem>>, vector<2x64xf32>
    tpu.vector_store %arg7[%c0_6, %c0_7], %7 {strides = array<i32>} : memref<2x64xf32, #tpu.memory_space<vmem>>, vector<2x64xf32>,
    %c0_i32_8 = arith.constant 0 : i32
    %9 = arith.cmpi eq, %arg2, %c0_i32_8 : i32
    %10 = arith.extui %9 : i1 to i32
    %c0_i32_9 = arith.constant 0 : i32
    %11 = arith.cmpi ne, %10, %c0_i32_9 : i32
    scf.if %11 {
      %c0_10 = arith.constant 0 : index
      %c0_11 = arith.constant 0 : index
      %12 = vector.load %arg7[%c0_10, %c0_11] : memref<2x64xf32, #tpu.memory_space<vmem>>, vector<2x64xf32>
      %c0_12 = arith.constant 0 : index
      %c0_13 = arith.constant 0 : index
      %13 = vector.load %arg5[%c0_12, %c0_13] : memref<1x64xf32, #tpu.memory_space<vmem>>, vector<1x64xf32>
      %14 = vector.broadcast %13 : vector<1x64xf32> to vector<2x64xf32>
      %15 = arith.addf %12, %14 : vector<2x64xf32>
      %cst_14 = arith.constant 0.000000e+00 : f32
      %16 = vector.broadcast %cst_14 : f32 to vector<2x64xf32>
      %17 = arith.maximumf %15, %16 : vector<2x64xf32>
      %c0_15 = arith.constant 0 : index
      %c0_16 = arith.constant 0 : index
      %18 = vector.load %arg6[%c0_15, %c0_16] : memref<2x64xf32, #tpu.memory_space<vmem>>, vector<2x64xf32>
      tpu.vector_store %arg6[%c0_15, %c0_16], %17 {strides = array<i32>} : memref<2x64xf32, #tpu.memory_space<vmem>>, vector<2x64xf32>,
    } else {
    }
    return
  }
  func.func @transform_0(%arg0: i32, %arg1: i32, %arg2: i32) -> (i32, i32) {
    %c0_i32 = arith.constant 0 : i32
    return %arg0, %arg2 : i32, i32
  }
  func.func @transform_1(%arg0: i32, %arg1: i32, %arg2: i32) -> (i32, i32) {
    %c0_i32 = arith.constant 0 : i32
    return %arg2, %arg1 : i32, i32
  }
  func.func @transform_2(%arg0: i32, %arg1: i32, %arg2: i32) -> (i32, i32) {
    %c0_i32 = arith.constant 0 : i32
    %c0_i32_0 = arith.constant 0 : i32
    return %c0_i32, %arg1 : i32, i32
  }
  func.func @transform_3(%arg0: i32, %arg1: i32, %arg2: i32) -> (i32, i32) {
    %c0_i32 = arith.constant 0 : i32
    return %arg0, %arg1 : i32, i32
  }
}

module attributes {stable_mosaic.version = 11 : i64} {
  func.func @linear_kernel(%arg0: i32, %arg1: i32, %arg2: i32, %arg3: memref<2x64xf32, #tpu.memory_space<vmem>>, %arg4: memref<64x10xf32, #tpu.memory_space<vmem>>, %arg5: memref<1x10xf32, #tpu.memory_space<vmem>>, %arg6: memref<2x10xf32, #tpu.memory_space<vmem>>, %arg7: memref<2x10xf32, #tpu.memory_space<vmem>>) attributes {dimension_semantics = [#tpu.dimension_semantics<parallel>, #tpu.dimension_semantics<parallel>, #tpu.dimension_semantics<arbitrary>], iteration_bounds = array<i64: 1, 1, 1>, scalar_prefetch = 0 : i64, scratch_operands = 1 : i64, tpu.core_type = #tpu.core_type<tc>, window_params = [{transform_indices = @transform_0, window_bounds = array<i64: 2, 64>}, {transform_indices = @transform_1, window_bounds = array<i64: 64, 10>}, {transform_indices = @transform_2, window_bounds = array<i64: 1, 10>}, {transform_indices = @transform_3, window_bounds = array<i64: 2, 10>}]} {
    %c0_i32 = arith.constant 0 : i32
    %0 = arith.cmpi eq, %arg2, %c0_i32 : i32
    %1 = arith.extui %0 : i1 to i32
    %c0_i32_0 = arith.constant 0 : i32
    %2 = arith.cmpi ne, %1, %c0_i32_0 : i32
    scf.if %2 {
      %cst_10 = arith.constant 0.000000e+00 : f32
      %12 = vector.broadcast %cst_10 : f32 to vector<2x10xf32>
      %c0_11 = arith.constant 0 : index
      %c0_12 = arith.constant 0 : index
      %13 = vector.load %arg7[%c0_11, %c0_12] : memref<2x10xf32, #tpu.memory_space<vmem>>, vector<2x10xf32>
      tpu.vector_store %arg7[%c0_11, %c0_12], %12 {strides = array<i32>} : memref<2x10xf32, #tpu.memory_space<vmem>>, vector<2x10xf32>,
    } else {
    }
    %c0 = arith.constant 0 : index
    %c0_1 = arith.constant 0 : index
    %3 = vector.load %arg7[%c0, %c0_1] : memref<2x10xf32, #tpu.memory_space<vmem>>, vector<2x10xf32>
    %c0_2 = arith.constant 0 : index
    %c0_3 = arith.constant 0 : index
    %4 = vector.load %arg3[%c0_2, %c0_3] : memref<2x64xf32, #tpu.memory_space<vmem>>, vector<2x64xf32>
    %c0_4 = arith.constant 0 : index
    %c0_5 = arith.constant 0 : index
    %5 = vector.load %arg4[%c0_4, %c0_5] : memref<64x10xf32, #tpu.memory_space<vmem>>, vector<64x10xf32>
    %cst = arith.constant dense<0.000000e+00> : vector<2x10xf32>
    %6 = tpu.matmul %4, %5, %cst {dimension_numbers = #tpu.dot_dimension_numbers<[1], [0], [0], [1], [0, 0, 1, 1], [], []>} : vector<2x64xf32>, vector<64x10xf32>, vector<2x10xf32> -> vector<2x10xf32>
    %7 = arith.addf %3, %6 : vector<2x10xf32>
    %c0_6 = arith.constant 0 : index
    %c0_7 = arith.constant 0 : index
    %8 = vector.load %arg7[%c0_6, %c0_7] : memref<2x10xf32, #tpu.memory_space<vmem>>, vector<2x10xf32>
    tpu.vector_store %arg7[%c0_6, %c0_7], %7 {strides = array<i32>} : memref<2x10xf32, #tpu.memory_space<vmem>>, vector<2x10xf32>,
    %c0_i32_8 = arith.constant 0 : i32
    %9 = arith.cmpi eq, %arg2, %c0_i32_8 : i32
    %10 = arith.extui %9 : i1 to i32
    %c0_i32_9 = arith.constant 0 : i32
    %11 = arith.cmpi ne, %10, %c0_i32_9 : i32
    scf.if %11 {
      %c0_10 = arith.constant 0 : index
      %c0_11 = arith.constant 0 : index
      %12 = vector.load %arg7[%c0_10, %c0_11] : memref<2x10xf32, #tpu.memory_space<vmem>>, vector<2x10xf32>
      %c0_12 = arith.constant 0 : index
      %c0_13 = arith.constant 0 : index
      %13 = vector.load %arg5[%c0_12, %c0_13] : memref<1x10xf32, #tpu.memory_space<vmem>>, vector<1x10xf32>
      %14 = vector.broadcast %13 : vector<1x10xf32> to vector<2x10xf32>
      %15 = arith.addf %12, %14 : vector<2x10xf32>
      %c0_14 = arith.constant 0 : index
      %c0_15 = arith.constant 0 : index
      %16 = vector.load %arg6[%c0_14, %c0_15] : memref<2x10xf32, #tpu.memory_space<vmem>>, vector<2x10xf32>
      tpu.vector_store %arg6[%c0_14, %c0_15], %15 {strides = array<i32>} : memref<2x10xf32, #tpu.memory_space<vmem>>, vector<2x10xf32>,
    } else {
    }
    return
  }
  func.func @transform_0(%arg0: i32, %arg1: i32, %arg2: i32) -> (i32, i32) {
    %c0_i32 = arith.constant 0 : i32
    return %arg0, %arg2 : i32, i32
  }
  func.func @transform_1(%arg0: i32, %arg1: i32, %arg2: i32) -> (i32, i32) {
    %c0_i32 = arith.constant 0 : i32
    return %arg2, %arg1 : i32, i32
  }
  func.func @transform_2(%arg0: i32, %arg1: i32, %arg2: i32) -> (i32, i32) {
    %c0_i32 = arith.constant 0 : i32
    %c0_i32_0 = arith.constant 0 : i32
    return %c0_i32, %arg1 : i32, i32
  }
  func.func @transform_3(%arg0: i32, %arg1: i32, %arg2: i32) -> (i32, i32) {
    %c0_i32 = arith.constant 0 : i32
    return %arg0, %arg1 : i32, i32
  }
}

</mosaic_0001>

<bundles_post_ra>
// kernel: _lambda_.10
= control target key start
LH: loop header
LB: loop body
LE: loop exit
PB: predicated region body
PF: predicated region fallthrough
CT: control target
= control target key end

     0   :  { %8 = vsyncpa [#allocation3], 0  ;;  %s2725_s0 = inlined_call_operand.hbm [shape: f32[2,288,9], index: 0, kind: input, shape index: {}]   ;;  %s2726_s1 = inlined_call_operand.hbm [shape: f32[3,9,8], index: 1, kind: input, shape index: {}]   ;;  %s2727_s2 = inlined_call_operand.hbm [shape: f32[1,8], index: 2, kind: input, shape index: {}]   ;;  %s2728_s3 = inlined_call_operand.hbm [shape: f32[2,256,8], index: 3, kind: output, shape index: {}]  }
   0x1   :  { %10 = vsyncpa [#allocation3 + $0x1], 0 }
   0x2   :  { %11 = vsyncpa [#allocation6], 0 }
   0x3   :  { %12 = vsyncpa [#allocation4], 0 }
   0x4   :  { %14 = vsyncpa [#allocation4 + $0x1], 0  ;;  %s2197_s12 = smov 0   ;;  %s2199_s13 = smov 0  }
   0x5   :  { %s2201_s14 = smov 0   ;;  %s2203_s15 = smov 0  }
   0x6   :  { %s2205_s16 = smov 0   ;;  %s2207_s17 = smov 0  }
   0x7 LB: > { %s1444_s18 = sadd.s32 4294967295, %s2166_s17   ;;  %s1445_s19 = sadd.s32 4294967294, %s2166_s17   ;;  %s2166_s17 = sphi %s2207_s17, %s20_s17   ;;  %s2162_s16 = sphi %s2205_s16, %s2752_s16   ;;  %s2158_s15 = sphi %s2203_s15, %s2751_s15   ;;  %s2154_s14 = sphi %s2201_s14, %s2750_s14   ;;  %s2150_s13 = sphi %s2199_s13, %s2749_s13   ;;  %s2146_s12 = sphi %s2197_s12, %s2748_s12  }
   0x8   : > { %p52_p0 = scmp.ne.s32.totalorder %s2150_s13, %s2146_s12  ;;  %p2231_p1 = scmp.eq.s32.totalorder %s1444_s18, 0 }
   0x9   : > { %p2235_p2 = scmp.eq.s32.totalorder %s1444_s18, 1  ;;  %p126_p3 = scmp.eq.s32.totalorder %s1445_s19, 1 }
   0xa   : > { %s2733_s20 = scalar_select %p2231_p1, 1, 0 }
   0xb   : > { %p2241_p4 = por %p2231_p1, %p52_p0  ;;  %p1446_p5 = scmp.ge.s32.totalorder %s2166_s17, 1 }
   0xc   : > { %p2246_p6 = por %p126_p3, %p52_p0  ;;  %p133_p7 = scmp.lt.s32.totalorder %s2166_s17, 3 }
   0xd   : > { %s2735_s22 = scalar_select %p2241_p4, 1, 0 }
   0xe   : > { %s2736_s23 = scalar_select %p2246_p6, 1, 0 }
   0xf   : > { %p2251_p8 = pnand %p1446_p5, %p133_p7  ;;  %s2168_s25 = smov [#allocation5]  }
  0x10   : > { %s145_s26 = sshll.u32 %s2168_s25, 4  ;;  %s2169_s28 = smov [#allocation7]   ;;  %s2255_s26 = int_to_ptr.vmem [resolvable:$true] %s145_s26 }
  0x11   : > { %p1918_p9 = pneg %p2251_p8  ;;  %s159_s29 = sshll.u32 %s2169_s28, 4  ;;  %s2266_s29 = int_to_ptr.vmem [resolvable:$true] %s159_s29 }
  0x12   : > { %s1994_s5 = scalar_lea.hbm %s2726_s1, 768 }
  0x13   : > { %p2262_p11 = pnand %p1918_p9, %p2231_p1  ;;  %p1995_p12 = scmp.ne.s32.totalorder %s2726_s1, %s1994_s5 }
  0x14   : > { %p2001_p5 = scmp.lt.u32.totalorder %s1994_s5, %s2726_s1 }
  0x15   : > { %p1996_p13 = pneg %p2262_p11 }
  0x17   : > { %p1997_p0 = pnand %p1996_p13, %p1995_p12 }
  0x19   : > { %p1998_p3 = pneg %p1997_p0 }
  0x1b   : > { %p2003_p7 = pnand %p2001_p5, %p1998_p3 }
  0x1d   : > { %2006 = shalt.err (!%p2003_p7)
}
  0x1e   : > { %s2007_s10 = scalar_lea.vmem %s2255_s26, 768  ;;  %p2015_p1 = scmp.lt.s32.totalorder %s2255_s26, %s2255_s26 }
  0x1f   : > { %p2008_p9 = scmp.ne.s32.totalorder %s2255_s26, %s2007_s10  ;;  %p2016_p12 = scmp.lt.s32.totalorder %s2007_s10, %s2007_s10 }
  0x21   : > { %p2010_p10 = pnand %p2008_p9, %p1996_p13  ;;  %p2017_p0 = por %p2016_p12, %p2015_p1 }
  0x23   : > { %p2011_p6 = pneg %p2010_p10 }
  0x25   : > { %p2018_p4 = pnand %p2017_p0, %p2011_p6 }
  0x27   : > { %2021 = shalt.err (!%p2018_p4)
}
  0x28   : > { %s2170_s11 = smov 128   ;;  %s2171_s18 = smov 8  }
  0x29   : > { %1921 = dma.hbm_to_vmem [thread:$0]  (!%p2262_p11), %s2726_s1, 768, %s2255_s26, [#allocation6], %s2170_s11, %s2170_s11, %s2171_s18  }
  0x2a   : > { %s2022_s4 = scalar_lea.hbm %s2727_s2, 16 }
  0x2b   : > { %p2023_p1 = scmp.ne.s32.totalorder %s2727_s2, %s2022_s4  ;;  %p2029_p10 = scmp.lt.u32.totalorder %s2022_s4, %s2727_s2 }
  0x2d   : > { %p2025_p4 = pnand %p2023_p1, %p1996_p13 }
  0x2f   : > { %p2026_p6 = pneg %p2025_p4 }
  0x31   : > { %p2031_p3 = pnand %p2029_p10, %p2026_p6 }
  0x33   : > { %2034 = shalt.err (!%p2031_p3)
}
  0x34   : > { %s2035_s26 = scalar_lea.vmem %s2266_s29, 16  ;;  %s2042_s9 = scalar_lea.vmem %s2266_s29, 32 }
  0x35   : > { %p2036_p5 = scmp.ne.s32.totalorder %s2266_s29, %s2035_s26  ;;  %p2043_p12 = scmp.lt.s32.totalorder %s2266_s29, %s2266_s29 }
  0x36   : > { %p2044_p0 = scmp.lt.s32.totalorder %s2042_s9, %s2035_s26 }
  0x37   : > { %p2038_p7 = pnand %p2036_p5, %p1996_p13 }
  0x38   : > { %p2045_p1 = por %p2044_p0, %p2043_p12 }
  0x39   : > { %p2039_p9 = pneg %p2038_p7 }
  0x3b   : > { %p2046_p4 = pnand %p2045_p1, %p2039_p9 }
  0x3d   : > { %2049 = shalt.err (!%p2046_p4)
}
  0x3e   : > { %1924 = dma.hbm_to_vmem [thread:$0]  (!%p2262_p11), %s2727_s2, 16, %s2266_s29, [#allocation6]  }
  0x3f   : > { %s32_s25 = sadd.s32 1, %s2162_s16  ;;  %s39_s28 = sadd.s32 1, %s2154_s14 }
  0x40   : > { %p34_p13 = scmp.ge.s32.totalorder %s32_s25, 2  ;;  %p46_p6 = scmp.ne.s32.totalorder %s2154_s14, %s2150_s13 }
  0x41   : > { %p47_p10 = scmp.eq.s32.totalorder %s2166_s17, 0  ;;  %p1935_p3 = scmp.lt.s32.totalorder %s2166_s17, 2 }
  0x42   : > { %s2754_s25 = smov (%p34_p13, %s32_s25), 0  ;;  %p2334_p7 = por %p2235_p2, %p46_p6 }
  0x43   : > { %p48_p5 = por %p47_p10, %p46_p6  ;;  %s36_s30 = ssub.s32 %s2162_s16, %s2754_s25 }
  0x44   : > { %s2739_s27 = scalar_select %p2334_p7, 1, 0 }
  0x45   : > { %s170_s4 = sand.u32 1, %s2154_s14   ;;  %p37_p9 = scmp.eq.s32.totalorder %s36_s30, 0 }
  0x46   : > { %s1903_s29 = smul.u32 288, %s170_s4  ;;  %p2341_p11 = pnand %p1935_p3, %p48_p5 }
  0x47   : > { %s2346_s6 = scalar_select %p37_p9, %s2154_s14, %s39_s28  }
  0x48   : > { %s1904_s7 = smul.u32 4608, %s2162_s16  ;;  %s174_s8 = scalar_lea.vmem [#allocation2], %s1903_s29 }
  0x49   : > { %s181_s26 = sshll.u32 %s174_s8, 4  ;;  %s2356_s19 = scalar_lea.sflag [#allocation3], %s170_s4  ;;  %s2354_s26 = int_to_ptr.vmem [resolvable:$true] %s181_s26 }
  0x4a   : > { %s2352_s10 = scalar_lea.hbm %s2725_s0, %s1904_s7  ;;  %p2052_p12 = pneg %p2341_p11 }
  0x4b   : > { %s2050_s30 = scalar_lea.hbm %s2352_s10, 4608  ;;  %s2055_s7 = scalar_lea.hbm %s2725_s0, 9216 }
  0x4c   : > { %p2051_p2 = scmp.ne.s32.totalorder %s2352_s10, %s2050_s30  ;;  %p2056_p4 = scmp.lt.u32.totalorder %s2352_s10, %s2725_s0 }
  0x4d   : > { %p2057_p13 = scmp.lt.u32.totalorder %s2055_s7, %s2050_s30  ;;  %p2059_p10 = scmp.lt.u32.totalorder %s2050_s30, %s2352_s10 }
  0x4e   : > { %p2053_p0 = pnand %p2052_p12, %p2051_p2 }
  0x4f   : > { %p2058_p6 = por %p2057_p13, %p2056_p4 }
  0x50   : > { %p2054_p1 = pneg %p2053_p0 }
  0x51   : > { %p2060_p3 = por %p2059_p10, %p2058_p6 }
  0x53   : > { %p2061_p5 = pnand %p2060_p3, %p2054_p1 }
  0x55   : > { %2064 = shalt.err (!%p2061_p5)
}
  0x56   : > { %s2065_s4 = scalar_lea.vmem %s2354_s26, 4608  ;;  %s2172_s9 = smov [#allocation2]  }
  0x57   : > { %p2066_p9 = scmp.ne.s32.totalorder %s2354_s26, %s2065_s4  ;;  %s2070_s28 = sshll.u32 %s2172_s9, 4  ;;  %s2071_s28 = int_to_ptr.vmem [resolvable:$false] %s2070_s28 }
  0x58   : > { %s2072_s29 = scalar_lea.vmem %s2071_s28, 9216  ;;  %p2073_p7 = scmp.lt.s32.totalorder %s2354_s26, %s2071_s28 }
  0x59   : > { %p2068_p2 = pnand %p2066_p9, %p2052_p12  ;;  %p2074_p4 = scmp.lt.s32.totalorder %s2072_s29, %s2065_s4 }
  0x5b   : > { %p2069_p0 = pneg %p2068_p2  ;;  %p2075_p13 = por %p2074_p4, %p2073_p7 }
  0x5d   : > { %p2076_p6 = pnand %p2075_p13, %p2069_p0 }
  0x5f   : > { %2079 = shalt.err (!%p2076_p6)
}
  0x60   : > { %1928 = dma.hbm_to_vmem [thread:$0]  (!%p2341_p11), %s2352_s10, 4608, %s2354_s26, %s2356_s19, %s2170_s11, %s2170_s11, %s2171_s18  }
  0x61   : > { %193 = sbr.rel (%p2251_p8) target bundleno = 443 (0x1bb), region = 32  ;;  %s2390_s30 = sand.u32 (!%p2251_p8), 1, %s2150_s13  }
  0x62   : > { %s1905_s7 = smul.u32 (!%p2251_p8), 288, %s2390_s30  ;;  %s196_s8 = scalar_lea.sflag (!%p2251_p8), [#allocation3], %s2390_s30 }
  0x63   : > { %p2741_p7 = scmp.ne.s32.totalorder (!%p2251_p8), %s2735_s22, 0 }
  0x64   : > { %s2394_s21 = scalar_lea.vmem (!%p2251_p8), [#allocation2], %s1905_s7 }
  0x68   : > { %2133 = dma.done.wait (%p2741_p7), %s196_s8, 4608  }
  0x69   : > { %2135 = vsyncadd (%p2741_p7), %s196_s8, 4294962688  ;;  %p2742_p11 = scmp.ne.s32.totalorder %s2733_s20, 0 }
  0x6b   : > { %2137 = dma.done.wait (%p2742_p11), [#allocation6], 784  }
  0x6c   : > { %2139 = vsyncadd (%p2742_p11), [#allocation6], 4294966512  ;;  %vm367_vm0 = vcmask 1040384   ;;  %vm2173_vm1 = vmmov 1   ;;  %vm270_vm3 = vcmask 72704   ;;  %v268_v1 = vld [vmem:[#allocation5 + $0x10] sm:$0xff] }
  0x6d   : > { %vm2404_vm2 = vmpackc.low %vm367_vm0, %vm2173_vm1  ;;  %v269_v2 = vld [vmem:[#allocation5 + $0x18] sm:$0x1]  ;;  %v263_v3 = vld [vmem:[#allocation5] sm:$0xff]  ;;  %s1454_s20 = sshll.u32 %s2390_s30, 8  ;;  %vm1292_vm4 = vcmask 64512   ;;  %s1560_s24 = sshll.u32 %s2158_s15, 12 }
  0x6e   : > { %v1819_v4 = vpack.c.bf16 %v269_v2, %v268_v1  ;;  %v264_v5 = vld [vmem:[#allocation5 + $0x8] sm:$0x1]  ;;  %v233_v6 = vld [vmem:[%s2394_s21 + $0x10] sm:$0xff]  ;;  %v231_v7 = vld [vmem:[%s2394_s21] sm:$0xff]  ;;  %s2569_s22 = scalar_lea.vmem [#allocation8], %s1454_s20  ;;  %s2670_s26 = scalar_lea.hbm %s2728_s3, %s1560_s24 }
  0x6f   : > { %v1825_v8 = vpack.c.bf16 %v264_v5, %v263_v3  ;;  %1667 = vmatprep.mubr.msk.f32.mxu1 %vm270_vm3, %v233_v6  ;;  %1719 = vmatprep.mubr.msk.f32.mxu0 %vm270_vm3, %v231_v7  ;;  %v863_v9 = vld [vmem:[#allocation5 + $0x20] sm:$0xff]  ;;  %v864_v10 = vld [vmem:[#allocation5 + $0x28] sm:$0x1]  ;;  %v234_v11 = vld [vmem:[%s2394_s21 + $0x18] sm:$0xff]  ;;  %s1341_s11 = sshll.u32 %s2569_s22, 4  ;;  %s1326_s15 = scalar_lea.sflag [#allocation4], %s2390_s30  ;;  %s2672_s11 = int_to_ptr.vmem [resolvable:$true] %s1341_s11 }
  0x70   : > { %1821 = vmatprep.subr.msk.bf16.mxu1 %vm2404_vm2, %v1819_v4  ;;  %v1831_v12 = vpack.c.bf16 %v864_v10, %v863_v9  ;;  %v232_v13 = vld [vmem:[%s2394_s21 + $0x8] sm:$0xff]  ;;  %v235_v14 = vld [vmem:[%s2394_s21 + $0x20] sm:$0xff]  ;;  %v237_v16 = vld [vmem:[%s2394_s21 + $0x30] sm:$0xff]  ;;  %s2080_s10 = scalar_lea.vmem %s2672_s11, 4096  ;;  %p2745_p12 = scmp.ne.s32.totalorder %s2739_s27, 0 }
  0x71   : > { %1827 = vmatprep.subr.msk.bf16.mxu0 %vm2404_vm2, %v1825_v8  ;;  %1824 = vmatpush3.bf16.msk.msra.mxu1 %vm2404_vm2, %v1819_v4  ;;  %v236_v15 = vld [vmem:[%s2394_s21 + $0x28] sm:$0xff]  ;;  %v238_v17 = vld [vmem:[%s2394_s21 + $0x38] sm:$0xff]  ;;  %v239_v18 = vld [vmem:[%s2394_s21 + $0x40] sm:$0xff]  ;;  %p2081_p8 = scmp.ne.s32.totalorder %s2672_s11, %s2080_s10  ;;  %s2174_s19 = smov [#allocation8]  }
  0x72   : > { %1830 = vmatpush3.bf16.msk.msra.mxu0 %vm2404_vm2, %v1825_v8  ;;  %1837 = vmatprep.subr.msk.bf16.mxu1 %vm2404_vm2, %v1825_v8  ;;  %v240_v19 = vld [vmem:[%s2394_s21 + $0x48] sm:$0xff]  ;;  %v241_v20 = vld [vmem:[%s2394_s21 + $0x50] sm:$0xff]  ;;  %v242_v21 = vld [vmem:[%s2394_s21 + $0x58] sm:$0xff]  ;;  %s2084_s4 = sshll.u32 %s2174_s19, 4  ;;  %s2085_s4 = int_to_ptr.vmem [resolvable:$false] %s2084_s4 }
  0x73   : > { %1833 = vmatprep.subr.msk.bf16.mxu0 %vm2404_vm2, %v1831_v12  ;;  %v243_v22 = vld [vmem:[%s2394_s21 + $0x60] sm:$0xff]  ;;  %v244_v23 = vld [vmem:[%s2394_s21 + $0x68] sm:$0xff]  ;;  %v245_v24 = vld [vmem:[%s2394_s21 + $0x70] sm:$0xff]  ;;  %p2082_p1 = pnand %p2081_p8, %p2745_p12  ;;  %s2086_s9 = scalar_lea.vmem %s2085_s4, 8192 }
  0x74   : > { %1668 = vmatmul.mubr.msk.f32.vlgmr.msra.gmra.mrb[0].mxu1 %vm270_vm3, %v234_v11  ;;  %v246_v25 = vld [vmem:[%s2394_s21 + $0x78] sm:$0xff]  ;;  %v247_v26 = vld [vmem:[%s2394_s21 + $0x80] sm:$0xff]  ;;  %v248_v27 = vld [vmem:[%s2394_s21 + $0x88] sm:$0xff]  ;;  %p2087_p3 = scmp.lt.s32.totalorder %s2672_s11, %s2085_s4  ;;  %p2088_p5 = scmp.lt.s32.totalorder %s2086_s9, %s2080_s10 }
  0x75   : > { %1720 = vmatmul.mubr.msk.f32.vlgmr.msra.gmra.mrb[0].mxu0 %vm270_vm3, %v232_v13  ;;  %1838 = vmatpush3.bf16.msk.msra.mxu1 %vm2404_vm2, %v1825_v8  ;;  %v249_v28 = vld [vmem:[%s2394_s21 + $0x90] sm:$0xff]  ;;  %v250_v29 = vld [vmem:[%s2394_s21 + $0x98] sm:$0xff]  ;;  %v251_v30 = vld [vmem:[%s2394_s21 + $0xa0] sm:$0xff]  ;;  %p2083_p10 = pneg %p2082_p1 }
  0x76   : > { %1836 = vmatpush3.bf16.msk.msra.mxu0 %vm2404_vm2, %v1831_v12  ;;  %1670 = vmatprep.mubr.msk.f32.mxu1 %vm270_vm3, %v235_v14  ;;  %v252_v31 = vld [vmem:[%s2394_s21 + $0xa8] sm:$0xff]  ;;  %v253_v32 = vld [vmem:[%s2394_s21 + $0xb0] sm:$0xff]  ;;  %v254_v33 = vld [vmem:[%s2394_s21 + $0xb8] sm:$0xff]  ;;  %p2089_p9 = por %p2088_p5, %p2087_p3 }
  0x77   : > { %1722 = vmatprep.mubr.msk.f32.mxu0 %vm270_vm3, %v233_v6  ;;  %v255_v34 = vld [vmem:[%s2394_s21 + $0xc0] sm:$0xff]  ;;  %v256_v35 = vld [vmem:[%s2394_s21 + $0xc8] sm:$0xff]  ;;  %v257_v36 = vld [vmem:[%s2394_s21 + $0xd0] sm:$0xff] }
  0x78   : > { %1671 = vmatmul.mubr.msk.f32.gmra.mrb[2].mxu1 %vm270_vm3, %v236_v15  ;;  %v258_v37 = vld [vmem:[%s2394_s21 + $0xd8] sm:$0xff]  ;;  %v259_v38 = vld [vmem:[%s2394_s21 + $0xe0] sm:$0xff]  ;;  %v260_v39 = vld [vmem:[%s2394_s21 + $0xe8] sm:$0xff]  ;;  %p2090_p2 = pnand %p2089_p9, %p2083_p10 }
  0x79   : > { %1723 = vmatmul.mubr.msk.f32.gmra.mrb[2].mxu0 %vm270_vm3, %v234_v11  ;;  %1673 = vmatprep.mubr.msk.f32.mxu1 %vm270_vm3, %v237_v16  ;;  %v261_v40 = vld [vmem:[%s2394_s21 + $0xf0] sm:$0xff]  ;;  %v262_v41 = vld [vmem:[%s2394_s21 + $0xf8] sm:$0xff]  ;;  %v265_v42 = vld [vmem:[%s2394_s21 + $0x100] sm:$0xff] }
  0x7a   : > { %1725 = vmatprep.mubr.msk.f32.mxu0 %vm270_vm3, %v235_v14  ;;  %v266_v43 = vld [vmem:[%s2394_s21 + $0x108] sm:$0xff]  ;;  %v860_v44 = vld [vmem:[%s2394_s21 + $0x110] sm:$0xff]  ;;  %v861_v45 = vld [vmem:[%s2394_s21 + $0x118] sm:$0xff] }
  0x7b   : > { %v2564_v63 = vld [vmem:[#allocation7] ss:$0 sm:$0xff] }
  0x7c   : > { %1674 = vmatmul.mubr.msk.f32.gmra.mrb[4].mxu1 %vm270_vm3, %v238_v17 }
  0x7d   : > { %1726 = vmatmul.mubr.msk.f32.gmra.mrb[4].mxu0 %vm270_vm3, %v236_v15  ;;  %1676 = vmatprep.mubr.msk.f32.mxu1 %vm270_vm3, %v239_v18 }
  0x7e   : > { %1728 = vmatprep.mubr.msk.f32.mxu0 %vm270_vm3, %v237_v16 }
  0x80   : > { %1677 = vmatmul.mubr.msk.f32.gmra.mrb[6].mxu1 %vm270_vm3, %v240_v19 }
  0x81   : > { %1729 = vmatmul.mubr.msk.f32.gmra.mrb[6].mxu0 %vm270_vm3, %v238_v17  ;;  %1679 = vmatprep.mubr.msk.f32.mxu1 %vm270_vm3, %v241_v20 }
  0x82   : > { %1731 = vmatprep.mubr.msk.f32.mxu0 %vm270_vm3, %v239_v18 }
  0x84   : > { %1680 = vmatmul.mubr.msk.f32.gmra.mrb[8].mxu1 %vm270_vm3, %v242_v21 }
  0x85   : > { %1732 = vmatmul.mubr.msk.f32.gmra.mrb[8].mxu0 %vm270_vm3, %v240_v19  ;;  %1682 = vmatprep.mubr.msk.f32.mxu1 %vm270_vm3, %v243_v22 }
  0x86   : > { %1734 = vmatprep.mubr.msk.f32.mxu0 %vm270_vm3, %v241_v20 }
  0x88   : > { %1683 = vmatmul.mubr.msk.f32.gmra.mrb[10].mxu1 %vm270_vm3, %v244_v23 }
  0x89   : > { %1735 = vmatmul.mubr.msk.f32.gmra.mrb[10].mxu0 %vm270_vm3, %v242_v21  ;;  %1685 = vmatprep.mubr.msk.f32.mxu1 %vm270_vm3, %v245_v24 }
  0x8a   : > { %1737 = vmatprep.mubr.msk.f32.mxu0 %vm270_vm3, %v243_v22 }
  0x8c   : > { %1686 = vmatmul.mubr.msk.f32.gmra.mrb[12].mxu1 %vm270_vm3, %v246_v25 }
  0x8d   : > { %1738 = vmatmul.mubr.msk.f32.gmra.mrb[12].mxu0 %vm270_vm3, %v244_v23  ;;  %1688 = vmatprep.mubr.msk.f32.mxu1 %vm270_vm3, %v247_v26 }
  0x8e   : > { %1740 = vmatprep.mubr.msk.f32.mxu0 %vm270_vm3, %v245_v24 }
  0x90   : > { %1689 = vmatmul.mubr.msk.f32.gmra.mrb[14].mxu1 %vm270_vm3, %v248_v27 }
  0x91   : > { %1741 = vmatmul.mubr.msk.f32.gmra.mrb[14].mxu0 %vm270_vm3, %v246_v25  ;;  %1691 = vmatprep.mubr.msk.f32.mxu1 %vm270_vm3, %v249_v28 }
  0x92   : > { %1771 = vmatprep.mubr.msk.f32.mxu0 %vm270_vm3, %v235_v14 }
  0x94   : > { %1692 = vmatmul.mubr.msk.f32.gmra.mrb[16].mxu1 %vm270_vm3, %v250_v29 }
  0x95   : > { %1772 = vmatmul.mubr.msk.f32.vlgmr.msra.gmra.mrb[0].mxu0 %vm270_vm3, %v236_v15  ;;  %1694 = vmatprep.mubr.msk.f32.mxu1 %vm270_vm3, %v251_v30 }
  0x96   : > { %1774 = vmatprep.mubr.msk.f32.mxu0 %vm270_vm3, %v237_v16 }
  0x98   : > { %1695 = vmatmul.mubr.msk.f32.gmra.mrb[18].mxu1 %vm270_vm3, %v252_v31 }
  0x99   : > { %1775 = vmatmul.mubr.msk.f32.gmra.mrb[2].mxu0 %vm270_vm3, %v238_v17  ;;  %1697 = vmatprep.mubr.msk.f32.mxu1 %vm270_vm3, %v253_v32 }
  0x9a   : > { %1777 = vmatprep.mubr.msk.f32.mxu0 %vm270_vm3, %v239_v18 }
  0x9c   : > { %1698 = vmatmul.mubr.msk.f32.gmra.mrb[20].mxu1 %vm270_vm3, %v254_v33 }
  0x9d   : > { %1778 = vmatmul.mubr.msk.f32.gmra.mrb[4].mxu0 %vm270_vm3, %v240_v19  ;;  %1700 = vmatprep.mubr.msk.f32.mxu1 %vm270_vm3, %v255_v34 }
  0x9e   : > { %1780 = vmatprep.mubr.msk.f32.mxu0 %vm270_vm3, %v241_v20 }
  0xa0   : > { %1701 = vmatmul.mubr.msk.f32.gmra.mrb[22].mxu1 %vm270_vm3, %v256_v35 }
  0xa1   : > { %1781 = vmatmul.mubr.msk.f32.gmra.mrb[6].mxu0 %vm270_vm3, %v242_v21  ;;  %1703 = vmatprep.mubr.msk.f32.mxu1 %vm270_vm3, %v257_v36 }
  0xa2   : > { %1783 = vmatprep.mubr.msk.f32.mxu0 %vm270_vm3, %v243_v22 }
  0xa4   : > { %1704 = vmatmul.mubr.msk.f32.gmra.mrb[24].mxu1 %vm270_vm3, %v258_v37 }
  0xa5   : > { %1784 = vmatmul.mubr.msk.f32.gmra.mrb[8].mxu0 %vm270_vm3, %v244_v23  ;;  %1706 = vmatprep.mubr.msk.f32.mxu1 %vm270_vm3, %v259_v38 }
  0xa6   : > { %1786 = vmatprep.mubr.msk.f32.mxu0 %vm270_vm3, %v245_v24 }
  0xa8   : > { %1707 = vmatmul.mubr.msk.f32.gmra.mrb[26].mxu1 %vm270_vm3, %v260_v39 }
  0xa9   : > { %1787 = vmatmul.mubr.msk.f32.gmra.mrb[10].mxu0 %vm270_vm3, %v246_v25  ;;  %1709 = vmatprep.mubr.msk.f32.mxu1 %vm270_vm3, %v261_v40 }
  0xaa   : > { %1789 = vmatprep.mubr.msk.f32.mxu0 %vm270_vm3, %v247_v26 }
  0xac   : > { %1710 = vmatmul.mubr.msk.f32.gmra.mrb[28].mxu1 %vm270_vm3, %v262_v41 }
  0xad   : > { %1790 = vmatmul.mubr.msk.f32.gmra.mrb[12].mxu0 %vm270_vm3, %v248_v27  ;;  %1712 = vmatprep.mubr.msk.f32.mxu1 %vm270_vm3, %v265_v42 }
  0xae   : > { %1792 = vmatprep.mubr.msk.f32.mxu0 %vm270_vm3, %v249_v28 }
  0xb0   : > { %1713 = vmatmul.mubr.msk.f32.gmra.mrb[30].mxu1 %vm270_vm3, %v266_v43 }
  0xb1   : > { %1793 = vmatmul.mubr.msk.f32.gmra.mrb[14].mxu0 %vm270_vm3, %v250_v29  ;;  %1743 = vmatprep.mubr.msk.f32.mxu1 %vm270_vm3, %v247_v26 }
  0xb2   : > { %1795 = vmatprep.mubr.msk.f32.mxu0 %vm270_vm3, %v251_v30 }
  0xb4   : > { %1744 = vmatmul.mubr.msk.f32.vlgmr.msra.gmra.mrb[16].mxu1 %vm270_vm3, %v248_v27 }
  0xb5   : > { %1796 = vmatmul.mubr.msk.f32.gmra.mrb[16].mxu0 %vm270_vm3, %v252_v31  ;;  %1746 = vmatprep.mubr.msk.f32.mxu1 %vm270_vm3, %v249_v28 }
  0xb6   : > { %1798 = vmatprep.mubr.msk.f32.mxu0 %vm270_vm3, %v253_v32 }
  0xb8   : > { %1747 = vmatmul.mubr.msk.f32.gmra.mrb[18].mxu1 %vm270_vm3, %v250_v29 }
  0xb9   : > { %1799 = vmatmul.mubr.msk.f32.gmra.mrb[18].mxu0 %vm270_vm3, %v254_v33  ;;  %1749 = vmatprep.mubr.msk.f32.mxu1 %vm270_vm3, %v251_v30 }
  0xba   : > { %1801 = vmatprep.mubr.msk.f32.mxu0 %vm270_vm3, %v255_v34 }
  0xbc   : > { %1750 = vmatmul.mubr.msk.f32.gmra.mrb[20].mxu1 %vm270_vm3, %v252_v31 }
  0xbd   : > { %1802 = vmatmul.mubr.msk.f32.gmra.mrb[20].mxu0 %vm270_vm3, %v256_v35  ;;  %1752 = vmatprep.mubr.msk.f32.mxu1 %vm270_vm3, %v253_v32 }
  0xbe   : > { %1804 = vmatprep.mubr.msk.f32.mxu0 %vm270_vm3, %v257_v36 }
  0xc0   : > { %1753 = vmatmul.mubr.msk.f32.gmra.mrb[22].mxu1 %vm270_vm3, %v254_v33 }
  0xc1   : > { %1805 = vmatmul.mubr.msk.f32.gmra.mrb[22].mxu0 %vm270_vm3, %v258_v37  ;;  %1755 = vmatprep.mubr.msk.f32.mxu1 %vm270_vm3, %v255_v34 }
  0xc2   : > { %1807 = vmatprep.mubr.msk.f32.mxu0 %vm270_vm3, %v259_v38 }
  0xc4   : > { %1756 = vmatmul.mubr.msk.f32.gmra.mrb[24].mxu1 %vm270_vm3, %v256_v35 }
  0xc5   : > { %1808 = vmatmul.mubr.msk.f32.gmra.mrb[24].mxu0 %vm270_vm3, %v260_v39  ;;  %1758 = vmatprep.mubr.msk.f32.mxu1 %vm270_vm3, %v257_v36 }
  0xc6   : > { %1810 = vmatprep.mubr.msk.f32.mxu0 %vm270_vm3, %v261_v40 }
  0xc8   : > { %1759 = vmatmul.mubr.msk.f32.gmra.mrb[26].mxu1 %vm270_vm3, %v258_v37 }
  0xc9   : > { %1811 = vmatmul.mubr.msk.f32.gmra.mrb[26].mxu0 %vm270_vm3, %v262_v41  ;;  %1761 = vmatprep.mubr.msk.f32.mxu1 %vm270_vm3, %v259_v38 }
  0xca   : > { %1813 = vmatprep.mubr.msk.f32.mxu0 %vm270_vm3, %v265_v42 }
  0xcc   : > { %1762 = vmatmul.mubr.msk.f32.gmra.mrb[28].mxu1 %vm270_vm3, %v260_v39 }
  0xcd   : > { %1814 = vmatmul.mubr.msk.f32.gmra.mrb[28].mxu0 %vm270_vm3, %v266_v43  ;;  %1764 = vmatprep.mubr.msk.f32.mxu1 %vm270_vm3, %v261_v40 }
  0xce   : > { %1816 = vmatprep.mubr.msk.f32.mxu0 %vm270_vm3, %v860_v44 }
  0xd0   : > { %1765 = vmatmul.mubr.msk.f32.gmra.mrb[30].mxu1 %vm270_vm3, %v262_v41 }
  0xd1   : > { %1817 = vmatmul.mubr.msk.f32.gmra.mrb[30].mxu0 %vm270_vm3, %v861_v45 }
 0x147   : > { %v1669_v46 = vpop.f32.mrb[0].mxu1 }
 0x148   : > { %v437_v47 = vpop.f32.mrb[1].mxu1 }
 0x14b   : > { %v1672_v48 = vpop.f32.mrb[2].mxu1 }
 0x14c   : > { %v447_v49 = vpop.f32.mrb[3].mxu1 }
 0x14f   : > { %v1675_v50 = vpop.f32.mrb[4].mxu1 }
 0x150   : > { %v457_v51 = vpop.f32.mrb[5].mxu1 }
 0x153   : > { %v1678_v52 = vpop.f32.mrb[6].mxu1 }
 0x154   : > { %v467_v53 = vpop.f32.mrb[7].mxu1 }
 0x157   : > { %v1681_v54 = vpop.f32.mrb[8].mxu1 }
 0x158   : > { %v477_v55 = vpop.f32.mrb[9].mxu1 }
 0x15b   : > { %v1684_v56 = vpop.f32.mrb[10].mxu1 }
 0x15c   : > { %v487_v57 = vpop.f32.mrb[11].mxu1 }
 0x15f   : > { %v2556_v58 = vpop.f32.mrb[12].mxu1 }
 0x160   : > { %v2558_v59 = vpop.f32.mrb[13].mxu1 }
 0x163   : > { %v2560_v60 = vpop.f32.mrb[14].mxu1 }
 0x164   : > { %v2562_v61 = vpop.f32.mrb[15].mxu1 }
 0x168   : > { %v1773_v62 = vpop.f32.mrb[0].mxu0 }
 0x169   : > { %v1839_v0 = vadd.f32 %v1773_v62, %v1669_v46  ;;  %v1030_v1 = vpop.f32.mrb[1].mxu0 }
 0x16a   : > { %v1840_v2 = vadd.f32 %v1030_v1, %v437_v47 }
 0x16b   : > { %v1229_v3 = vadd.f32 %v1839_v0, %v2564_v63 }
 0x16c   : > { %v1228_v4 = vadd.f32 %v1840_v2, %v2564_v63  ;;  %v1776_v5 = vpop.f32.mrb[2].mxu0 }
 0x16d   : > { %v1261_v6 = vmax.f32 %v1229_v3, 0.0  ;;  %v1841_v7 = vadd.f32 %v1776_v5, %v1672_v48  ;;  %v1040_v8 = vpop.f32.mrb[3].mxu0 }
 0x16e   : > { %v1260_v9 = vmax.f32 %v1228_v4, 0.0  ;;  %v1842_v10 = vadd.f32 %v1040_v8, %v447_v49 }
 0x16f   : > { %1294 = vst.msk [vmem:[%s2569_s22 + $0x8] sm:$0xff] %vm1292_vm4, %v1261_v6  ;;  %v1231_v11 = vadd.f32 %v1841_v7, %v2564_v63 }
 0x170   : > { %1293 = vst.msk [vmem:[%s2569_s22] sm:$0xff] %vm1292_vm4, %v1260_v9  ;;  %v1230_v12 = vadd.f32 %v1842_v10, %v2564_v63  ;;  %v1779_v13 = vpop.f32.mrb[4].mxu0 }
 0x171   : > { %v1263_v14 = vmax.f32 %v1231_v11, 0.0  ;;  %v1843_v15 = vadd.f32 %v1779_v13, %v1675_v50  ;;  %v1050_v16 = vpop.f32.mrb[5].mxu0 }
 0x172   : > { %v1262_v17 = vmax.f32 %v1230_v12, 0.0  ;;  %v1844_v18 = vadd.f32 %v1050_v16, %v457_v51 }
 0x173   : > { %1296 = vst.msk [vmem:[%s2569_s22 + $0x18] sm:$0xff] %vm1292_vm4, %v1263_v14  ;;  %v1233_v19 = vadd.f32 %v1843_v15, %v2564_v63 }
 0x174   : > { %1295 = vst.msk [vmem:[%s2569_s22 + $0x10] sm:$0xff] %vm1292_vm4, %v1262_v17  ;;  %v1232_v20 = vadd.f32 %v1844_v18, %v2564_v63  ;;  %v1782_v21 = vpop.f32.mrb[6].mxu0 }
 0x175   : > { %v1265_v22 = vmax.f32 %v1233_v19, 0.0  ;;  %v1845_v23 = vadd.f32 %v1782_v21, %v1678_v52  ;;  %v1060_v24 = vpop.f32.mrb[7].mxu0 }
 0x176   : > { %v1264_v25 = vmax.f32 %v1232_v20, 0.0  ;;  %v1846_v26 = vadd.f32 %v1060_v24, %v467_v53 }
 0x177   : > { %1298 = vst.msk [vmem:[%s2569_s22 + $0x28] sm:$0xff] %vm1292_vm4, %v1265_v22  ;;  %v1235_v27 = vadd.f32 %v1845_v23, %v2564_v63 }
 0x178   : > { %1297 = vst.msk [vmem:[%s2569_s22 + $0x20] sm:$0xff] %vm1292_vm4, %v1264_v25  ;;  %v1234_v28 = vadd.f32 %v1846_v26, %v2564_v63  ;;  %v1785_v29 = vpop.f32.mrb[8].mxu0 }
 0x179   : > { %v1267_v30 = vmax.f32 %v1235_v27, 0.0  ;;  %v1847_v31 = vadd.f32 %v1785_v29, %v1681_v54  ;;  %v1070_v32 = vpop.f32.mrb[9].mxu0 }
 0x17a   : > { %v1266_v33 = vmax.f32 %v1234_v28, 0.0  ;;  %v1848_v34 = vadd.f32 %v1070_v32, %v477_v55 }
 0x17b   : > { %1300 = vst.msk [vmem:[%s2569_s22 + $0x38] sm:$0xff] %vm1292_vm4, %v1267_v30  ;;  %v1237_v35 = vadd.f32 %v1847_v31, %v2564_v63 }
 0x17c   : > { %1299 = vst.msk [vmem:[%s2569_s22 + $0x30] sm:$0xff] %vm1292_vm4, %v1266_v33  ;;  %v1236_v36 = vadd.f32 %v1848_v34, %v2564_v63  ;;  %v1788_v37 = vpop.f32.mrb[10].mxu0 }
 0x17d   : > { %v1269_v38 = vmax.f32 %v1237_v35, 0.0  ;;  %v1849_v39 = vadd.f32 %v1788_v37, %v1684_v56  ;;  %v1080_v40 = vpop.f32.mrb[11].mxu0 }
 0x17e   : > { %v1268_v41 = vmax.f32 %v1236_v36, 0.0  ;;  %v1850_v42 = vadd.f32 %v1080_v40, %v487_v57 }
 0x17f   : > { %1302 = vst.msk [vmem:[%s2569_s22 + $0x48] sm:$0xff] %vm1292_vm4, %v1269_v38  ;;  %v1239_v43 = vadd.f32 %v1849_v39, %v2564_v63 }
 0x180   : > { %1301 = vst.msk [vmem:[%s2569_s22 + $0x40] sm:$0xff] %vm1292_vm4, %v1268_v41  ;;  %v1238_v44 = vadd.f32 %v1850_v42, %v2564_v63  ;;  %v1791_v45 = vpop.f32.mrb[12].mxu0 }
 0x181   : > { %v1271_v46 = vmax.f32 %v1239_v43, 0.0  ;;  %v1851_v47 = vadd.f32 %v1791_v45, %v2556_v58  ;;  %v1090_v48 = vpop.f32.mrb[13].mxu0 }
 0x182   : > { %v1270_v49 = vmax.f32 %v1238_v44, 0.0  ;;  %v1852_v50 = vadd.f32 %v1090_v48, %v2558_v59 }
 0x183   : > { %1304 = vst.msk [vmem:[%s2569_s22 + $0x58] sm:$0xff] %vm1292_vm4, %v1271_v46  ;;  %v1241_v51 = vadd.f32 %v1851_v47, %v2564_v63 }
 0x184   : > { %1303 = vst.msk [vmem:[%s2569_s22 + $0x50] sm:$0xff] %vm1292_vm4, %v1270_v49  ;;  %v1240_v52 = vadd.f32 %v1852_v50, %v2564_v63  ;;  %v1794_v53 = vpop.f32.mrb[14].mxu0 }
 0x185   : > { %v1273_v54 = vmax.f32 %v1241_v51, 0.0  ;;  %v1853_v55 = vadd.f32 %v1794_v53, %v2560_v60  ;;  %v1100_v56 = vpop.f32.mrb[15].mxu0 }
 0x186   : > { %v1272_v57 = vmax.f32 %v1240_v52, 0.0  ;;  %v1854_v58 = vadd.f32 %v1100_v56, %v2562_v61 }
 0x187   : > { %1306 = vst.msk [vmem:[%s2569_s22 + $0x68] sm:$0xff] %vm1292_vm4, %v1273_v54  ;;  %v1243_v59 = vadd.f32 %v1853_v55, %v2564_v63  ;;  %v1745_v62 = vpop.f32.mrb[16].mxu1 }
 0x188   : > { %1305 = vst.msk [vmem:[%s2569_s22 + $0x60] sm:$0xff] %vm1292_vm4, %v1272_v57  ;;  %v1242_v0 = vadd.f32 %v1854_v58, %v2564_v63  ;;  %v1797_v1 = vpop.f32.mrb[16].mxu0  ;;  %v751_v2 = vpop.f32.mrb[17].mxu1 }
 0x189   : > { %v1275_v3 = vmax.f32 %v1243_v59, 0.0  ;;  %v1855_v4 = vadd.f32 %v1797_v1, %v1745_v62  ;;  %v1110_v60 = vpop.f32.mrb[17].mxu0 }
 0x18a   : > { %v1274_v5 = vmax.f32 %v1242_v0, 0.0  ;;  %v1856_v6 = vadd.f32 %v1110_v60, %v751_v2 }
 0x18b   : > { %1308 = vst.msk [vmem:[%s2569_s22 + $0x78] sm:$0xff] %vm1292_vm4, %v1275_v3  ;;  %v1245_v61 = vadd.f32 %v1855_v4, %v2564_v63  ;;  %v1748_v7 = vpop.f32.mrb[18].mxu1 }
 0x18c   : > { %1307 = vst.msk [vmem:[%s2569_s22 + $0x70] sm:$0xff] %vm1292_vm4, %v1274_v5  ;;  %v1244_v8 = vadd.f32 %v1856_v6, %v2564_v63  ;;  %v1800_v9 = vpop.f32.mrb[18].mxu0  ;;  %v761_v10 = vpop.f32.mrb[19].mxu1 }
 0x18d   : > { %v1277_v11 = vmax.f32 %v1245_v61, 0.0  ;;  %v1857_v12 = vadd.f32 %v1800_v9, %v1748_v7  ;;  %v1120_v13 = vpop.f32.mrb[19].mxu0 }
 0x18e   : > { %v1276_v14 = vmax.f32 %v1244_v8, 0.0  ;;  %v1858_v15 = vadd.f32 %v1120_v13, %v761_v10 }
 0x18f   : > { %1310 = vst.msk [vmem:[%s2569_s22 + $0x88] sm:$0xff] %vm1292_vm4, %v1277_v11  ;;  %v1247_v16 = vadd.f32 %v1857_v12, %v2564_v63  ;;  %v1751_v17 = vpop.f32.mrb[20].mxu1 }
 0x190   : > { %1309 = vst.msk [vmem:[%s2569_s22 + $0x80] sm:$0xff] %vm1292_vm4, %v1276_v14  ;;  %v1246_v18 = vadd.f32 %v1858_v15, %v2564_v63  ;;  %v1803_v19 = vpop.f32.mrb[20].mxu0  ;;  %v771_v20 = vpop.f32.mrb[21].mxu1 }
 0x191   : > { %v1279_v21 = vmax.f32 %v1247_v16, 0.0  ;;  %v1859_v22 = vadd.f32 %v1803_v19, %v1751_v17  ;;  %v1130_v23 = vpop.f32.mrb[21].mxu0 }
 0x192   : > { %v1278_v24 = vmax.f32 %v1246_v18, 0.0  ;;  %v1860_v25 = vadd.f32 %v1130_v23, %v771_v20 }
 0x193   : > { %1312 = vst.msk [vmem:[%s2569_s22 + $0x98] sm:$0xff] %vm1292_vm4, %v1279_v21  ;;  %v1249_v26 = vadd.f32 %v1859_v22, %v2564_v63  ;;  %v1754_v27 = vpop.f32.mrb[22].mxu1 }
 0x194   : > { %1311 = vst.msk [vmem:[%s2569_s22 + $0x90] sm:$0xff] %vm1292_vm4, %v1278_v24  ;;  %v1248_v28 = vadd.f32 %v1860_v25, %v2564_v63  ;;  %v1806_v29 = vpop.f32.mrb[22].mxu0  ;;  %v781_v30 = vpop.f32.mrb[23].mxu1 }
 0x195   : > { %v1281_v31 = vmax.f32 %v1249_v26, 0.0  ;;  %v1861_v32 = vadd.f32 %v1806_v29, %v1754_v27  ;;  %v1140_v33 = vpop.f32.mrb[23].mxu0 }
 0x196   : > { %v1280_v34 = vmax.f32 %v1248_v28, 0.0  ;;  %v1862_v35 = vadd.f32 %v1140_v33, %v781_v30 }
 0x197   : > { %1314 = vst.msk [vmem:[%s2569_s22 + $0xa8] sm:$0xff] %vm1292_vm4, %v1281_v31  ;;  %v1251_v36 = vadd.f32 %v1861_v32, %v2564_v63  ;;  %v1757_v37 = vpop.f32.mrb[24].mxu1 }
 0x198   : > { %1313 = vst.msk [vmem:[%s2569_s22 + $0xa0] sm:$0xff] %vm1292_vm4, %v1280_v34  ;;  %v1250_v38 = vadd.f32 %v1862_v35, %v2564_v63  ;;  %v1809_v39 = vpop.f32.mrb[24].mxu0  ;;  %v791_v40 = vpop.f32.mrb[25].mxu1 }
 0x199   : > { %v1283_v41 = vmax.f32 %v1251_v36, 0.0  ;;  %v1863_v42 = vadd.f32 %v1809_v39, %v1757_v37  ;;  %v1150_v43 = vpop.f32.mrb[25].mxu0 }
 0x19a   : > { %v1282_v44 = vmax.f32 %v1250_v38, 0.0  ;;  %v1864_v45 = vadd.f32 %v1150_v43, %v791_v40 }
 0x19b   : > { %1316 = vst.msk [vmem:[%s2569_s22 + $0xb8] sm:$0xff] %vm1292_vm4, %v1283_v41  ;;  %v1253_v46 = vadd.f32 %v1863_v42, %v2564_v63  ;;  %v1760_v47 = vpop.f32.mrb[26].mxu1 }
 0x19c   : > { %1315 = vst.msk [vmem:[%s2569_s22 + $0xb0] sm:$0xff] %vm1292_vm4, %v1282_v44  ;;  %v1252_v48 = vadd.f32 %v1864_v45, %v2564_v63  ;;  %v1812_v49 = vpop.f32.mrb[26].mxu0  ;;  %v801_v50 = vpop.f32.mrb[27].mxu1 }
 0x19d   : > { %v1285_v51 = vmax.f32 %v1253_v46, 0.0  ;;  %v1865_v52 = vadd.f32 %v1812_v49, %v1760_v47  ;;  %v1160_v53 = vpop.f32.mrb[27].mxu0 }
 0x19e   : > { %v1284_v54 = vmax.f32 %v1252_v48, 0.0  ;;  %v1866_v55 = vadd.f32 %v1160_v53, %v801_v50 }
 0x19f   : > { %1318 = vst.msk [vmem:[%s2569_s22 + $0xc8] sm:$0xff] %vm1292_vm4, %v1285_v51  ;;  %v1255_v56 = vadd.f32 %v1865_v52, %v2564_v63  ;;  %v1763_v57 = vpop.f32.mrb[28].mxu1 }
 0x1a0   : > { %1317 = vst.msk [vmem:[%s2569_s22 + $0xc0] sm:$0xff] %vm1292_vm4, %v1284_v54  ;;  %v1254_v58 = vadd.f32 %v1866_v55, %v2564_v63  ;;  %v1815_v59 = vpop.f32.mrb[28].mxu0  ;;  %v811_v62 = vpop.f32.mrb[29].mxu1 }
 0x1a1   : > { %v1287_v0 = vmax.f32 %v1255_v56, 0.0  ;;  %v1867_v1 = vadd.f32 %v1815_v59, %v1763_v57  ;;  %v1170_v2 = vpop.f32.mrb[29].mxu0 }
 0x1a2   : > { %v1286_v3 = vmax.f32 %v1254_v58, 0.0  ;;  %v1868_v4 = vadd.f32 %v1170_v2, %v811_v62 }
 0x1a3   : > { %1320 = vst.msk [vmem:[%s2569_s22 + $0xd8] sm:$0xff] %vm1292_vm4, %v1287_v0  ;;  %v1257_v60 = vadd.f32 %v1867_v1, %v2564_v63  ;;  %v1766_v5 = vpop.f32.mrb[30].mxu1 }
 0x1a4   : > { %1319 = vst.msk [vmem:[%s2569_s22 + $0xd0] sm:$0xff] %vm1292_vm4, %v1286_v3  ;;  %v1256_v6 = vadd.f32 %v1868_v4, %v2564_v63  ;;  %v1818_v61 = vpop.f32.mrb[30].mxu0  ;;  %v821_v7 = vpop.f32.mrb[31].mxu1 }
 0x1a5   : > { %v1289_v8 = vmax.f32 %v1257_v60, 0.0  ;;  %v1869_v9 = vadd.f32 %v1818_v61, %v1766_v5  ;;  %v1180_v10 = vpop.f32.mrb[31].mxu0 }
 0x1a6   : > { %v1288_v11 = vmax.f32 %v1256_v6, 0.0  ;;  %v1870_v12 = vadd.f32 %v1180_v10, %v821_v7 }
 0x1a7   : > { %1322 = vst.msk [vmem:[%s2569_s22 + $0xe8] sm:$0xff] %vm1292_vm4, %v1289_v8  ;;  %v1259_v13 = vadd.f32 %v1869_v9, %v2564_v63 }
 0x1a8   : > { %1321 = vst.msk [vmem:[%s2569_s22 + $0xe0] sm:$0xff] %vm1292_vm4, %v1288_v11  ;;  %v1258_v14 = vadd.f32 %v1870_v12, %v2564_v63 }
 0x1a9   : > { %v1291_v15 = vmax.f32 %v1259_v13, 0.0 }
 0x1aa   : > { %v1290_v16 = vmax.f32 %v1258_v14, 0.0 }
 0x1ab   : > { %1324 = vst.msk [vmem:[%s2569_s22 + $0xf8] sm:$0xff] %vm1292_vm4, %v1291_v15 }
 0x1ac   : > { %1323 = vst.msk [vmem:[%s2569_s22 + $0xf0] sm:$0xff] %vm1292_vm4, %v1290_v16 }
 0x1ad   : > { %2093 = shalt.err (!%p2090_p2)
}
 0x1ae   : > { %s2094_s28 = scalar_lea.hbm %s2670_s26, 4096  ;;  %s2098_s8 = scalar_lea.hbm %s2728_s3, 8192 }
 0x1af   : > { %p2095_p0 = scmp.ne.s32.totalorder %s2670_s26, %s2094_s28  ;;  %p2099_p6 = scmp.lt.u32.totalorder %s2670_s26, %s2728_s3 }
 0x1b0   : > { %p2100_p7 = scmp.lt.u32.totalorder %s2098_s8, %s2094_s28  ;;  %p2102_p8 = scmp.lt.u32.totalorder %s2094_s28, %s2670_s26 }
 0x1b1   : > { %p2096_p4 = pnand %p2095_p0, %p2745_p12 }
 0x1b2   : > { %p2101_p11 = por %p2100_p7, %p2099_p6 }
 0x1b3   : > { %p2097_p13 = pneg %p2096_p4 }
 0x1b4   : > { %p2103_p1 = por %p2102_p8, %p2101_p11 }
 0x1b6   : > { %p2104_p10 = pnand %p2103_p1, %p2097_p13 }
 0x1b8   : > { %2107 = shalt.err (!%p2104_p10)
}
 0x1b9   : > { %s2175_s22 = smov 128   ;;  %s2176_s24 = smov 8  }
 0x1ba   : > { %1916 = dma.vmem_to_hbm [thread:$0]  (%p2745_p12), %s2672_s11, 4096, %s2670_s26, %s1326_s15, %s2175_s22, %s2175_s22, %s2176_s24  }
 0x1bb PF: > { %s1356_s18 = sand.u32 1, %s2146_s12   ;;  %p2746_p3 = scmp.ne.s32.totalorder %s2736_s23, 0 }
 0x1bc   : > { %p2747_p5 = scmp.ge.s32.totalorder %s2166_s17, 2  ;;  %s1357_s5 = scalar_lea.sflag [#allocation4], %s1356_s18 }
 0x1be   : > { %p1930_p9 = pnand %p2747_p5, %p2746_p3 }
 0x1c0   : > { %2141 = dma.done.wait (!%p1930_p9), %s1357_s5, 4096  }
 0x1c1   : > { %2143 = vsyncadd (!%p1930_p9), %s1357_s5, 4294963200  ;;  %s20_s17 = sadd.s32 1, %s2166_s17   ;;  %s2748_s12 = smov %s2150_s13 }
 0x1c2   : > { %p17_p2 = scmp.ge.s32.totalorder %s20_s17, 4   ;;  %s2749_s13 = smov %s2154_s14 }
 0x1c3   : > { %s2750_s14 = smov %s2346_s6  ;;  %s2751_s15 = smov %s2162_s16 }
 0x1c4   : > { %s2752_s16 = smov %s2754_s25  ;;  %19 = sbr.rel (!%p17_p2) target bundleno = 7 (0x7), region = 87 }
 0x1cb   :  { %1362 = vsyncpa [#allocation3], 1 }
 0x1cc   :  { %1364 = vsyncpa [#allocation3 + $0x1], 1 }
 0x1cd   :  { %1365 = vsyncpa [#allocation6], 1 }
 0x1ce   :  { %1366 = vsyncpa [#allocation4], 1 }
 0x1cf   :  { %1368 = vsyncpa [#allocation4 + $0x1], 1 }

// kernel: _lambda_.11
= control target key start
LH: loop header
LB: loop body
LE: loop exit
PB: predicated region body
PF: predicated region fallthrough
CT: control target
= control target key end

     0   :  { %8 = vsyncpa [#allocation3], 0  ;;  %s2698_s0 = inlined_call_operand.hbm [shape: f32[2,288,24], index: 0, kind: input, shape index: {}]   ;;  %s2699_s1 = inlined_call_operand.hbm [shape: f32[3,24,8], index: 1, kind: input, shape index: {}]   ;;  %s2700_s2 = inlined_call_operand.hbm [shape: f32[1,8], index: 2, kind: input, shape index: {}]   ;;  %s2701_s3 = inlined_call_operand.hbm [shape: f32[2,256,8], index: 3, kind: output, shape index: {}]  }
   0x1   :  { %10 = vsyncpa [#allocation3 + $0x1], 0 }
   0x2   :  { %11 = vsyncpa [#allocation6], 0 }
   0x3   :  { %12 = vsyncpa [#allocation4], 0 }
   0x4   :  { %14 = vsyncpa [#allocation4 + $0x1], 0  ;;  %s2190_s12 = smov 0   ;;  %s2192_s13 = smov 0  }
   0x5   :  { %s2194_s14 = smov 0   ;;  %s2196_s15 = smov 0  }
   0x6   :  { %s2198_s16 = smov 0   ;;  %s2200_s17 = smov 0  }
   0x7 LB: > { %s1437_s18 = sadd.s32 4294967295, %s2160_s17   ;;  %s1438_s19 = sadd.s32 4294967294, %s2160_s17   ;;  %s2160_s17 = sphi %s2200_s17, %s20_s17   ;;  %s2156_s16 = sphi %s2198_s16, %s2723_s16   ;;  %s2152_s15 = sphi %s2196_s15, %s2722_s15   ;;  %s2148_s14 = sphi %s2194_s14, %s2721_s14   ;;  %s2144_s13 = sphi %s2192_s13, %s2720_s13   ;;  %s2140_s12 = sphi %s2190_s12, %s2719_s12  }
   0x8   : > { %p52_p0 = scmp.ne.s32.totalorder %s2144_s13, %s2140_s12  ;;  %p2224_p1 = scmp.eq.s32.totalorder %s1437_s18, 0 }
   0x9   : > { %p2228_p2 = scmp.eq.s32.totalorder %s1437_s18, 1  ;;  %p126_p3 = scmp.eq.s32.totalorder %s1438_s19, 1 }
   0xa   : > { %s2706_s20 = scalar_select %p2224_p1, 1, 0 }
   0xb   : > { %p2234_p4 = por %p2224_p1, %p52_p0  ;;  %p1439_p5 = scmp.ge.s32.totalorder %s2160_s17, 1 }
   0xc   : > { %p2239_p6 = por %p126_p3, %p52_p0  ;;  %p133_p7 = scmp.lt.s32.totalorder %s2160_s17, 3 }
   0xd   : > { %s2708_s22 = scalar_select %p2234_p4, 1, 0 }
   0xe   : > { %s2709_s23 = scalar_select %p2239_p6, 1, 0 }
   0xf   : > { %p2244_p8 = pnand %p1439_p5, %p133_p7  ;;  %s2162_s25 = smov [#allocation5]  }
  0x10   : > { %s145_s26 = sshll.u32 %s2162_s25, 4  ;;  %s2163_s28 = smov [#allocation7]   ;;  %s2248_s26 = int_to_ptr.vmem [resolvable:$true] %s145_s26 }
  0x11   : > { %p1913_p9 = pneg %p2244_p8  ;;  %s159_s29 = sshll.u32 %s2163_s28, 4  ;;  %s2259_s29 = int_to_ptr.vmem [resolvable:$true] %s159_s29 }
  0x12   : > { %s1988_s5 = scalar_lea.hbm %s2699_s1, 1152 }
  0x13   : > { %p2255_p11 = pnand %p1913_p9, %p2224_p1  ;;  %p1989_p12 = scmp.ne.s32.totalorder %s2699_s1, %s1988_s5 }
  0x14   : > { %p1995_p5 = scmp.lt.u32.totalorder %s1988_s5, %s2699_s1 }
  0x15   : > { %p1990_p13 = pneg %p2255_p11 }
  0x17   : > { %p1991_p0 = pnand %p1990_p13, %p1989_p12 }
  0x19   : > { %p1992_p3 = pneg %p1991_p0 }
  0x1b   : > { %p1997_p7 = pnand %p1995_p5, %p1992_p3 }
  0x1d   : > { %2000 = shalt.err (!%p1997_p7)
}
  0x1e   : > { %s2001_s10 = scalar_lea.vmem %s2248_s26, 1152  ;;  %p2009_p1 = scmp.lt.s32.totalorder %s2248_s26, %s2248_s26 }
  0x1f   : > { %p2002_p9 = scmp.ne.s32.totalorder %s2248_s26, %s2001_s10  ;;  %p2010_p12 = scmp.lt.s32.totalorder %s2001_s10, %s2001_s10 }
  0x21   : > { %p2004_p10 = pnand %p2002_p9, %p1990_p13  ;;  %p2011_p0 = por %p2010_p12, %p2009_p1 }
  0x23   : > { %p2005_p6 = pneg %p2004_p10 }
  0x25   : > { %p2012_p4 = pnand %p2011_p0, %p2005_p6 }
  0x27   : > { %2015 = shalt.err (!%p2012_p4)
}
  0x28   : > { %s2164_s11 = smov 128   ;;  %s2165_s18 = smov 8  }
  0x29   : > { %1916 = dma.hbm_to_vmem [thread:$0]  (!%p2255_p11), %s2699_s1, 1152, %s2248_s26, [#allocation6], %s2164_s11, %s2164_s11, %s2165_s18  }
  0x2a   : > { %s2016_s4 = scalar_lea.hbm %s2700_s2, 16 }
  0x2b   : > { %p2017_p1 = scmp.ne.s32.totalorder %s2700_s2, %s2016_s4  ;;  %p2023_p10 = scmp.lt.u32.totalorder %s2016_s4, %s2700_s2 }
  0x2d   : > { %p2019_p4 = pnand %p2017_p1, %p1990_p13 }
  0x2f   : > { %p2020_p6 = pneg %p2019_p4 }
  0x31   : > { %p2025_p3 = pnand %p2023_p10, %p2020_p6 }
  0x33   : > { %2028 = shalt.err (!%p2025_p3)
}
  0x34   : > { %s2029_s26 = scalar_lea.vmem %s2259_s29, 16  ;;  %s2036_s9 = scalar_lea.vmem %s2259_s29, 32 }
  0x35   : > { %p2030_p5 = scmp.ne.s32.totalorder %s2259_s29, %s2029_s26  ;;  %p2037_p12 = scmp.lt.s32.totalorder %s2259_s29, %s2259_s29 }
  0x36   : > { %p2038_p0 = scmp.lt.s32.totalorder %s2036_s9, %s2029_s26 }
  0x37   : > { %p2032_p7 = pnand %p2030_p5, %p1990_p13 }
  0x38   : > { %p2039_p1 = por %p2038_p0, %p2037_p12 }
  0x39   : > { %p2033_p9 = pneg %p2032_p7 }
  0x3b   : > { %p2040_p4 = pnand %p2039_p1, %p2033_p9 }
  0x3d   : > { %2043 = shalt.err (!%p2040_p4)
}
  0x3e   : > { %1919 = dma.hbm_to_vmem [thread:$0]  (!%p2255_p11), %s2700_s2, 16, %s2259_s29, [#allocation6]  }
  0x3f   : > { %s32_s25 = sadd.s32 1, %s2156_s16  ;;  %s39_s28 = sadd.s32 1, %s2148_s14 }
  0x40   : > { %p34_p13 = scmp.ge.s32.totalorder %s32_s25, 2  ;;  %p46_p6 = scmp.ne.s32.totalorder %s2148_s14, %s2144_s13 }
  0x41   : > { %p47_p10 = scmp.eq.s32.totalorder %s2160_s17, 0  ;;  %p1930_p3 = scmp.lt.s32.totalorder %s2160_s17, 2 }
  0x42   : > { %s2725_s25 = smov (%p34_p13, %s32_s25), 0  ;;  %p2327_p7 = por %p2228_p2, %p46_p6 }
  0x43   : > { %p48_p5 = por %p47_p10, %p46_p6  ;;  %s36_s30 = ssub.s32 %s2156_s16, %s2725_s25 }
  0x44   : > { %s2712_s27 = scalar_select %p2327_p7, 1, 0 }
  0x45   : > { %s170_s4 = sand.u32 1, %s2148_s14   ;;  %p37_p9 = scmp.eq.s32.totalorder %s36_s30, 0 }
  0x46   : > { %s1898_s29 = smul.u32 288, %s170_s4  ;;  %p2334_p11 = pnand %p1930_p3, %p48_p5 }
  0x47   : > { %s2339_s6 = scalar_select %p37_p9, %s2148_s14, %s39_s28  }
  0x48   : > { %s1899_s7 = smul.u32 4608, %s2156_s16  ;;  %s174_s8 = scalar_lea.vmem [#allocation2], %s1898_s29 }
  0x49   : > { %s181_s26 = sshll.u32 %s174_s8, 4  ;;  %s2349_s19 = scalar_lea.sflag [#allocation3], %s170_s4  ;;  %s2347_s26 = int_to_ptr.vmem [resolvable:$true] %s181_s26 }
  0x4a   : > { %s2345_s10 = scalar_lea.hbm %s2698_s0, %s1899_s7  ;;  %p2046_p12 = pneg %p2334_p11 }
  0x4b   : > { %s2044_s30 = scalar_lea.hbm %s2345_s10, 4608  ;;  %s2049_s7 = scalar_lea.hbm %s2698_s0, 9216 }
  0x4c   : > { %p2045_p2 = scmp.ne.s32.totalorder %s2345_s10, %s2044_s30  ;;  %p2050_p4 = scmp.lt.u32.totalorder %s2345_s10, %s2698_s0 }
  0x4d   : > { %p2051_p13 = scmp.lt.u32.totalorder %s2049_s7, %s2044_s30  ;;  %p2053_p10 = scmp.lt.u32.totalorder %s2044_s30, %s2345_s10 }
  0x4e   : > { %p2047_p0 = pnand %p2046_p12, %p2045_p2 }
  0x4f   : > { %p2052_p6 = por %p2051_p13, %p2050_p4 }
  0x50   : > { %p2048_p1 = pneg %p2047_p0 }
  0x51   : > { %p2054_p3 = por %p2053_p10, %p2052_p6 }
  0x53   : > { %p2055_p5 = pnand %p2054_p3, %p2048_p1 }
  0x55   : > { %2058 = shalt.err (!%p2055_p5)
}
  0x56   : > { %s2059_s4 = scalar_lea.vmem %s2347_s26, 4608  ;;  %s2166_s9 = smov [#allocation2]  }
  0x57   : > { %p2060_p9 = scmp.ne.s32.totalorder %s2347_s26, %s2059_s4  ;;  %s2064_s28 = sshll.u32 %s2166_s9, 4  ;;  %s2065_s28 = int_to_ptr.vmem [resolvable:$false] %s2064_s28 }
  0x58   : > { %s2066_s29 = scalar_lea.vmem %s2065_s28, 9216  ;;  %p2067_p7 = scmp.lt.s32.totalorder %s2347_s26, %s2065_s28 }
  0x59   : > { %p2062_p2 = pnand %p2060_p9, %p2046_p12  ;;  %p2068_p4 = scmp.lt.s32.totalorder %s2066_s29, %s2059_s4 }
  0x5b   : > { %p2063_p0 = pneg %p2062_p2  ;;  %p2069_p13 = por %p2068_p4, %p2067_p7 }
  0x5d   : > { %p2070_p6 = pnand %p2069_p13, %p2063_p0 }
  0x5f   : > { %2073 = shalt.err (!%p2070_p6)
}
  0x60   : > { %1923 = dma.hbm_to_vmem [thread:$0]  (!%p2334_p11), %s2345_s10, 4608, %s2347_s26, %s2349_s19, %s2164_s11, %s2164_s11, %s2165_s18  }
  0x61   : > { %193 = sbr.rel (%p2244_p8) target bundleno = 444 (0x1bc), region = 32  ;;  %s2383_s30 = sand.u32 (!%p2244_p8), 1, %s2144_s13  }
  0x62   : > { %s1900_s7 = smul.u32 (!%p2244_p8), 288, %s2383_s30  ;;  %s196_s8 = scalar_lea.sflag (!%p2244_p8), [#allocation3], %s2383_s30 }
  0x63   : > { %p2714_p7 = scmp.ne.s32.totalorder (!%p2244_p8), %s2708_s22, 0 }
  0x64   : > { %s2387_s21 = scalar_lea.vmem (!%p2244_p8), [#allocation2], %s1900_s7 }
  0x68   : > { %2127 = dma.done.wait (%p2714_p7), %s196_s8, 4608  }
  0x69   : > { %2129 = vsyncadd (%p2714_p7), %s196_s8, 4294962688  ;;  %p2715_p11 = scmp.ne.s32.totalorder %s2706_s20, 0 }
  0x6b   : > { %2131 = dma.done.wait (%p2715_p11), [#allocation6], 1168  }
  0x6c   : > { %2133 = vsyncadd (%p2715_p11), [#allocation6], 4294966128  ;;  %v269_v0 = vld [vmem:[#allocation5 + $0x18] sm:$0xff]  ;;  %v270_v1 = vld [vmem:[#allocation5 + $0x20] sm:$0xff]  ;;  %vm272_vm0 = vcmask 195584   ;;  %s1447_s20 = sshll.u32 %s2383_s30, 8 }
  0x6d   : > { %v263_v2 = vld [vmem:[#allocation5] sm:$0xff]  ;;  %v1818_v3 = vpack.c.bf16 %v270_v1, %v269_v0  ;;  %v264_v4 = vld [vmem:[#allocation5 + $0x8] sm:$0xff]  ;;  %v233_v7 = vld [vmem:[%s2387_s21 + $0x10] sm:$0xff]  ;;  %vm1285_vm1 = vcmask 64512   ;;  %s2542_s22 = scalar_lea.vmem [#allocation8], %s1447_s20  ;;  %s1550_s24 = sshll.u32 %s2152_s15, 12 }
  0x6e   : > { %v1822_v5 = vpack.c.bf16 %v264_v4, %v263_v2  ;;  %v271_v6 = vld [vmem:[#allocation5 + $0x28] sm:$0xff]  ;;  %v265_v8 = vld [vmem:[#allocation5 + $0x10] sm:$0xff]  ;;  %1662 = vmatprep.mubr.msk.f32.mxu1 %vm272_vm0, %v233_v7  ;;  %v231_v9 = vld [vmem:[%s2387_s21] sm:$0xff]  ;;  %s1334_s11 = sshll.u32 %s2542_s22, 4  ;;  %s2643_s26 = scalar_lea.hbm %s2701_s3, %s1550_s24  ;;  %s2645_s11 = int_to_ptr.vmem [resolvable:$true] %s1334_s11 }
  0x6f   : > { %1819 = vmatprep.subr.bf16.mxu1 %v1818_v3  ;;  %v858_v10 = vld [vmem:[#allocation5 + $0x30] sm:$0xff]  ;;  %v859_v11 = vld [vmem:[#allocation5 + $0x38] sm:$0xff]  ;;  %1716 = vmatprep.mubr.msk.f32.mxu0 %vm272_vm0, %v231_v9  ;;  %v232_v13 = vld [vmem:[%s2387_s21 + $0x8] sm:$0xff]  ;;  %s1319_s15 = scalar_lea.sflag [#allocation4], %s2383_s30  ;;  %s2074_s10 = scalar_lea.vmem %s2645_s11, 4096 }
  0x70   : > { %1823 = vmatprep.subr.bf16.mxu0 %v1822_v5  ;;  %1821 = vmatpush3.bf16.msra.mxu1 %v1818_v3  ;;  %v234_v12 = vld [vmem:[%s2387_s21 + $0x18] sm:$0xff]  ;;  %v1826_v14 = vpack.c.bf16 %v859_v11, %v858_v10  ;;  %v235_v15 = vld [vmem:[%s2387_s21 + $0x20] sm:$0xff]  ;;  %v236_v16 = vld [vmem:[%s2387_s21 + $0x28] sm:$0xff]  ;;  %p2075_p8 = scmp.ne.s32.totalorder %s2645_s11, %s2074_s10  ;;  %p2716_p12 = scmp.ne.s32.totalorder %s2712_s27, 0 }
  0x71   : > { %1825 = vmatpush3.bf16.msra.mxu0 %v1822_v5  ;;  %1660 = vmatprep.subr.mxu1 %v271_v6  ;;  %v237_v17 = vld [vmem:[%s2387_s21 + $0x30] sm:$0xff]  ;;  %v860_v18 = vld [vmem:[#allocation5 + $0x40] sm:$0xff]  ;;  %v238_v19 = vld [vmem:[%s2387_s21 + $0x38] sm:$0xff]  ;;  %s2167_s19 = smov [#allocation8]  }
  0x72   : > { %1714 = vmatprep.subr.mxu0 %v265_v8  ;;  %v239_v20 = vld [vmem:[%s2387_s21 + $0x40] sm:$0xff]  ;;  %v240_v21 = vld [vmem:[%s2387_s21 + $0x48] sm:$0xff]  ;;  %v241_v22 = vld [vmem:[%s2387_s21 + $0x50] sm:$0xff]  ;;  %p2076_p1 = pnand %p2075_p8, %p2716_p12  ;;  %s2078_s4 = sshll.u32 %s2167_s19, 4  ;;  %s2079_s4 = int_to_ptr.vmem [resolvable:$false] %s2078_s4 }
  0x73   : > { %v242_v23 = vld [vmem:[%s2387_s21 + $0x58] sm:$0xff]  ;;  %v243_v24 = vld [vmem:[%s2387_s21 + $0x60] sm:$0xff]  ;;  %v244_v25 = vld [vmem:[%s2387_s21 + $0x68] sm:$0xff]  ;;  %s2080_s9 = scalar_lea.vmem %s2079_s4, 8192  ;;  %p2081_p3 = scmp.lt.s32.totalorder %s2645_s11, %s2079_s4 }
  0x74   : > { %1661 = vmatpush3.msra.mxu1 %v271_v6  ;;  %v245_v26 = vld [vmem:[%s2387_s21 + $0x70] sm:$0xff]  ;;  %v246_v27 = vld [vmem:[%s2387_s21 + $0x78] sm:$0xff]  ;;  %v247_v28 = vld [vmem:[%s2387_s21 + $0x80] sm:$0xff]  ;;  %p2077_p10 = pneg %p2076_p1  ;;  %p2082_p5 = scmp.lt.s32.totalorder %s2080_s9, %s2074_s10 }
  0x75   : > { %1715 = vmatpush3.msra.mxu0 %v265_v8  ;;  %1663 = vmatmul.mubr.msk.f32.vlgmr.msra.gmra.mrb[0].mxu1 %vm272_vm0, %v234_v12  ;;  %v248_v29 = vld [vmem:[%s2387_s21 + $0x88] sm:$0xff]  ;;  %v249_v30 = vld [vmem:[%s2387_s21 + $0x90] sm:$0xff]  ;;  %v250_v31 = vld [vmem:[%s2387_s21 + $0x98] sm:$0xff] }
  0x76   : > { %1830 = vmatprep.subr.bf16.mxu1 %v1822_v5  ;;  %1717 = vmatmul.mubr.msk.f32.vlgmr.msra.gmra.mrb[0].mxu0 %vm272_vm0, %v232_v13  ;;  %v251_v32 = vld [vmem:[%s2387_s21 + $0xa0] sm:$0xff]  ;;  %v252_v33 = vld [vmem:[%s2387_s21 + $0xa8] sm:$0xff]  ;;  %v253_v34 = vld [vmem:[%s2387_s21 + $0xb0] sm:$0xff]  ;;  %p2083_p9 = por %p2082_p5, %p2081_p3 }
  0x77   : > { %1827 = vmatprep.subr.bf16.mxu0 %v1826_v14  ;;  %1832 = vmatpush3.bf16.msra.mxu1 %v1822_v5  ;;  %v254_v35 = vld [vmem:[%s2387_s21 + $0xb8] sm:$0xff]  ;;  %v255_v36 = vld [vmem:[%s2387_s21 + $0xc0] sm:$0xff]  ;;  %v256_v37 = vld [vmem:[%s2387_s21 + $0xc8] sm:$0xff] }
  0x78   : > { %1829 = vmatpush3.bf16.msra.mxu0 %v1826_v14  ;;  %1665 = vmatprep.mubr.msk.f32.mxu1 %vm272_vm0, %v235_v15  ;;  %v257_v38 = vld [vmem:[%s2387_s21 + $0xd0] sm:$0xff]  ;;  %v258_v39 = vld [vmem:[%s2387_s21 + $0xd8] sm:$0xff]  ;;  %v259_v40 = vld [vmem:[%s2387_s21 + $0xe0] sm:$0xff]  ;;  %p2084_p2 = pnand %p2083_p9, %p2077_p10 }
  0x79   : > { %1719 = vmatprep.mubr.msk.f32.mxu0 %vm272_vm0, %v233_v7  ;;  %1666 = vmatmul.mubr.msk.f32.gmra.mrb[2].mxu1 %vm272_vm0, %v236_v16  ;;  %v260_v41 = vld [vmem:[%s2387_s21 + $0xe8] sm:$0xff]  ;;  %v261_v42 = vld [vmem:[%s2387_s21 + $0xf0] sm:$0xff]  ;;  %v262_v43 = vld [vmem:[%s2387_s21 + $0xf8] sm:$0xff] }
  0x7a   : > { %1720 = vmatmul.mubr.msk.f32.gmra.mrb[2].mxu0 %vm272_vm0, %v234_v12  ;;  %1668 = vmatprep.mubr.msk.f32.mxu1 %vm272_vm0, %v237_v17  ;;  %v266_v44 = vld [vmem:[%s2387_s21 + $0x100] sm:$0xff]  ;;  %v267_v45 = vld [vmem:[%s2387_s21 + $0x108] sm:$0xff]  ;;  %v855_v46 = vld [vmem:[%s2387_s21 + $0x110] sm:$0xff] }
  0x7b   : > { %1722 = vmatprep.mubr.msk.f32.mxu0 %vm272_vm0, %v235_v15  ;;  %1768 = vmatprep.subr.mxu0 %v860_v18  ;;  %v856_v47 = vld [vmem:[%s2387_s21 + $0x118] sm:$0xff]  ;;  %v2537_v1 = vld [vmem:[#allocation7] ss:$0 sm:$0xff] }
  0x7c   : > { %1769 = vmatpush3.msra.mxu0 %v860_v18  ;;  %1831 = vmatprep.subr.mxu1 %v265_v8 }
  0x7d   : > { %1669 = vmatmul.mubr.msk.f32.gmra.mrb[4].mxu1 %vm272_vm0, %v238_v19 }
  0x7e   : > { %1723 = vmatmul.mubr.msk.f32.gmra.mrb[4].mxu0 %vm272_vm0, %v236_v16  ;;  %1671 = vmatprep.mubr.msk.f32.mxu1 %vm272_vm0, %v239_v20 }
  0x7f   : > { %1725 = vmatprep.mubr.msk.f32.mxu0 %vm272_vm0, %v237_v17  ;;  %1833 = vmatpush3.msra.mxu1 %v265_v8 }
  0x81   : > { %1672 = vmatmul.mubr.msk.f32.gmra.mrb[6].mxu1 %vm272_vm0, %v240_v21 }
  0x82   : > { %1726 = vmatmul.mubr.msk.f32.gmra.mrb[6].mxu0 %vm272_vm0, %v238_v19  ;;  %1674 = vmatprep.mubr.msk.f32.mxu1 %vm272_vm0, %v241_v22 }
  0x83   : > { %1728 = vmatprep.mubr.msk.f32.mxu0 %vm272_vm0, %v239_v20 }
  0x85   : > { %1675 = vmatmul.mubr.msk.f32.gmra.mrb[8].mxu1 %vm272_vm0, %v242_v23 }
  0x86   : > { %1729 = vmatmul.mubr.msk.f32.gmra.mrb[8].mxu0 %vm272_vm0, %v240_v21  ;;  %1677 = vmatprep.mubr.msk.f32.mxu1 %vm272_vm0, %v243_v24 }
  0x87   : > { %1731 = vmatprep.mubr.msk.f32.mxu0 %vm272_vm0, %v241_v22 }
  0x89   : > { %1678 = vmatmul.mubr.msk.f32.gmra.mrb[10].mxu1 %vm272_vm0, %v244_v25 }
  0x8a   : > { %1732 = vmatmul.mubr.msk.f32.gmra.mrb[10].mxu0 %vm272_vm0, %v242_v23  ;;  %1680 = vmatprep.mubr.msk.f32.mxu1 %vm272_vm0, %v245_v26 }
  0x8b   : > { %1734 = vmatprep.mubr.msk.f32.mxu0 %vm272_vm0, %v243_v24 }
  0x8d   : > { %1681 = vmatmul.mubr.msk.f32.gmra.mrb[12].mxu1 %vm272_vm0, %v246_v27 }
  0x8e   : > { %1735 = vmatmul.mubr.msk.f32.gmra.mrb[12].mxu0 %vm272_vm0, %v244_v25  ;;  %1683 = vmatprep.mubr.msk.f32.mxu1 %vm272_vm0, %v247_v28 }
  0x8f   : > { %1737 = vmatprep.mubr.msk.f32.mxu0 %vm272_vm0, %v245_v26 }
  0x91   : > { %1684 = vmatmul.mubr.msk.f32.gmra.mrb[14].mxu1 %vm272_vm0, %v248_v29 }
  0x92   : > { %1738 = vmatmul.mubr.msk.f32.gmra.mrb[14].mxu0 %vm272_vm0, %v246_v27  ;;  %1686 = vmatprep.mubr.msk.f32.mxu1 %vm272_vm0, %v249_v30 }
  0x93   : > { %1770 = vmatprep.mubr.msk.f32.mxu0 %vm272_vm0, %v235_v15 }
  0x95   : > { %1687 = vmatmul.mubr.msk.f32.gmra.mrb[16].mxu1 %vm272_vm0, %v250_v31 }
  0x96   : > { %1771 = vmatmul.mubr.msk.f32.vlgmr.msra.gmra.mrb[0].mxu0 %vm272_vm0, %v236_v16  ;;  %1689 = vmatprep.mubr.msk.f32.mxu1 %vm272_vm0, %v251_v32 }
  0x97   : > { %1773 = vmatprep.mubr.msk.f32.mxu0 %vm272_vm0, %v237_v17 }
  0x99   : > { %1690 = vmatmul.mubr.msk.f32.gmra.mrb[18].mxu1 %vm272_vm0, %v252_v33 }
  0x9a   : > { %1774 = vmatmul.mubr.msk.f32.gmra.mrb[2].mxu0 %vm272_vm0, %v238_v19  ;;  %1692 = vmatprep.mubr.msk.f32.mxu1 %vm272_vm0, %v253_v34 }
  0x9b   : > { %1776 = vmatprep.mubr.msk.f32.mxu0 %vm272_vm0, %v239_v20 }
  0x9d   : > { %1693 = vmatmul.mubr.msk.f32.gmra.mrb[20].mxu1 %vm272_vm0, %v254_v35 }
  0x9e   : > { %1777 = vmatmul.mubr.msk.f32.gmra.mrb[4].mxu0 %vm272_vm0, %v240_v21  ;;  %1695 = vmatprep.mubr.msk.f32.mxu1 %vm272_vm0, %v255_v36 }
  0x9f   : > { %1779 = vmatprep.mubr.msk.f32.mxu0 %vm272_vm0, %v241_v22 }
  0xa1   : > { %1696 = vmatmul.mubr.msk.f32.gmra.mrb[22].mxu1 %vm272_vm0, %v256_v37 }
  0xa2   : > { %1780 = vmatmul.mubr.msk.f32.gmra.mrb[6].mxu0 %vm272_vm0, %v242_v23  ;;  %1698 = vmatprep.mubr.msk.f32.mxu1 %vm272_vm0, %v257_v38 }
  0xa3   : > { %1782 = vmatprep.mubr.msk.f32.mxu0 %vm272_vm0, %v243_v24 }
  0xa5   : > { %1699 = vmatmul.mubr.msk.f32.gmra.mrb[24].mxu1 %vm272_vm0, %v258_v39 }
  0xa6   : > { %1783 = vmatmul.mubr.msk.f32.gmra.mrb[8].mxu0 %vm272_vm0, %v244_v25  ;;  %1701 = vmatprep.mubr.msk.f32.mxu1 %vm272_vm0, %v259_v40 }
  0xa7   : > { %1785 = vmatprep.mubr.msk.f32.mxu0 %vm272_vm0, %v245_v26 }
  0xa9   : > { %1702 = vmatmul.mubr.msk.f32.gmra.mrb[26].mxu1 %vm272_vm0, %v260_v41 }
  0xaa   : > { %1786 = vmatmul.mubr.msk.f32.gmra.mrb[10].mxu0 %vm272_vm0, %v246_v27  ;;  %1704 = vmatprep.mubr.msk.f32.mxu1 %vm272_vm0, %v261_v42 }
  0xab   : > { %1788 = vmatprep.mubr.msk.f32.mxu0 %vm272_vm0, %v247_v28 }
  0xad   : > { %1705 = vmatmul.mubr.msk.f32.gmra.mrb[28].mxu1 %vm272_vm0, %v262_v43 }
  0xae   : > { %1789 = vmatmul.mubr.msk.f32.gmra.mrb[12].mxu0 %vm272_vm0, %v248_v29  ;;  %1707 = vmatprep.mubr.msk.f32.mxu1 %vm272_vm0, %v266_v44 }
  0xaf   : > { %1791 = vmatprep.mubr.msk.f32.mxu0 %vm272_vm0, %v249_v30 }
  0xb1   : > { %1708 = vmatmul.mubr.msk.f32.gmra.mrb[30].mxu1 %vm272_vm0, %v267_v45 }
  0xb2   : > { %1792 = vmatmul.mubr.msk.f32.gmra.mrb[14].mxu0 %vm272_vm0, %v250_v31  ;;  %1740 = vmatprep.mubr.msk.f32.mxu1 %vm272_vm0, %v247_v28 }
  0xb3   : > { %1794 = vmatprep.mubr.msk.f32.mxu0 %vm272_vm0, %v251_v32 }
  0xb5   : > { %1741 = vmatmul.mubr.msk.f32.vlgmr.msra.gmra.mrb[16].mxu1 %vm272_vm0, %v248_v29 }
  0xb6   : > { %1795 = vmatmul.mubr.msk.f32.gmra.mrb[16].mxu0 %vm272_vm0, %v252_v33  ;;  %1743 = vmatprep.mubr.msk.f32.mxu1 %vm272_vm0, %v249_v30 }
  0xb7   : > { %1797 = vmatprep.mubr.msk.f32.mxu0 %vm272_vm0, %v253_v34 }
  0xb9   : > { %1744 = vmatmul.mubr.msk.f32.gmra.mrb[18].mxu1 %vm272_vm0, %v250_v31 }
  0xba   : > { %1798 = vmatmul.mubr.msk.f32.gmra.mrb[18].mxu0 %vm272_vm0, %v254_v35  ;;  %1746 = vmatprep.mubr.msk.f32.mxu1 %vm272_vm0, %v251_v32 }
  0xbb   : > { %1800 = vmatprep.mubr.msk.f32.mxu0 %vm272_vm0, %v255_v36 }
  0xbd   : > { %1747 = vmatmul.mubr.msk.f32.gmra.mrb[20].mxu1 %vm272_vm0, %v252_v33 }
  0xbe   : > { %1801 = vmatmul.mubr.msk.f32.gmra.mrb[20].mxu0 %vm272_vm0, %v256_v37  ;;  %1749 = vmatprep.mubr.msk.f32.mxu1 %vm272_vm0, %v253_v34 }
  0xbf   : > { %1803 = vmatprep.mubr.msk.f32.mxu0 %vm272_vm0, %v257_v38 }
  0xc1   : > { %1750 = vmatmul.mubr.msk.f32.gmra.mrb[22].mxu1 %vm272_vm0, %v254_v35 }
  0xc2   : > { %1804 = vmatmul.mubr.msk.f32.gmra.mrb[22].mxu0 %vm272_vm0, %v258_v39  ;;  %1752 = vmatprep.mubr.msk.f32.mxu1 %vm272_vm0, %v255_v36 }
  0xc3   : > { %1806 = vmatprep.mubr.msk.f32.mxu0 %vm272_vm0, %v259_v40 }
  0xc5   : > { %1753 = vmatmul.mubr.msk.f32.gmra.mrb[24].mxu1 %vm272_vm0, %v256_v37 }
  0xc6   : > { %1807 = vmatmul.mubr.msk.f32.gmra.mrb[24].mxu0 %vm272_vm0, %v260_v41  ;;  %1755 = vmatprep.mubr.msk.f32.mxu1 %vm272_vm0, %v257_v38 }
  0xc7   : > { %1809 = vmatprep.mubr.msk.f32.mxu0 %vm272_vm0, %v261_v42 }
  0xc9   : > { %1756 = vmatmul.mubr.msk.f32.gmra.mrb[26].mxu1 %vm272_vm0, %v258_v39 }
  0xca   : > { %1810 = vmatmul.mubr.msk.f32.gmra.mrb[26].mxu0 %vm272_vm0, %v262_v43  ;;  %1758 = vmatprep.mubr.msk.f32.mxu1 %vm272_vm0, %v259_v40 }
  0xcb   : > { %1812 = vmatprep.mubr.msk.f32.mxu0 %vm272_vm0, %v266_v44 }
  0xcd   : > { %1759 = vmatmul.mubr.msk.f32.gmra.mrb[28].mxu1 %vm272_vm0, %v260_v41 }
  0xce   : > { %1813 = vmatmul.mubr.msk.f32.gmra.mrb[28].mxu0 %vm272_vm0, %v267_v45  ;;  %1761 = vmatprep.mubr.msk.f32.mxu1 %vm272_vm0, %v261_v42 }
  0xcf   : > { %1815 = vmatprep.mubr.msk.f32.mxu0 %vm272_vm0, %v855_v46 }
  0xd1   : > { %1762 = vmatmul.mubr.msk.f32.gmra.mrb[30].mxu1 %vm272_vm0, %v262_v43 }
  0xd2   : > { %1816 = vmatmul.mubr.msk.f32.gmra.mrb[30].mxu0 %vm272_vm0, %v856_v47 }
 0x148   : > { %v1664_v48 = vpop.f32.mrb[0].mxu1 }
 0x149   : > { %v435_v49 = vpop.f32.mrb[1].mxu1 }
 0x14c   : > { %v1667_v50 = vpop.f32.mrb[2].mxu1 }
 0x14d   : > { %v445_v51 = vpop.f32.mrb[3].mxu1 }
 0x150   : > { %v1670_v52 = vpop.f32.mrb[4].mxu1 }
 0x151   : > { %v455_v53 = vpop.f32.mrb[5].mxu1 }
 0x154   : > { %v1673_v54 = vpop.f32.mrb[6].mxu1 }
 0x155   : > { %v465_v55 = vpop.f32.mrb[7].mxu1 }
 0x158   : > { %v1676_v56 = vpop.f32.mrb[8].mxu1 }
 0x159   : > { %v475_v57 = vpop.f32.mrb[9].mxu1 }
 0x15c   : > { %v1679_v58 = vpop.f32.mrb[10].mxu1 }
 0x15d   : > { %v485_v59 = vpop.f32.mrb[11].mxu1 }
 0x160   : > { %v2529_v60 = vpop.f32.mrb[12].mxu1 }
 0x161   : > { %v2531_v61 = vpop.f32.mrb[13].mxu1 }
 0x164   : > { %v2533_v62 = vpop.f32.mrb[14].mxu1 }
 0x165   : > { %v2535_v63 = vpop.f32.mrb[15].mxu1 }
 0x169   : > { %v1772_v0 = vpop.f32.mrb[0].mxu0 }
 0x16a   : > { %v1834_v2 = vadd.f32 %v1772_v0, %v1664_v48  ;;  %v1023_v3 = vpop.f32.mrb[1].mxu0 }
 0x16b   : > { %v1835_v4 = vadd.f32 %v1023_v3, %v435_v49 }
 0x16c   : > { %v1222_v5 = vadd.f32 %v1834_v2, %v2537_v1 }
 0x16d   : > { %v1221_v6 = vadd.f32 %v1835_v4, %v2537_v1  ;;  %v1775_v7 = vpop.f32.mrb[2].mxu0 }
 0x16e   : > { %v1254_v8 = vmax.f32 %v1222_v5, 0.0  ;;  %v1836_v9 = vadd.f32 %v1775_v7, %v1667_v50  ;;  %v1033_v10 = vpop.f32.mrb[3].mxu0 }
 0x16f   : > { %v1253_v11 = vmax.f32 %v1221_v6, 0.0  ;;  %v1837_v12 = vadd.f32 %v1033_v10, %v445_v51 }
 0x170   : > { %1287 = vst.msk [vmem:[%s2542_s22 + $0x8] sm:$0xff] %vm1285_vm1, %v1254_v8  ;;  %v1224_v13 = vadd.f32 %v1836_v9, %v2537_v1 }
 0x171   : > { %1286 = vst.msk [vmem:[%s2542_s22] sm:$0xff] %vm1285_vm1, %v1253_v11  ;;  %v1223_v14 = vadd.f32 %v1837_v12, %v2537_v1  ;;  %v1778_v15 = vpop.f32.mrb[4].mxu0 }
 0x172   : > { %v1256_v16 = vmax.f32 %v1224_v13, 0.0  ;;  %v1838_v17 = vadd.f32 %v1778_v15, %v1670_v52  ;;  %v1043_v18 = vpop.f32.mrb[5].mxu0 }
 0x173   : > { %v1255_v19 = vmax.f32 %v1223_v14, 0.0  ;;  %v1839_v20 = vadd.f32 %v1043_v18, %v455_v53 }
 0x174   : > { %1289 = vst.msk [vmem:[%s2542_s22 + $0x18] sm:$0xff] %vm1285_vm1, %v1256_v16  ;;  %v1226_v21 = vadd.f32 %v1838_v17, %v2537_v1 }
 0x175   : > { %1288 = vst.msk [vmem:[%s2542_s22 + $0x10] sm:$0xff] %vm1285_vm1, %v1255_v19  ;;  %v1225_v22 = vadd.f32 %v1839_v20, %v2537_v1  ;;  %v1781_v23 = vpop.f32.mrb[6].mxu0 }
 0x176   : > { %v1258_v24 = vmax.f32 %v1226_v21, 0.0  ;;  %v1840_v25 = vadd.f32 %v1781_v23, %v1673_v54  ;;  %v1053_v26 = vpop.f32.mrb[7].mxu0 }
 0x177   : > { %v1257_v27 = vmax.f32 %v1225_v22, 0.0  ;;  %v1841_v28 = vadd.f32 %v1053_v26, %v465_v55 }
 0x178   : > { %1291 = vst.msk [vmem:[%s2542_s22 + $0x28] sm:$0xff] %vm1285_vm1, %v1258_v24  ;;  %v1228_v29 = vadd.f32 %v1840_v25, %v2537_v1 }
 0x179   : > { %1290 = vst.msk [vmem:[%s2542_s22 + $0x20] sm:$0xff] %vm1285_vm1, %v1257_v27  ;;  %v1227_v30 = vadd.f32 %v1841_v28, %v2537_v1  ;;  %v1784_v31 = vpop.f32.mrb[8].mxu0 }
 0x17a   : > { %v1260_v32 = vmax.f32 %v1228_v29, 0.0  ;;  %v1842_v33 = vadd.f32 %v1784_v31, %v1676_v56  ;;  %v1063_v34 = vpop.f32.mrb[9].mxu0 }
 0x17b   : > { %v1259_v35 = vmax.f32 %v1227_v30, 0.0  ;;  %v1843_v36 = vadd.f32 %v1063_v34, %v475_v57 }
 0x17c   : > { %1293 = vst.msk [vmem:[%s2542_s22 + $0x38] sm:$0xff] %vm1285_vm1, %v1260_v32  ;;  %v1230_v37 = vadd.f32 %v1842_v33, %v2537_v1 }
 0x17d   : > { %1292 = vst.msk [vmem:[%s2542_s22 + $0x30] sm:$0xff] %vm1285_vm1, %v1259_v35  ;;  %v1229_v38 = vadd.f32 %v1843_v36, %v2537_v1  ;;  %v1787_v39 = vpop.f32.mrb[10].mxu0 }
 0x17e   : > { %v1262_v40 = vmax.f32 %v1230_v37, 0.0  ;;  %v1844_v41 = vadd.f32 %v1787_v39, %v1679_v58  ;;  %v1073_v42 = vpop.f32.mrb[11].mxu0 }
 0x17f   : > { %v1261_v43 = vmax.f32 %v1229_v38, 0.0  ;;  %v1845_v44 = vadd.f32 %v1073_v42, %v485_v59 }
 0x180   : > { %1295 = vst.msk [vmem:[%s2542_s22 + $0x48] sm:$0xff] %vm1285_vm1, %v1262_v40  ;;  %v1232_v45 = vadd.f32 %v1844_v41, %v2537_v1 }
 0x181   : > { %1294 = vst.msk [vmem:[%s2542_s22 + $0x40] sm:$0xff] %vm1285_vm1, %v1261_v43  ;;  %v1231_v46 = vadd.f32 %v1845_v44, %v2537_v1  ;;  %v1790_v47 = vpop.f32.mrb[12].mxu0 }
 0x182   : > { %v1264_v48 = vmax.f32 %v1232_v45, 0.0  ;;  %v1846_v49 = vadd.f32 %v1790_v47, %v2529_v60  ;;  %v1083_v50 = vpop.f32.mrb[13].mxu0 }
 0x183   : > { %v1263_v51 = vmax.f32 %v1231_v46, 0.0  ;;  %v1847_v52 = vadd.f32 %v1083_v50, %v2531_v61 }
 0x184   : > { %1297 = vst.msk [vmem:[%s2542_s22 + $0x58] sm:$0xff] %vm1285_vm1, %v1264_v48  ;;  %v1234_v53 = vadd.f32 %v1846_v49, %v2537_v1 }
 0x185   : > { %1296 = vst.msk [vmem:[%s2542_s22 + $0x50] sm:$0xff] %vm1285_vm1, %v1263_v51  ;;  %v1233_v54 = vadd.f32 %v1847_v52, %v2537_v1  ;;  %v1793_v55 = vpop.f32.mrb[14].mxu0 }
 0x186   : > { %v1266_v56 = vmax.f32 %v1234_v53, 0.0  ;;  %v1848_v57 = vadd.f32 %v1793_v55, %v2533_v62  ;;  %v1093_v58 = vpop.f32.mrb[15].mxu0 }
 0x187   : > { %v1265_v59 = vmax.f32 %v1233_v54, 0.0  ;;  %v1849_v60 = vadd.f32 %v1093_v58, %v2535_v63 }
 0x188   : > { %1299 = vst.msk [vmem:[%s2542_s22 + $0x68] sm:$0xff] %vm1285_vm1, %v1266_v56  ;;  %v1236_v61 = vadd.f32 %v1848_v57, %v2537_v1  ;;  %v1742_v0 = vpop.f32.mrb[16].mxu1 }
 0x189   : > { %1298 = vst.msk [vmem:[%s2542_s22 + $0x60] sm:$0xff] %vm1285_vm1, %v1265_v59  ;;  %v1235_v2 = vadd.f32 %v1849_v60, %v2537_v1  ;;  %v1796_v3 = vpop.f32.mrb[16].mxu0  ;;  %v746_v4 = vpop.f32.mrb[17].mxu1 }
 0x18a   : > { %v1268_v5 = vmax.f32 %v1236_v61, 0.0  ;;  %v1850_v6 = vadd.f32 %v1796_v3, %v1742_v0  ;;  %v1103_v62 = vpop.f32.mrb[17].mxu0 }
 0x18b   : > { %v1267_v7 = vmax.f32 %v1235_v2, 0.0  ;;  %v1851_v8 = vadd.f32 %v1103_v62, %v746_v4 }
 0x18c   : > { %1301 = vst.msk [vmem:[%s2542_s22 + $0x78] sm:$0xff] %vm1285_vm1, %v1268_v5  ;;  %v1238_v63 = vadd.f32 %v1850_v6, %v2537_v1  ;;  %v1745_v9 = vpop.f32.mrb[18].mxu1 }
 0x18d   : > { %1300 = vst.msk [vmem:[%s2542_s22 + $0x70] sm:$0xff] %vm1285_vm1, %v1267_v7  ;;  %v1237_v10 = vadd.f32 %v1851_v8, %v2537_v1  ;;  %v1799_v11 = vpop.f32.mrb[18].mxu0  ;;  %v756_v12 = vpop.f32.mrb[19].mxu1 }
 0x18e   : > { %v1270_v13 = vmax.f32 %v1238_v63, 0.0  ;;  %v1852_v14 = vadd.f32 %v1799_v11, %v1745_v9  ;;  %v1113_v15 = vpop.f32.mrb[19].mxu0 }
 0x18f   : > { %v1269_v16 = vmax.f32 %v1237_v10, 0.0  ;;  %v1853_v17 = vadd.f32 %v1113_v15, %v756_v12 }
 0x190   : > { %1303 = vst.msk [vmem:[%s2542_s22 + $0x88] sm:$0xff] %vm1285_vm1, %v1270_v13  ;;  %v1240_v18 = vadd.f32 %v1852_v14, %v2537_v1  ;;  %v1748_v19 = vpop.f32.mrb[20].mxu1 }
 0x191   : > { %1302 = vst.msk [vmem:[%s2542_s22 + $0x80] sm:$0xff] %vm1285_vm1, %v1269_v16  ;;  %v1239_v20 = vadd.f32 %v1853_v17, %v2537_v1  ;;  %v1802_v21 = vpop.f32.mrb[20].mxu0  ;;  %v766_v22 = vpop.f32.mrb[21].mxu1 }
 0x192   : > { %v1272_v23 = vmax.f32 %v1240_v18, 0.0  ;;  %v1854_v24 = vadd.f32 %v1802_v21, %v1748_v19  ;;  %v1123_v25 = vpop.f32.mrb[21].mxu0 }
 0x193   : > { %v1271_v26 = vmax.f32 %v1239_v20, 0.0  ;;  %v1855_v27 = vadd.f32 %v1123_v25, %v766_v22 }
 0x194   : > { %1305 = vst.msk [vmem:[%s2542_s22 + $0x98] sm:$0xff] %vm1285_vm1, %v1272_v23  ;;  %v1242_v28 = vadd.f32 %v1854_v24, %v2537_v1  ;;  %v1751_v29 = vpop.f32.mrb[22].mxu1 }
 0x195   : > { %1304 = vst.msk [vmem:[%s2542_s22 + $0x90] sm:$0xff] %vm1285_vm1, %v1271_v26  ;;  %v1241_v30 = vadd.f32 %v1855_v27, %v2537_v1  ;;  %v1805_v31 = vpop.f32.mrb[22].mxu0  ;;  %v776_v32 = vpop.f32.mrb[23].mxu1 }
 0x196   : > { %v1274_v33 = vmax.f32 %v1242_v28, 0.0  ;;  %v1856_v34 = vadd.f32 %v1805_v31, %v1751_v29  ;;  %v1133_v35 = vpop.f32.mrb[23].mxu0 }
 0x197   : > { %v1273_v36 = vmax.f32 %v1241_v30, 0.0  ;;  %v1857_v37 = vadd.f32 %v1133_v35, %v776_v32 }
 0x198   : > { %1307 = vst.msk [vmem:[%s2542_s22 + $0xa8] sm:$0xff] %vm1285_vm1, %v1274_v33  ;;  %v1244_v38 = vadd.f32 %v1856_v34, %v2537_v1  ;;  %v1754_v39 = vpop.f32.mrb[24].mxu1 }
 0x199   : > { %1306 = vst.msk [vmem:[%s2542_s22 + $0xa0] sm:$0xff] %vm1285_vm1, %v1273_v36  ;;  %v1243_v40 = vadd.f32 %v1857_v37, %v2537_v1  ;;  %v1808_v41 = vpop.f32.mrb[24].mxu0  ;;  %v786_v42 = vpop.f32.mrb[25].mxu1 }
 0x19a   : > { %v1276_v43 = vmax.f32 %v1244_v38, 0.0  ;;  %v1858_v44 = vadd.f32 %v1808_v41, %v1754_v39  ;;  %v1143_v45 = vpop.f32.mrb[25].mxu0 }
 0x19b   : > { %v1275_v46 = vmax.f32 %v1243_v40, 0.0  ;;  %v1859_v47 = vadd.f32 %v1143_v45, %v786_v42 }
 0x19c   : > { %1309 = vst.msk [vmem:[%s2542_s22 + $0xb8] sm:$0xff] %vm1285_vm1, %v1276_v43  ;;  %v1246_v48 = vadd.f32 %v1858_v44, %v2537_v1  ;;  %v1757_v49 = vpop.f32.mrb[26].mxu1 }
 0x19d   : > { %1308 = vst.msk [vmem:[%s2542_s22 + $0xb0] sm:$0xff] %vm1285_vm1, %v1275_v46  ;;  %v1245_v50 = vadd.f32 %v1859_v47, %v2537_v1  ;;  %v1811_v51 = vpop.f32.mrb[26].mxu0  ;;  %v796_v52 = vpop.f32.mrb[27].mxu1 }
 0x19e   : > { %v1278_v53 = vmax.f32 %v1246_v48, 0.0  ;;  %v1860_v54 = vadd.f32 %v1811_v51, %v1757_v49  ;;  %v1153_v55 = vpop.f32.mrb[27].mxu0 }
 0x19f   : > { %v1277_v56 = vmax.f32 %v1245_v50, 0.0  ;;  %v1861_v57 = vadd.f32 %v1153_v55, %v796_v52 }
 0x1a0   : > { %1311 = vst.msk [vmem:[%s2542_s22 + $0xc8] sm:$0xff] %vm1285_vm1, %v1278_v53  ;;  %v1248_v58 = vadd.f32 %v1860_v54, %v2537_v1  ;;  %v1760_v59 = vpop.f32.mrb[28].mxu1 }
 0x1a1   : > { %1310 = vst.msk [vmem:[%s2542_s22 + $0xc0] sm:$0xff] %vm1285_vm1, %v1277_v56  ;;  %v1247_v60 = vadd.f32 %v1861_v57, %v2537_v1  ;;  %v1814_v61 = vpop.f32.mrb[28].mxu0  ;;  %v806_v0 = vpop.f32.mrb[29].mxu1 }
 0x1a2   : > { %v1280_v2 = vmax.f32 %v1248_v58, 0.0  ;;  %v1862_v3 = vadd.f32 %v1814_v61, %v1760_v59  ;;  %v1163_v4 = vpop.f32.mrb[29].mxu0 }
 0x1a3   : > { %v1279_v5 = vmax.f32 %v1247_v60, 0.0  ;;  %v1863_v6 = vadd.f32 %v1163_v4, %v806_v0 }
 0x1a4   : > { %1313 = vst.msk [vmem:[%s2542_s22 + $0xd8] sm:$0xff] %vm1285_vm1, %v1280_v2  ;;  %v1250_v62 = vadd.f32 %v1862_v3, %v2537_v1  ;;  %v1763_v7 = vpop.f32.mrb[30].mxu1 }
 0x1a5   : > { %1312 = vst.msk [vmem:[%s2542_s22 + $0xd0] sm:$0xff] %vm1285_vm1, %v1279_v5  ;;  %v1249_v8 = vadd.f32 %v1863_v6, %v2537_v1  ;;  %v1817_v63 = vpop.f32.mrb[30].mxu0  ;;  %v816_v9 = vpop.f32.mrb[31].mxu1 }
 0x1a6   : > { %v1282_v10 = vmax.f32 %v1250_v62, 0.0  ;;  %v1864_v11 = vadd.f32 %v1817_v63, %v1763_v7  ;;  %v1173_v12 = vpop.f32.mrb[31].mxu0 }
 0x1a7   : > { %v1281_v13 = vmax.f32 %v1249_v8, 0.0  ;;  %v1865_v14 = vadd.f32 %v1173_v12, %v816_v9 }
 0x1a8   : > { %1315 = vst.msk [vmem:[%s2542_s22 + $0xe8] sm:$0xff] %vm1285_vm1, %v1282_v10  ;;  %v1252_v15 = vadd.f32 %v1864_v11, %v2537_v1 }
 0x1a9   : > { %1314 = vst.msk [vmem:[%s2542_s22 + $0xe0] sm:$0xff] %vm1285_vm1, %v1281_v13  ;;  %v1251_v16 = vadd.f32 %v1865_v14, %v2537_v1 }
 0x1aa   : > { %v1284_v17 = vmax.f32 %v1252_v15, 0.0 }
 0x1ab   : > { %v1283_v18 = vmax.f32 %v1251_v16, 0.0 }
 0x1ac   : > { %1317 = vst.msk [vmem:[%s2542_s22 + $0xf8] sm:$0xff] %vm1285_vm1, %v1284_v17 }
 0x1ad   : > { %1316 = vst.msk [vmem:[%s2542_s22 + $0xf0] sm:$0xff] %vm1285_vm1, %v1283_v18 }
 0x1ae   : > { %2087 = shalt.err (!%p2084_p2)
}
 0x1af   : > { %s2088_s28 = scalar_lea.hbm %s2643_s26, 4096  ;;  %s2092_s8 = scalar_lea.hbm %s2701_s3, 8192 }
 0x1b0   : > { %p2089_p0 = scmp.ne.s32.totalorder %s2643_s26, %s2088_s28  ;;  %p2093_p6 = scmp.lt.u32.totalorder %s2643_s26, %s2701_s3 }
 0x1b1   : > { %p2094_p7 = scmp.lt.u32.totalorder %s2092_s8, %s2088_s28  ;;  %p2096_p8 = scmp.lt.u32.totalorder %s2088_s28, %s2643_s26 }
 0x1b2   : > { %p2090_p4 = pnand %p2089_p0, %p2716_p12 }
 0x1b3   : > { %p2095_p11 = por %p2094_p7, %p2093_p6 }
 0x1b4   : > { %p2091_p13 = pneg %p2090_p4 }
 0x1b5   : > { %p2097_p1 = por %p2096_p8, %p2095_p11 }
 0x1b7   : > { %p2098_p10 = pnand %p2097_p1, %p2091_p13 }
 0x1b9   : > { %2101 = shalt.err (!%p2098_p10)
}
 0x1ba   : > { %s2168_s22 = smov 128   ;;  %s2169_s24 = smov 8  }
 0x1bb   : > { %1911 = dma.vmem_to_hbm [thread:$0]  (%p2716_p12), %s2645_s11, 4096, %s2643_s26, %s1319_s15, %s2168_s22, %s2168_s22, %s2169_s24  }
 0x1bc PF: > { %s1349_s18 = sand.u32 1, %s2140_s12   ;;  %p2717_p3 = scmp.ne.s32.totalorder %s2709_s23, 0 }
 0x1bd   : > { %p2718_p5 = scmp.ge.s32.totalorder %s2160_s17, 2  ;;  %s1350_s5 = scalar_lea.sflag [#allocation4], %s1349_s18 }
 0x1bf   : > { %p1925_p9 = pnand %p2718_p5, %p2717_p3 }
 0x1c1   : > { %2135 = dma.done.wait (!%p1925_p9), %s1350_s5, 4096  }
 0x1c2   : > { %2137 = vsyncadd (!%p1925_p9), %s1350_s5, 4294963200  ;;  %s20_s17 = sadd.s32 1, %s2160_s17   ;;  %s2719_s12 = smov %s2144_s13 }
 0x1c3   : > { %p17_p2 = scmp.ge.s32.totalorder %s20_s17, 4   ;;  %s2720_s13 = smov %s2148_s14 }
 0x1c4   : > { %s2721_s14 = smov %s2339_s6  ;;  %s2722_s15 = smov %s2156_s16 }
 0x1c5   : > { %s2723_s16 = smov %s2725_s25  ;;  %19 = sbr.rel (!%p17_p2) target bundleno = 7 (0x7), region = 87 }
 0x1cc   :  { %1355 = vsyncpa [#allocation3], 1 }
 0x1cd   :  { %1357 = vsyncpa [#allocation3 + $0x1], 1 }
 0x1ce   :  { %1358 = vsyncpa [#allocation6], 1 }
 0x1cf   :  { %1359 = vsyncpa [#allocation4], 1 }
 0x1d0   :  { %1361 = vsyncpa [#allocation4 + $0x1], 1 }

// kernel: _lambda_.12
= control target key start
LH: loop header
LB: loop body
LE: loop exit
PB: predicated region body
PF: predicated region fallthrough
CT: control target
= control target key end

     0   :  { %6 = vsyncpa [#allocation3], 0  ;;  %s717_s0 = inlined_call_operand.hbm [shape: f32[2,16,8,16], index: 0, kind: input, shape index: {}]   ;;  %s718_s1 = inlined_call_operand.hbm [shape: f32[2,8,8,8], index: 1, kind: output, shape index: {}]  }
   0x1   :  { %8 = vsyncpa [#allocation3 + $0x1], 0 }
   0x2   :  { %9 = vsyncpa [#allocation4], 0 }
   0x3   :  { %11 = vsyncpa [#allocation4 + $0x1], 0  ;;  %s517_s6 = smov 0   ;;  %s519_s7 = smov 0  }
   0x4   :  { %s521_s8 = smov 0   ;;  %s523_s9 = smov 0  }
   0x5 LB: > { %s538_s10 = sadd.s32 4294967295, %s498_s9   ;;  %s335_s11 = sadd.s32 4294967294, %s498_s9   ;;  %s498_s9 = sphi %s523_s9, %s731_s9   ;;  %s494_s8 = sphi %s521_s8, %s730_s8   ;;  %s490_s7 = sphi %s519_s7, %s729_s7   ;;  %s486_s6 = sphi %s517_s6, %s728_s6  }
   0x6   : > { %s542_s12 = sadd.s32 1, %s498_s9   ;;  %s24_s13 = sadd.s32 1, %s494_s8 }
   0x7   : > { %s21_s14 = ssub.s32 %s498_s9, %s542_s12  ;;  %p31_p0 = scmp.ne.s32.totalorder %s494_s8, %s490_s7 }
   0x8   : > { %p22_p1 = scmp.eq.s32.totalorder %s21_s14, 0  ;;  %p32_p2 = scmp.eq.s32.totalorder %s498_s9, 0 }
   0x9   : > { %p37_p3 = scmp.ne.s32.totalorder %s490_s7, %s486_s6  ;;  %p38_p4 = scmp.eq.s32.totalorder %s538_s10, 0 }
   0xa   : > { %s554_s15 = scalar_select %p22_p1, %s494_s8, %s24_s13  }
   0xb   : > { %p556_p5 = por %p32_p2, %p31_p0  ;;  %p560_p6 = por %p38_p4, %p37_p3 }
   0xc   : > { %p61_p7 = scmp.eq.s32.totalorder %s538_s10, 1  ;;  %p67_p8 = scmp.eq.s32.totalorder %s335_s11, 1 }
   0xd   : > { %p363_p10 = scmp.lt.s32.totalorder %s498_s9, 2  ;;  %s87_s20 = sand.u32 1, %s494_s8  }
   0xe   : > { %p567_p11 = por %p61_p7, %p31_p0  ;;  %p571_p12 = por %p67_p8, %p37_p3 }
   0xf   : > { %s349_s21 = sshll.u32 %s498_s9, 11  ;;  %s338_s22 = sshll.u32 %s87_s20, 7 }
  0x10   : > { %s722_s18 = scalar_select %p567_p11, 1, 0 }
  0x11   : > { %s723_s19 = scalar_select %p571_p12, 1, 0 }
  0x12   : > { %s580_s25 = scalar_lea.hbm %s717_s0, %s349_s21  ;;  %s91_s26 = scalar_lea.vmem [#allocation2], %s338_s22 }
  0x13   : > { %s98_s27 = sshll.u32 %s91_s26, 4  ;;  %p584_p13 = pnand %p363_p10, %p556_p5  ;;  %s588_s27 = int_to_ptr.vmem [resolvable:$true] %s98_s27 }
  0x14   : > { %s590_s29 = scalar_lea.sflag [#allocation3], %s87_s20  ;;  %s402_s30 = scalar_lea.hbm %s580_s25, 2048 }
  0x15   : > { %p403_p0 = scmp.ne.s32.totalorder %s580_s25, %s402_s30  ;;  %p404_p1 = pneg %p584_p13 }
  0x16   : > { %s407_s4 = scalar_lea.hbm %s717_s0, 4096  ;;  %p408_p4 = scmp.lt.u32.totalorder %s580_s25, %s717_s0 }
  0x17   : > { %p405_p2 = pnand %p404_p1, %p403_p0  ;;  %p409_p5 = scmp.lt.u32.totalorder %s407_s4, %s402_s30 }
  0x18   : > { %p411_p8 = scmp.lt.u32.totalorder %s402_s30, %s580_s25 }
  0x19   : > { %p406_p3 = pneg %p405_p2  ;;  %p410_p7 = por %p409_p5, %p408_p4 }
  0x1b   : > { %p412_p10 = por %p411_p8, %p410_p7 }
  0x1d   : > { %p413_p9 = pnand %p412_p10, %p406_p3 }
  0x1f   : > { %416 = shalt.err (!%p413_p9)
}
  0x20   : > { %s417_s13 = scalar_lea.vmem %s588_s27, 2048  ;;  %s500_s14 = smov [#allocation2]  }
  0x21   : > { %p418_p0 = scmp.ne.s32.totalorder %s588_s27, %s417_s13  ;;  %s422_s16 = sshll.u32 %s500_s14, 4  ;;  %s423_s16 = int_to_ptr.vmem [resolvable:$false] %s422_s16 }
  0x22   : > { %s424_s20 = scalar_lea.vmem %s423_s16, 4096  ;;  %p425_p11 = scmp.lt.s32.totalorder %s588_s27, %s423_s16 }
  0x23   : > { %p420_p2 = pnand %p418_p0, %p404_p1  ;;  %p426_p4 = scmp.lt.s32.totalorder %s424_s20, %s417_s13 }
  0x25   : > { %p421_p12 = pneg %p420_p2  ;;  %p427_p5 = por %p426_p4, %p425_p11 }
  0x27   : > { %p428_p7 = pnand %p427_p5, %p421_p12 }
  0x29   : > { %431 = shalt.err (!%p428_p7)
}
  0x2a   : > { %s501_s21 = smov 128   ;;  %s502_s22 = smov 8  }
  0x2b   : > { %358 = dma.hbm_to_vmem [thread:$0]  (!%p584_p13), %s580_s25, 2048, %s588_s27, %s590_s29, %s501_s21, %s501_s21, %s502_s22  }
  0x2c   : > { %p341_p9 = scmp.ge.s32.totalorder %s498_s9, 1  ;;  %p106_p1 = scmp.lt.s32.totalorder %s498_s9, 3 }
  0x2e   : > { %p107_p3 = pnand %p341_p9, %p106_p1 }
  0x2f   : > { %s621_s23 = sand.u32 (!%p107_p3), 1, %s490_s7  }
  0x30   : > { %110 = sbr.rel (%p107_p3) target bundleno = 219 (0xdb), region = 24  ;;  %s342_s24 = sshll.u32 (!%p107_p3), %s621_s23, 7 }
  0x31   : > { %s113_s26 = scalar_lea.sflag (!%p107_p3), [#allocation3], %s621_s23  ;;  %s625_s30 = scalar_lea.vmem (!%p107_p3), [#allocation2], %s342_s24 }
  0x37   : > { %477 = dma.done.wait (%p560_p6), %s113_s26, 2048  }
  0x38   : > { %479 = vsyncadd (%p560_p6), %s113_s26, 4294965248  ;;  %v137_v0 = vld [vmem:[%s625_s30 + $0x10] sm:$0xff]  ;;  %v135_v1 = vld [vmem:[%s625_s30] sm:$0xff]  ;;  %s503_s25 = smov 120   ;;  %s343_s17 = sshll.u32 %s621_s23, 6  ;;  %vm239_vm0 = vcmask 64512  }
  0x39   : > { %171 = vrot.lane.b32.xlu1 %v137_v0, %s503_s25  ;;  %167 = vrot.lane.b32.xlu0 %v135_v1, %s503_s25  ;;  %v138_v2 = vld [vmem:[%s625_s30 + $0x18] sm:$0xff]  ;;  %v136_v3 = vld [vmem:[%s625_s30 + $0x8] sm:$0xff]  ;;  %s648_s27 = scalar_lea.vmem [#allocation5], %s343_s17  ;;  %s350_s28 = sshll.u32 %s538_s10, 10 }
  0x3a   : > { %v140_v4 = vld [vmem:[%s625_s30 + $0x28] sm:$0xff]  ;;  %v139_v5 = vld [vmem:[%s625_s30 + $0x20] sm:$0xff]  ;;  %v142_v6 = vld [vmem:[%s625_s30 + $0x38] sm:$0xff]  ;;  %s262_s29 = sshll.u32 %s648_s27, 4  ;;  %s669_s4 = scalar_lea.hbm %s718_s1, %s350_s28  ;;  %s671_s29 = int_to_ptr.vmem [resolvable:$true] %s262_s29 }
  0x3b   : > { %v141_v7 = vld [vmem:[%s625_s30 + $0x30] sm:$0xff]  ;;  %v144_v8 = vld [vmem:[%s625_s30 + $0x48] sm:$0xff]  ;;  %v143_v9 = vld [vmem:[%s625_s30 + $0x40] sm:$0xff]  ;;  %s249_s10 = scalar_lea.sflag [#allocation4], %s621_s23  ;;  %s432_s5 = scalar_lea.vmem %s671_s29, 1024 }
  0x3c   : > { %v146_v10 = vld [vmem:[%s625_s30 + $0x58] sm:$0xff]  ;;  %v145_v11 = vld [vmem:[%s625_s30 + $0x50] sm:$0xff]  ;;  %v148_v12 = vld [vmem:[%s625_s30 + $0x68] sm:$0xff]  ;;  %p433_p6 = scmp.ne.s32.totalorder %s671_s29, %s432_s5  ;;  %p725_p11 = scmp.ne.s32.totalorder %s722_s18, 0 }
  0x3d   : > { %173 = vrot.lane.b32.xlu1 %v138_v2, %s503_s25  ;;  %169 = vrot.lane.b32.xlu0 %v136_v3, %s503_s25  ;;  %v147_v13 = vld [vmem:[%s625_s30 + $0x60] sm:$0xff]  ;;  %v150_v14 = vld [vmem:[%s625_s30 + $0x78] sm:$0xff]  ;;  %s504_s11 = smov [#allocation5]  }
  0x3e   : > { %v149_v15 = vld [vmem:[%s625_s30 + $0x70] sm:$0xff]  ;;  %p434_p12 = pnand %p433_p6, %p725_p11  ;;  %s436_s13 = sshll.u32 %s504_s11, 4  ;;  %s437_s13 = int_to_ptr.vmem [resolvable:$false] %s436_s13 }
  0x3f   : > { %s438_s14 = scalar_lea.vmem %s437_s13, 2048  ;;  %p439_p8 = scmp.lt.s32.totalorder %s671_s29, %s437_s13 }
  0x40   : > { %p435_p13 = pneg %p434_p12  ;;  %p440_p10 = scmp.lt.s32.totalorder %s438_s14, %s432_s5 }
  0x41   : > { %177 = vrot.lane.b32.xlu1 %v140_v4, %s503_s25  ;;  %175 = vrot.lane.b32.xlu0 %v139_v5, %s503_s25 }
  0x42   : > { %p441_p0 = por %p440_p10, %p439_p8 }
  0x44   : > { %p442_p2 = pnand %p441_p0, %p435_p13 }
  0x45   : > { %181 = vrot.lane.b32.xlu1 %v142_v6, %s503_s25  ;;  %179 = vrot.lane.b32.xlu0 %v141_v7, %s503_s25 }
  0x49   : > { %185 = vrot.lane.b32.xlu1 %v144_v8, %s503_s25  ;;  %183 = vrot.lane.b32.xlu0 %v143_v9, %s503_s25 }
  0x4d   : > { %189 = vrot.lane.b32.xlu1 %v146_v10, %s503_s25  ;;  %187 = vrot.lane.b32.xlu0 %v145_v11, %s503_s25 }
  0x51   : > { %193 = vrot.lane.b32.xlu1 %v148_v12, %s503_s25  ;;  %191 = vrot.lane.b32.xlu0 %v147_v13, %s503_s25 }
  0x55   : > { %197 = vrot.lane.b32.xlu1 %v150_v14, %s503_s25  ;;  %195 = vrot.lane.b32.xlu0 %v149_v15, %s503_s25 }
  0xab   : > { %v172_v16 = vpop.permute.xlu1 %171  ;;  %v168_v17 = vpop.permute.xlu0 %167 }
  0xac   : > { %v217_v20 = vmax.f32 %v137_v0, %v172_v16  ;;  %v215_v21 = vmax.f32 %v135_v1, %v168_v17 }
  0xaf   : > { %v174_v18 = vpop.permute.xlu1 %173  ;;  %v170_v19 = vpop.permute.xlu0 %169 }
  0xb0   : > { %v218_v22 = vmax.f32 %v138_v2, %v174_v18  ;;  %v216_v23 = vmax.f32 %v136_v3, %v170_v19 }
  0xb2   : > { %v232_v24 = vmax.f32 %v217_v20, %v218_v22  ;;  %v231_v25 = vmax.f32 %v215_v21, %v216_v23 }
  0xb3   : > { %v178_v26 = vpop.permute.xlu1 %177  ;;  %v176_v27 = vpop.permute.xlu0 %175 }
  0xb4   : > { %241 = vst.msk [vmem:[%s648_s27 + $0x8] sm:$0xff] %vm239_vm0, %v232_v24  ;;  %240 = vst.msk [vmem:[%s648_s27] sm:$0xff] %vm239_vm0, %v231_v25  ;;  %v220_v28 = vmax.f32 %v140_v4, %v178_v26  ;;  %v219_v29 = vmax.f32 %v139_v5, %v176_v27 }
  0xb6   : > { %v233_v30 = vmax.f32 %v219_v29, %v220_v28 }
  0xb7   : > { %v182_v31 = vpop.permute.xlu1 %181  ;;  %v180_v32 = vpop.permute.xlu0 %179 }
  0xb8   : > { %242 = vst.msk [vmem:[%s648_s27 + $0x10] sm:$0xff] %vm239_vm0, %v233_v30  ;;  %v222_v33 = vmax.f32 %v142_v6, %v182_v31  ;;  %v221_v34 = vmax.f32 %v141_v7, %v180_v32 }
  0xba   : > { %v234_v35 = vmax.f32 %v221_v34, %v222_v33 }
  0xbb   : > { %v186_v36 = vpop.permute.xlu1 %185  ;;  %v184_v37 = vpop.permute.xlu0 %183 }
  0xbc   : > { %243 = vst.msk [vmem:[%s648_s27 + $0x18] sm:$0xff] %vm239_vm0, %v234_v35  ;;  %v224_v38 = vmax.f32 %v144_v8, %v186_v36  ;;  %v223_v39 = vmax.f32 %v143_v9, %v184_v37 }
  0xbe   : > { %v235_v40 = vmax.f32 %v223_v39, %v224_v38 }
  0xbf   : > { %v190_v41 = vpop.permute.xlu1 %189  ;;  %v188_v42 = vpop.permute.xlu0 %187 }
  0xc0   : > { %244 = vst.msk [vmem:[%s648_s27 + $0x20] sm:$0xff] %vm239_vm0, %v235_v40  ;;  %v226_v43 = vmax.f32 %v146_v10, %v190_v41  ;;  %v225_v44 = vmax.f32 %v145_v11, %v188_v42 }
  0xc2   : > { %v236_v45 = vmax.f32 %v225_v44, %v226_v43 }
  0xc3   : > { %v194_v46 = vpop.permute.xlu1 %193  ;;  %v192_v47 = vpop.permute.xlu0 %191 }
  0xc4   : > { %245 = vst.msk [vmem:[%s648_s27 + $0x28] sm:$0xff] %vm239_vm0, %v236_v45  ;;  %v228_v48 = vmax.f32 %v148_v12, %v194_v46  ;;  %v227_v49 = vmax.f32 %v147_v13, %v192_v47 }
  0xc6   : > { %v237_v50 = vmax.f32 %v227_v49, %v228_v48 }
  0xc7   : > { %v198_v51 = vpop.permute.xlu1 %197  ;;  %v196_v52 = vpop.permute.xlu0 %195 }
  0xc8   : > { %246 = vst.msk [vmem:[%s648_s27 + $0x30] sm:$0xff] %vm239_vm0, %v237_v50  ;;  %v230_v53 = vmax.f32 %v150_v14, %v198_v51  ;;  %v229_v54 = vmax.f32 %v149_v15, %v196_v52 }
  0xca   : > { %v238_v55 = vmax.f32 %v229_v54, %v230_v53 }
  0xcc   : > { %247 = vst.msk [vmem:[%s648_s27 + $0x38] sm:$0xff] %vm239_vm0, %v238_v55 }
  0xcd   : > { %445 = shalt.err (!%p442_p2)
}
  0xce   : > { %s446_s16 = scalar_lea.hbm %s669_s4, 1024  ;;  %s450_s22 = scalar_lea.hbm %s718_s1, 2048 }
  0xcf   : > { %p447_p4 = scmp.ne.s32.totalorder %s669_s4, %s446_s16  ;;  %p451_p9 = scmp.lt.u32.totalorder %s669_s4, %s718_s1 }
  0xd0   : > { %p452_p1 = scmp.lt.u32.totalorder %s450_s22, %s446_s16  ;;  %p454_p6 = scmp.lt.u32.totalorder %s446_s16, %s669_s4 }
  0xd1   : > { %p448_p5 = pnand %p447_p4, %p725_p11 }
  0xd2   : > { %p453_p3 = por %p452_p1, %p451_p9 }
  0xd3   : > { %p449_p7 = pneg %p448_p5 }
  0xd4   : > { %p455_p12 = por %p454_p6, %p453_p3 }
  0xd6   : > { %p456_p13 = pnand %p455_p12, %p449_p7 }
  0xd8   : > { %459 = shalt.err (!%p456_p13)
}
  0xd9   : > { %s505_s30 = smov 128   ;;  %s506_s25 = smov 8  }
  0xda   : > { %353 = dma.vmem_to_hbm [thread:$0]  (%p725_p11), %s671_s29, 1024, %s669_s4, %s249_s10, %s505_s30, %s505_s30, %s506_s25  }
  0xdb PF: > { %s277_s17 = sand.u32 1, %s486_s6   ;;  %p726_p8 = scmp.ne.s32.totalorder %s723_s19, 0 }
  0xdc   : > { %p727_p10 = scmp.ge.s32.totalorder %s498_s9, 2  ;;  %s278_s27 = scalar_lea.sflag [#allocation4], %s277_s17 }
  0xde   : > { %p360_p0 = pnand %p727_p10, %p726_p8 }
  0xe0   : > { %481 = dma.done.wait (!%p360_p0), %s278_s27, 1024  }
  0xe1   : > { %483 = vsyncadd (!%p360_p0), %s278_s27, 4294966272  ;;  %p14_p2 = scmp.ge.s32.totalorder %s542_s12, 4   ;;  %s728_s6 = smov %s490_s7 }
  0xe2   : > { %s729_s7 = smov %s494_s8  ;;  %s730_s8 = smov %s554_s15 }
  0xe3   : > { %s731_s9 = smov %s542_s12  ;;  %16 = sbr.rel (!%p14_p2) target bundleno = 5 (0x5), region = 69 }
  0xea   :  { %283 = vsyncpa [#allocation3], 1 }
  0xeb   :  { %285 = vsyncpa [#allocation3 + $0x1], 1 }
  0xec   :  { %286 = vsyncpa [#allocation4], 1 }
  0xed   :  { %288 = vsyncpa [#allocation4 + $0x1], 1 }

// kernel: _lambda_.14
= control target key start
LH: loop header
LB: loop body
LE: loop exit
PB: predicated region body
PF: predicated region fallthrough
CT: control target
= control target key end

     0   :  { %6 = vsyncpa [#allocation3], 0  ;;  %s628_s0 = inlined_call_operand.hbm [shape: f32[2,8,4,32], index: 0, kind: input, shape index: {}]   ;;  %s629_s1 = inlined_call_operand.hbm [shape: f32[2,4,4,16], index: 1, kind: output, shape index: {}]  }
   0x1   :  { %8 = vsyncpa [#allocation3 + $0x1], 0 }
   0x2   :  { %9 = vsyncpa [#allocation4], 0 }
   0x3   :  { %11 = vsyncpa [#allocation4 + $0x1], 0  ;;  %s461_s6 = smov 0   ;;  %s463_s7 = smov 0  }
   0x4   :  { %s465_s8 = smov 0   ;;  %s467_s9 = smov 0  }
   0x5 LB: > { %s482_s10 = sadd.s32 4294967295, %s442_s9   ;;  %s279_s11 = sadd.s32 4294967294, %s442_s9   ;;  %s442_s9 = sphi %s467_s9, %s642_s9   ;;  %s438_s8 = sphi %s465_s8, %s641_s8   ;;  %s434_s7 = sphi %s463_s7, %s640_s7   ;;  %s430_s6 = sphi %s461_s6, %s639_s6  }
   0x6   : > { %s486_s12 = sadd.s32 1, %s442_s9   ;;  %s24_s13 = sadd.s32 1, %s438_s8 }
   0x7   : > { %s21_s14 = ssub.s32 %s442_s9, %s486_s12  ;;  %p31_p0 = scmp.ne.s32.totalorder %s438_s8, %s434_s7 }
   0x8   : > { %p22_p1 = scmp.eq.s32.totalorder %s21_s14, 0  ;;  %p32_p2 = scmp.eq.s32.totalorder %s442_s9, 0 }
   0x9   : > { %p37_p3 = scmp.ne.s32.totalorder %s434_s7, %s430_s6  ;;  %p38_p4 = scmp.eq.s32.totalorder %s482_s10, 0 }
   0xa   : > { %s498_s15 = scalar_select %p22_p1, %s438_s8, %s24_s13  }
   0xb   : > { %p500_p5 = por %p32_p2, %p31_p0  ;;  %p504_p6 = por %p38_p4, %p37_p3 }
   0xc   : > { %p61_p7 = scmp.eq.s32.totalorder %s482_s10, 1  ;;  %p67_p8 = scmp.eq.s32.totalorder %s279_s11, 1 }
   0xd   : > { %p307_p10 = scmp.lt.s32.totalorder %s442_s9, 2  ;;  %s87_s20 = sand.u32 1, %s438_s8  }
   0xe   : > { %p511_p11 = por %p61_p7, %p31_p0  ;;  %p515_p12 = por %p67_p8, %p37_p3 }
   0xf   : > { %s293_s21 = sshll.u32 %s442_s9, 9  ;;  %s282_s22 = sshll.u32 %s87_s20, 5 }
  0x10   : > { %s633_s18 = scalar_select %p511_p11, 1, 0 }
  0x11   : > { %s634_s19 = scalar_select %p515_p12, 1, 0 }
  0x12   : > { %s524_s25 = scalar_lea.hbm %s628_s0, %s293_s21  ;;  %s91_s26 = scalar_lea.vmem [#allocation2], %s282_s22 }
  0x13   : > { %s98_s27 = sshll.u32 %s91_s26, 4  ;;  %p528_p13 = pnand %p307_p10, %p500_p5  ;;  %s532_s27 = int_to_ptr.vmem [resolvable:$true] %s98_s27 }
  0x14   : > { %s534_s29 = scalar_lea.sflag [#allocation3], %s87_s20  ;;  %s346_s30 = scalar_lea.hbm %s524_s25, 512 }
  0x15   : > { %p347_p0 = scmp.ne.s32.totalorder %s524_s25, %s346_s30  ;;  %p348_p1 = pneg %p528_p13 }
  0x16   : > { %s351_s4 = scalar_lea.hbm %s628_s0, 1024  ;;  %p352_p4 = scmp.lt.u32.totalorder %s524_s25, %s628_s0 }
  0x17   : > { %p349_p2 = pnand %p348_p1, %p347_p0  ;;  %p353_p5 = scmp.lt.u32.totalorder %s351_s4, %s346_s30 }
  0x18   : > { %p355_p8 = scmp.lt.u32.totalorder %s346_s30, %s524_s25 }
  0x19   : > { %p350_p3 = pneg %p349_p2  ;;  %p354_p7 = por %p353_p5, %p352_p4 }
  0x1b   : > { %p356_p10 = por %p355_p8, %p354_p7 }
  0x1d   : > { %p357_p9 = pnand %p356_p10, %p350_p3 }
  0x1f   : > { %360 = shalt.err (!%p357_p9)
}
  0x20   : > { %s361_s13 = scalar_lea.vmem %s532_s27, 512  ;;  %s444_s14 = smov [#allocation2]  }
  0x21   : > { %p362_p0 = scmp.ne.s32.totalorder %s532_s27, %s361_s13  ;;  %s366_s16 = sshll.u32 %s444_s14, 4  ;;  %s367_s16 = int_to_ptr.vmem [resolvable:$false] %s366_s16 }
  0x22   : > { %s368_s20 = scalar_lea.vmem %s367_s16, 1024  ;;  %p369_p11 = scmp.lt.s32.totalorder %s532_s27, %s367_s16 }
  0x23   : > { %p364_p2 = pnand %p362_p0, %p348_p1  ;;  %p370_p4 = scmp.lt.s32.totalorder %s368_s20, %s361_s13 }
  0x25   : > { %p365_p12 = pneg %p364_p2  ;;  %p371_p5 = por %p370_p4, %p369_p11 }
  0x27   : > { %p372_p7 = pnand %p371_p5, %p365_p12 }
  0x29   : > { %375 = shalt.err (!%p372_p7)
}
  0x2a   : > { %s445_s21 = smov 64   ;;  %s446_s22 = smov 4  }
  0x2b   : > { %302 = dma.hbm_to_vmem [thread:$0]  (!%p528_p13), %s524_s25, 512, %s532_s27, %s534_s29, %s445_s21, %s445_s21, %s446_s22  }
  0x2c   : > { %p285_p9 = scmp.ge.s32.totalorder %s442_s9, 1  ;;  %p106_p1 = scmp.lt.s32.totalorder %s442_s9, 3 }
  0x2e   : > { %p107_p3 = pnand %p285_p9, %p106_p1 }
  0x2f   : > { %s565_s23 = sand.u32 (!%p107_p3), 1, %s434_s7  }
  0x30   : > { %110 = sbr.rel (%p107_p3) target bundleno = 203 (0xcb), region = 24  ;;  %s286_s24 = sshll.u32 (!%p107_p3), %s565_s23, 5 }
  0x31   : > { %s113_s26 = scalar_lea.sflag (!%p107_p3), [#allocation3], %s565_s23  ;;  %s116_s30 = scalar_lea.vmem (!%p107_p3), [#allocation2], %s286_s24 }
  0x37   : > { %421 = dma.done.wait (%p504_p6), %s113_s26, 512  }
  0x38   : > { %423 = vsyncadd (%p504_p6), %s113_s26, 4294966784  ;;  %v137_v0 = vld [vmem:[%s116_s30 + $0x8] sm:$0xf]  ;;  %v135_v1 = vld [vmem:[%s116_s30] sm:$0xf]  ;;  %s447_s25 = smov 112  }
  0x39   : > { %155 = vrot.lane.b32.xlu1 %v137_v0, %s447_s25  ;;  %151 = vrot.lane.b32.xlu0 %v135_v1, %s447_s25  ;;  %v138_v2 = vld [vmem:[%s116_s30 + $0xc] sm:$0xf]  ;;  %v136_v3 = vld [vmem:[%s116_s30 + $0x4] sm:$0xf]  ;;  %s287_s17 = sshll.u32 %s565_s23, 4  ;;  %vm187_vm0 = vcmask 125952  }
  0x3a   : > { %v140_v4 = vld [vmem:[%s116_s30 + $0x14] sm:$0xf]  ;;  %v139_v5 = vld [vmem:[%s116_s30 + $0x10] sm:$0xf]  ;;  %v142_v6 = vld [vmem:[%s116_s30 + $0x1c] sm:$0xf] }
  0x3b   : > { %v141_v7 = vld [vmem:[%s116_s30 + $0x18] sm:$0xf]  ;;  %s134_s27 = scalar_lea.vmem [#allocation5], %s287_s17  ;;  %s294_s29 = sshll.u32 %s482_s10, 8 }
  0x3c   : > { %s206_s28 = sshll.u32 %s134_s27, 4  ;;  %s583_s4 = scalar_lea.hbm %s629_s1, %s294_s29  ;;  %s577_s28 = int_to_ptr.vmem [resolvable:$true] %s206_s28 }
  0x3d   : > { %157 = vrot.lane.b32.xlu1 %v138_v2, %s447_s25  ;;  %153 = vrot.lane.b32.xlu0 %v136_v3, %s447_s25  ;;  %s193_s10 = scalar_lea.sflag [#allocation4], %s565_s23  ;;  %s376_s5 = scalar_lea.vmem %s577_s28, 256 }
  0x3e   : > { %p377_p6 = scmp.ne.s32.totalorder %s577_s28, %s376_s5  ;;  %p636_p11 = scmp.ne.s32.totalorder %s633_s18, 0 }
  0x3f   : > { %s448_s11 = smov [#allocation5]  }
  0x40   : > { %p378_p12 = pnand %p377_p6, %p636_p11  ;;  %s380_s13 = sshll.u32 %s448_s11, 4  ;;  %s381_s13 = int_to_ptr.vmem [resolvable:$false] %s380_s13 }
  0x41   : > { %161 = vrot.lane.b32.xlu1 %v140_v4, %s447_s25  ;;  %159 = vrot.lane.b32.xlu0 %v139_v5, %s447_s25  ;;  %s382_s14 = scalar_lea.vmem %s381_s13, 512  ;;  %p383_p8 = scmp.lt.s32.totalorder %s577_s28, %s381_s13 }
  0x42   : > { %p379_p13 = pneg %p378_p12  ;;  %p384_p10 = scmp.lt.s32.totalorder %s382_s14, %s376_s5 }
  0x44   : > { %p385_p0 = por %p384_p10, %p383_p8 }
  0x45   : > { %165 = vrot.lane.b32.xlu1 %v142_v6, %s447_s25  ;;  %163 = vrot.lane.b32.xlu0 %v141_v7, %s447_s25 }
  0x46   : > { %p386_p2 = pnand %p385_p0, %p379_p13 }
  0xab   : > { %v156_v8 = vpop.permute.xlu1 %155  ;;  %v152_v9 = vpop.permute.xlu0 %151 }
  0xac   : > { %v177_v12 = vmax.f32 %v137_v0, %v156_v8  ;;  %v175_v13 = vmax.f32 %v135_v1, %v152_v9 }
  0xaf   : > { %v158_v10 = vpop.permute.xlu1 %157  ;;  %v154_v11 = vpop.permute.xlu0 %153 }
  0xb0   : > { %v178_v14 = vmax.f32 %v138_v2, %v158_v10  ;;  %v176_v15 = vmax.f32 %v136_v3, %v154_v11 }
  0xb2   : > { %v184_v16 = vmax.f32 %v177_v12, %v178_v14  ;;  %v183_v17 = vmax.f32 %v175_v13, %v176_v15 }
  0xb3   : > { %v162_v18 = vpop.permute.xlu1 %161  ;;  %v160_v19 = vpop.permute.xlu0 %159 }
  0xb4   : > { %189 = vst.msk [vmem:[%s134_s27 + $0x4] sm:$0xf] %vm187_vm0, %v184_v16  ;;  %188 = vst.msk [vmem:[%s134_s27] sm:$0xf] %vm187_vm0, %v183_v17  ;;  %v180_v20 = vmax.f32 %v140_v4, %v162_v18  ;;  %v179_v21 = vmax.f32 %v139_v5, %v160_v19 }
  0xb6   : > { %v185_v22 = vmax.f32 %v179_v21, %v180_v20 }
  0xb7   : > { %v166_v23 = vpop.permute.xlu1 %165  ;;  %v164_v24 = vpop.permute.xlu0 %163 }
  0xb8   : > { %190 = vst.msk [vmem:[%s134_s27 + $0x8] sm:$0xf] %vm187_vm0, %v185_v22  ;;  %v182_v25 = vmax.f32 %v142_v6, %v166_v23  ;;  %v181_v26 = vmax.f32 %v141_v7, %v164_v24 }
  0xba   : > { %v186_v27 = vmax.f32 %v181_v26, %v182_v25 }
  0xbc   : > { %191 = vst.msk [vmem:[%s134_s27 + $0xc] sm:$0xf] %vm187_vm0, %v186_v27 }
  0xbd   : > { %389 = shalt.err (!%p386_p2)
}
  0xbe   : > { %s390_s16 = scalar_lea.hbm %s583_s4, 256  ;;  %s394_s22 = scalar_lea.hbm %s629_s1, 512 }
  0xbf   : > { %p391_p4 = scmp.ne.s32.totalorder %s583_s4, %s390_s16  ;;  %p395_p9 = scmp.lt.u32.totalorder %s583_s4, %s629_s1 }
  0xc0   : > { %p396_p1 = scmp.lt.u32.totalorder %s394_s22, %s390_s16  ;;  %p398_p6 = scmp.lt.u32.totalorder %s390_s16, %s583_s4 }
  0xc1   : > { %p392_p5 = pnand %p391_p4, %p636_p11 }
  0xc2   : > { %p397_p3 = por %p396_p1, %p395_p9 }
  0xc3   : > { %p393_p7 = pneg %p392_p5 }
  0xc4   : > { %p399_p12 = por %p398_p6, %p397_p3 }
  0xc6   : > { %p400_p13 = pnand %p399_p12, %p393_p7 }
  0xc8   : > { %403 = shalt.err (!%p400_p13)
}
  0xc9   : > { %s449_s30 = smov 64   ;;  %s450_s25 = smov 4  }
  0xca   : > { %297 = dma.vmem_to_hbm [thread:$0]  (%p636_p11), %s577_s28, 256, %s583_s4, %s193_s10, %s449_s30, %s449_s30, %s450_s25  }
  0xcb PF: > { %s221_s17 = sand.u32 1, %s430_s6   ;;  %p637_p8 = scmp.ne.s32.totalorder %s634_s19, 0 }
  0xcc   : > { %p638_p10 = scmp.ge.s32.totalorder %s442_s9, 2  ;;  %s222_s27 = scalar_lea.sflag [#allocation4], %s221_s17 }
  0xce   : > { %p304_p0 = pnand %p638_p10, %p637_p8 }
  0xd0   : > { %425 = dma.done.wait (!%p304_p0), %s222_s27, 256  }
  0xd1   : > { %427 = vsyncadd (!%p304_p0), %s222_s27, 4294967040  ;;  %p14_p2 = scmp.ge.s32.totalorder %s486_s12, 4   ;;  %s639_s6 = smov %s434_s7 }
  0xd2   : > { %s640_s7 = smov %s438_s8  ;;  %s641_s8 = smov %s498_s15 }
  0xd3   : > { %s642_s9 = smov %s486_s12  ;;  %16 = sbr.rel (!%p14_p2) target bundleno = 5 (0x5), region = 69 }
  0xda   :  { %227 = vsyncpa [#allocation3], 1 }
  0xdb   :  { %229 = vsyncpa [#allocation3 + $0x1], 1 }
  0xdc   :  { %230 = vsyncpa [#allocation4], 1 }
  0xdd   :  { %232 = vsyncpa [#allocation4 + $0x1], 1 }

// kernel: _lambda_.13
= control target key start
LH: loop header
LB: loop body
LE: loop exit
PB: predicated region body
PF: predicated region fallthrough
CT: control target
= control target key end

     0   :  { %8 = vsyncpa [#allocation3], 0  ;;  %s1554_s0 = inlined_call_operand.hbm [shape: f32[2,80,24], index: 0, kind: input, shape index: {}]   ;;  %s1555_s1 = inlined_call_operand.hbm [shape: f32[3,24,16], index: 1, kind: input, shape index: {}]   ;;  %s1556_s2 = inlined_call_operand.hbm [shape: f32[1,16], index: 2, kind: input, shape index: {}]   ;;  %s1557_s3 = inlined_call_operand.hbm [shape: f32[2,64,16], index: 3, kind: output, shape index: {}]  }
   0x1   :  { %10 = vsyncpa [#allocation3 + $0x1], 0 }
   0x2   :  { %11 = vsyncpa [#allocation6], 0 }
   0x3   :  { %12 = vsyncpa [#allocation4], 0 }
   0x4   :  { %14 = vsyncpa [#allocation4 + $0x1], 0  ;;  %s1238_s12 = smov 0   ;;  %s1240_s13 = smov 0  }
   0x5   :  { %s1242_s14 = smov 0   ;;  %s1244_s15 = smov 0  }
   0x6   :  { %s1246_s16 = smov 0   ;;  %s1248_s17 = smov 0  }
   0x7 LB: > { %s785_s18 = sadd.s32 4294967295, %s1208_s17   ;;  %s786_s19 = sadd.s32 4294967294, %s1208_s17   ;;  %s1208_s17 = sphi %s1248_s17, %s20_s17   ;;  %s1204_s16 = sphi %s1246_s16, %s1579_s16   ;;  %s1200_s15 = sphi %s1244_s15, %s1578_s15   ;;  %s1196_s14 = sphi %s1242_s14, %s1577_s14   ;;  %s1192_s13 = sphi %s1240_s13, %s1576_s13   ;;  %s1188_s12 = sphi %s1238_s12, %s1575_s12  }
   0x8   : > { %p52_p0 = scmp.ne.s32.totalorder %s1192_s13, %s1188_s12  ;;  %p1272_p1 = scmp.eq.s32.totalorder %s785_s18, 0 }
   0x9   : > { %p1276_p2 = scmp.eq.s32.totalorder %s785_s18, 1  ;;  %p126_p3 = scmp.eq.s32.totalorder %s786_s19, 1 }
   0xa   : > { %s1562_s20 = scalar_select %p1272_p1, 1, 0 }
   0xb   : > { %p1282_p4 = por %p1272_p1, %p52_p0  ;;  %p787_p5 = scmp.ge.s32.totalorder %s1208_s17, 1 }
   0xc   : > { %p1287_p6 = por %p126_p3, %p52_p0  ;;  %p133_p7 = scmp.lt.s32.totalorder %s1208_s17, 3 }
   0xd   : > { %s1564_s22 = scalar_select %p1282_p4, 1, 0 }
   0xe   : > { %s1565_s23 = scalar_select %p1287_p6, 1, 0 }
   0xf   : > { %p1292_p8 = pnand %p787_p5, %p133_p7  ;;  %s1210_s25 = smov [#allocation5]  }
  0x10   : > { %s145_s26 = sshll.u32 %s1210_s25, 4  ;;  %s1211_s28 = smov [#allocation7]   ;;  %s1296_s26 = int_to_ptr.vmem [resolvable:$true] %s145_s26 }
  0x11   : > { %p961_p9 = pneg %p1292_p8  ;;  %s159_s29 = sshll.u32 %s1211_s28, 4  ;;  %s1307_s29 = int_to_ptr.vmem [resolvable:$true] %s159_s29 }
  0x12   : > { %s1036_s5 = scalar_lea.hbm %s1555_s1, 1152 }
  0x13   : > { %p1303_p11 = pnand %p961_p9, %p1272_p1  ;;  %p1037_p12 = scmp.ne.s32.totalorder %s1555_s1, %s1036_s5 }
  0x14   : > { %p1043_p5 = scmp.lt.u32.totalorder %s1036_s5, %s1555_s1 }
  0x15   : > { %p1038_p13 = pneg %p1303_p11 }
  0x17   : > { %p1039_p0 = pnand %p1038_p13, %p1037_p12 }
  0x19   : > { %p1040_p3 = pneg %p1039_p0 }
  0x1b   : > { %p1045_p7 = pnand %p1043_p5, %p1040_p3 }
  0x1d   : > { %1048 = shalt.err (!%p1045_p7)
}
  0x1e   : > { %s1049_s10 = scalar_lea.vmem %s1296_s26, 1152  ;;  %p1057_p1 = scmp.lt.s32.totalorder %s1296_s26, %s1296_s26 }
  0x1f   : > { %p1050_p9 = scmp.ne.s32.totalorder %s1296_s26, %s1049_s10  ;;  %p1058_p12 = scmp.lt.s32.totalorder %s1049_s10, %s1049_s10 }
  0x21   : > { %p1052_p10 = pnand %p1050_p9, %p1038_p13  ;;  %p1059_p0 = por %p1058_p12, %p1057_p1 }
  0x23   : > { %p1053_p6 = pneg %p1052_p10 }
  0x25   : > { %p1060_p4 = pnand %p1059_p0, %p1053_p6 }
  0x27   : > { %1063 = shalt.err (!%p1060_p4)
}
  0x28   : > { %s1212_s11 = smov 128   ;;  %s1213_s18 = smov 8  }
  0x29   : > { %964 = dma.hbm_to_vmem [thread:$0]  (!%p1303_p11), %s1555_s1, 1152, %s1296_s26, [#allocation6], %s1212_s11, %s1212_s11, %s1213_s18  }
  0x2a   : > { %s1064_s4 = scalar_lea.hbm %s1556_s2, 16 }
  0x2b   : > { %p1065_p1 = scmp.ne.s32.totalorder %s1556_s2, %s1064_s4  ;;  %p1071_p10 = scmp.lt.u32.totalorder %s1064_s4, %s1556_s2 }
  0x2d   : > { %p1067_p4 = pnand %p1065_p1, %p1038_p13 }
  0x2f   : > { %p1068_p6 = pneg %p1067_p4 }
  0x31   : > { %p1073_p3 = pnand %p1071_p10, %p1068_p6 }
  0x33   : > { %1076 = shalt.err (!%p1073_p3)
}
  0x34   : > { %s1077_s26 = scalar_lea.vmem %s1307_s29, 16  ;;  %s1084_s9 = scalar_lea.vmem %s1307_s29, 32 }
  0x35   : > { %p1078_p5 = scmp.ne.s32.totalorder %s1307_s29, %s1077_s26  ;;  %p1085_p12 = scmp.lt.s32.totalorder %s1307_s29, %s1307_s29 }
  0x36   : > { %p1086_p0 = scmp.lt.s32.totalorder %s1084_s9, %s1077_s26 }
  0x37   : > { %p1080_p7 = pnand %p1078_p5, %p1038_p13 }
  0x38   : > { %p1087_p1 = por %p1086_p0, %p1085_p12 }
  0x39   : > { %p1081_p9 = pneg %p1080_p7 }
  0x3b   : > { %p1088_p4 = pnand %p1087_p1, %p1081_p9 }
  0x3d   : > { %1091 = shalt.err (!%p1088_p4)
}
  0x3e   : > { %967 = dma.hbm_to_vmem [thread:$0]  (!%p1303_p11), %s1556_s2, 16, %s1307_s29, [#allocation6]  }
  0x3f   : > { %s32_s25 = sadd.s32 1, %s1204_s16  ;;  %s39_s28 = sadd.s32 1, %s1196_s14 }
  0x40   : > { %p34_p13 = scmp.ge.s32.totalorder %s32_s25, 2  ;;  %p46_p6 = scmp.ne.s32.totalorder %s1196_s14, %s1192_s13 }
  0x41   : > { %p47_p10 = scmp.eq.s32.totalorder %s1208_s17, 0  ;;  %p978_p3 = scmp.lt.s32.totalorder %s1208_s17, 2 }
  0x42   : > { %s1581_s25 = smov (%p34_p13, %s32_s25), 0  ;;  %p1375_p7 = por %p1276_p2, %p46_p6 }
  0x43   : > { %p48_p5 = por %p47_p10, %p46_p6  ;;  %s36_s30 = ssub.s32 %s1204_s16, %s1581_s25 }
  0x44   : > { %s1568_s27 = scalar_select %p1375_p7, 1, 0 }
  0x45   : > { %s170_s4 = sand.u32 1, %s1196_s14   ;;  %p37_p9 = scmp.eq.s32.totalorder %s36_s30, 0 }
  0x46   : > { %s946_s29 = smul.u32 80, %s170_s4  ;;  %p1382_p11 = pnand %p978_p3, %p48_p5 }
  0x47   : > { %s1387_s6 = scalar_select %p37_p9, %s1196_s14, %s39_s28  }
  0x48   : > { %s947_s7 = smul.u32 1280, %s1204_s16  ;;  %s174_s8 = scalar_lea.vmem [#allocation2], %s946_s29 }
  0x49   : > { %s181_s26 = sshll.u32 %s174_s8, 4  ;;  %s1397_s19 = scalar_lea.sflag [#allocation3], %s170_s4  ;;  %s1395_s26 = int_to_ptr.vmem [resolvable:$true] %s181_s26 }
  0x4a   : > { %s1393_s10 = scalar_lea.hbm %s1554_s0, %s947_s7  ;;  %p1094_p12 = pneg %p1382_p11 }
  0x4b   : > { %s1092_s30 = scalar_lea.hbm %s1393_s10, 1280  ;;  %s1097_s7 = scalar_lea.hbm %s1554_s0, 2560 }
  0x4c   : > { %p1093_p2 = scmp.ne.s32.totalorder %s1393_s10, %s1092_s30  ;;  %p1098_p4 = scmp.lt.u32.totalorder %s1393_s10, %s1554_s0 }
  0x4d   : > { %p1099_p13 = scmp.lt.u32.totalorder %s1097_s7, %s1092_s30  ;;  %p1101_p10 = scmp.lt.u32.totalorder %s1092_s30, %s1393_s10 }
  0x4e   : > { %p1095_p0 = pnand %p1094_p12, %p1093_p2 }
  0x4f   : > { %p1100_p6 = por %p1099_p13, %p1098_p4 }
  0x50   : > { %p1096_p1 = pneg %p1095_p0 }
  0x51   : > { %p1102_p3 = por %p1101_p10, %p1100_p6 }
  0x53   : > { %p1103_p5 = pnand %p1102_p3, %p1096_p1 }
  0x55   : > { %1106 = shalt.err (!%p1103_p5)
}
  0x56   : > { %s1107_s4 = scalar_lea.vmem %s1395_s26, 1280  ;;  %s1214_s9 = smov [#allocation2]  }
  0x57   : > { %p1108_p9 = scmp.ne.s32.totalorder %s1395_s26, %s1107_s4  ;;  %s1112_s28 = sshll.u32 %s1214_s9, 4  ;;  %s1113_s28 = int_to_ptr.vmem [resolvable:$false] %s1112_s28 }
  0x58   : > { %s1114_s29 = scalar_lea.vmem %s1113_s28, 2560  ;;  %p1115_p7 = scmp.lt.s32.totalorder %s1395_s26, %s1113_s28 }
  0x59   : > { %p1110_p2 = pnand %p1108_p9, %p1094_p12  ;;  %p1116_p4 = scmp.lt.s32.totalorder %s1114_s29, %s1107_s4 }
  0x5b   : > { %p1111_p0 = pneg %p1110_p2  ;;  %p1117_p13 = por %p1116_p4, %p1115_p7 }
  0x5d   : > { %p1118_p6 = pnand %p1117_p13, %p1111_p0 }
  0x5f   : > { %1121 = shalt.err (!%p1118_p6)
}
  0x60   : > { %971 = dma.hbm_to_vmem [thread:$0]  (!%p1382_p11), %s1393_s10, 1280, %s1395_s26, %s1397_s19, %s1212_s11, %s1212_s11, %s1213_s18  }
  0x61   : > { %193 = sbr.rel (%p1292_p8) target bundleno = 373 (0x175), region = 32  ;;  %s1431_s30 = sand.u32 (!%p1292_p8), 1, %s1192_s13  }
  0x62   : > { %s948_s7 = smul.u32 (!%p1292_p8), 80, %s1431_s30  ;;  %s196_s8 = scalar_lea.sflag (!%p1292_p8), [#allocation3], %s1431_s30 }
  0x63   : > { %p1570_p7 = scmp.ne.s32.totalorder (!%p1292_p8), %s1564_s22, 0 }
  0x64   : > { %s1435_s21 = scalar_lea.vmem (!%p1292_p8), [#allocation2], %s948_s7 }
  0x68   : > { %1175 = dma.done.wait (%p1570_p7), %s196_s8, 1280  }
  0x69   : > { %1177 = vsyncadd (%p1570_p7), %s196_s8, 4294966016  ;;  %p1571_p11 = scmp.ne.s32.totalorder %s1562_s20, 0 }
  0x6b   : > { %1179 = dma.done.wait (%p1571_p11), [#allocation6], 1168  }
  0x6c   : > { %1181 = vsyncadd (%p1571_p11), [#allocation6], 4294966128  ;;  %v244_v0 = vld [vmem:[#allocation5 + $0x18] sm:$0xff]  ;;  %v245_v1 = vld [vmem:[#allocation5 + $0x20] sm:$0xff]  ;;  %vm247_vm0 = vcmask 195584   ;;  %s795_s20 = sshll.u32 %s1431_s30, 6 }
  0x6d   : > { %v239_v2 = vld [vmem:[#allocation5] sm:$0xff]  ;;  %v914_v3 = vpack.c.bf16 %v245_v1, %v244_v0  ;;  %v240_v4 = vld [vmem:[#allocation5 + $0x8] sm:$0xff]  ;;  %v241_v8 = vld [vmem:[#allocation5 + $0x10] sm:$0xff]  ;;  %vm657_vm1 = vcmask 130048   ;;  %s1480_s22 = scalar_lea.vmem [#allocation8], %s795_s20  ;;  %s826_s24 = sshll.u32 %s1200_s15, 10 }
  0x6e   : > { %v918_v5 = vpack.c.bf16 %v240_v4, %v239_v2  ;;  %v246_v6 = vld [vmem:[#allocation5 + $0x28] sm:$0xff]  ;;  %v231_v9 = vld [vmem:[%s1435_s21] sm:$0xff]  ;;  %v495_v11 = vld [vmem:[#allocation5 + $0x38] sm:$0xff]  ;;  %s682_s11 = sshll.u32 %s1480_s22, 4  ;;  %s1499_s26 = scalar_lea.hbm %s1557_s3, %s826_s24  ;;  %s1501_s11 = int_to_ptr.vmem [resolvable:$true] %s682_s11 }
  0x6f   : > { %v232_v7 = vld [vmem:[%s1435_s21 + $0x8] sm:$0xff]  ;;  %915 = vmatprep.subr.bf16.mxu1 %v914_v3  ;;  %v494_v10 = vld [vmem:[#allocation5 + $0x30] sm:$0xff]  ;;  %884 = vmatprep.mubr.msk.f32.mxu0 %vm247_vm0, %v231_v9  ;;  %v234_v14 = vld [vmem:[%s1435_s21 + $0x18] sm:$0xff]  ;;  %s667_s15 = scalar_lea.sflag [#allocation4], %s1431_s30  ;;  %s1122_s10 = scalar_lea.vmem %s1501_s11, 1024 }
  0x70   : > { %866 = vmatprep.mubr.msk.f32.mxu1 %vm247_vm0, %v232_v7  ;;  %919 = vmatprep.subr.bf16.mxu0 %v918_v5  ;;  %v233_v12 = vld [vmem:[%s1435_s21 + $0x10] sm:$0xff]  ;;  %v922_v13 = vpack.c.bf16 %v495_v11, %v494_v10  ;;  %v235_v15 = vld [vmem:[%s1435_s21 + $0x20] sm:$0xff]  ;;  %v236_v17 = vld [vmem:[%s1435_s21 + $0x28] sm:$0xff]  ;;  %p1123_p8 = scmp.ne.s32.totalorder %s1501_s11, %s1122_s10  ;;  %p1572_p12 = scmp.ne.s32.totalorder %s1568_s27, 0 }
  0x71   : > { %917 = vmatpush3.bf16.msra.mxu1 %v914_v3  ;;  %921 = vmatpush3.bf16.msra.mxu0 %v918_v5  ;;  %v496_v16 = vld [vmem:[#allocation5 + $0x40] sm:$0xff]  ;;  %v238_v19 = vld [vmem:[%s1435_s21 + $0x38] sm:$0xff]  ;;  %v492_v21 = vld [vmem:[%s1435_s21 + $0x48] sm:$0xff]  ;;  %s1215_s19 = smov [#allocation8]  }
  0x72   : > { %864 = vmatprep.subr.mxu1 %v246_v6  ;;  %882 = vmatprep.subr.mxu0 %v241_v8  ;;  %v237_v18 = vld [vmem:[%s1435_s21 + $0x30] sm:$0xff]  ;;  %v242_v20 = vld [vmem:[%s1435_s21 + $0x40] sm:$0xff]  ;;  %v820_v27 = vld [vmem:[#allocation7] ss:$0 sm:$0xff]  ;;  %p1124_p1 = pnand %p1123_p8, %p1572_p12  ;;  %s1126_s4 = sshll.u32 %s1215_s19, 4  ;;  %s1127_s4 = int_to_ptr.vmem [resolvable:$false] %s1126_s4 }
  0x73   : > { %s1128_s9 = scalar_lea.vmem %s1127_s4, 2048  ;;  %p1129_p3 = scmp.lt.s32.totalorder %s1501_s11, %s1127_s4 }
  0x74   : > { %p1125_p10 = pneg %p1124_p1  ;;  %p1130_p5 = scmp.lt.s32.totalorder %s1128_s9, %s1122_s10 }
  0x75   : > { %865 = vmatpush3.msra.mxu1 %v246_v6  ;;  %883 = vmatpush3.msra.mxu0 %v241_v8 }
  0x76   : > { %867 = vmatmul.mubr.msk.f32.vlgmr.msra.gmra.mrb[0].mxu1 %vm247_vm0, %v233_v12  ;;  %926 = vmatprep.subr.bf16.mxu1 %v918_v5  ;;  %p1131_p9 = por %p1130_p5, %p1129_p3 }
  0x77   : > { %885 = vmatmul.mubr.msk.f32.vlgmr.msra.gmra.mrb[0].mxu0 %vm247_vm0, %v232_v7  ;;  %923 = vmatprep.subr.bf16.mxu0 %v922_v13 }
  0x78   : > { %928 = vmatpush3.bf16.msra.mxu1 %v918_v5  ;;  %925 = vmatpush3.bf16.msra.mxu0 %v922_v13  ;;  %p1132_p2 = pnand %p1131_p9, %p1125_p10 }
  0x79   : > { %869 = vmatprep.mubr.msk.f32.mxu1 %vm247_vm0, %v234_v14  ;;  %887 = vmatprep.mubr.msk.f32.mxu0 %vm247_vm0, %v233_v12 }
  0x7a   : > { %870 = vmatmul.mubr.msk.f32.gmra.mrb[2].mxu1 %vm247_vm0, %v235_v15  ;;  %900 = vmatprep.subr.mxu0 %v496_v16 }
  0x7b   : > { %888 = vmatmul.mubr.msk.f32.gmra.mrb[2].mxu0 %vm247_vm0, %v234_v14  ;;  %872 = vmatprep.mubr.msk.f32.mxu1 %vm247_vm0, %v236_v17 }
  0x7c   : > { %902 = vmatprep.mubr.msk.f32.mxu0 %vm247_vm0, %v233_v12  ;;  %901 = vmatpush3.msra.mxu0 %v496_v16 }
  0x7d   : > { %927 = vmatprep.subr.mxu1 %v241_v8 }
  0x7e   : > { %873 = vmatmul.mubr.msk.f32.gmra.mrb[4].mxu1 %vm247_vm0, %v237_v18 }
  0x7f   : > { %903 = vmatmul.mubr.msk.f32.vlgmr.msra.gmra.mrb[0].mxu0 %vm247_vm0, %v234_v14  ;;  %929 = vmatpush3.msra.mxu1 %v241_v8 }
  0x80   : > { %875 = vmatprep.mubr.msk.f32.mxu1 %vm247_vm0, %v238_v19  ;;  %905 = vmatprep.mubr.msk.f32.mxu0 %vm247_vm0, %v235_v15 }
  0x82   : > { %876 = vmatmul.mubr.msk.f32.gmra.mrb[6].mxu1 %vm247_vm0, %v242_v20 }
  0x83   : > { %906 = vmatmul.mubr.msk.f32.gmra.mrb[2].mxu0 %vm247_vm0, %v236_v17  ;;  %890 = vmatprep.mubr.msk.f32.mxu1 %vm247_vm0, %v235_v15 }
  0x84   : > { %908 = vmatprep.mubr.msk.f32.mxu0 %vm247_vm0, %v237_v18 }
  0x86   : > { %891 = vmatmul.mubr.msk.f32.vlgmr.msra.gmra.mrb[4].mxu1 %vm247_vm0, %v236_v17 }
  0x87   : > { %909 = vmatmul.mubr.msk.f32.gmra.mrb[4].mxu0 %vm247_vm0, %v238_v19  ;;  %893 = vmatprep.mubr.msk.f32.mxu1 %vm247_vm0, %v237_v18 }
  0x88   : > { %911 = vmatprep.mubr.msk.f32.mxu0 %vm247_vm0, %v242_v20 }
  0x8a   : > { %894 = vmatmul.mubr.msk.f32.gmra.mrb[6].mxu1 %vm247_vm0, %v238_v19 }
  0x8b   : > { %912 = vmatmul.mubr.msk.f32.gmra.mrb[6].mxu0 %vm247_vm0, %v492_v21 }
 0x149   : > { %v868_v22 = vpop.f32.mrb[0].mxu1 }
 0x14a   : > { %v338_v23 = vpop.f32.mrb[1].mxu1 }
 0x14d   : > { %v871_v24 = vpop.f32.mrb[2].mxu1 }
 0x14e   : > { %v348_v25 = vpop.f32.mrb[3].mxu1 }
 0x152   : > { %v904_v26 = vpop.f32.mrb[0].mxu0 }
 0x153   : > { %v930_v28 = vadd.f32 %v904_v26, %v868_v22  ;;  %v587_v29 = vpop.f32.mrb[1].mxu0 }
 0x154   : > { %v931_v30 = vadd.f32 %v587_v29, %v338_v23 }
 0x155   : > { %v642_v31 = vadd.f32 %v930_v28, %v820_v27 }
 0x156   : > { %v641_v32 = vadd.f32 %v931_v30, %v820_v27  ;;  %v907_v33 = vpop.f32.mrb[2].mxu0 }
 0x157   : > { %v650_v34 = vmax.f32 %v642_v31, 0.0  ;;  %v932_v35 = vadd.f32 %v907_v33, %v871_v24  ;;  %v597_v36 = vpop.f32.mrb[3].mxu0 }
 0x158   : > { %v649_v37 = vmax.f32 %v641_v32, 0.0  ;;  %v933_v38 = vadd.f32 %v597_v36, %v348_v25 }
 0x159   : > { %659 = vst.msk [vmem:[%s1480_s22 + $0x8] sm:$0xff] %vm657_vm1, %v650_v34  ;;  %v644_v39 = vadd.f32 %v932_v35, %v820_v27  ;;  %v892_v40 = vpop.f32.mrb[4].mxu1 }
 0x15a   : > { %658 = vst.msk [vmem:[%s1480_s22] sm:$0xff] %vm657_vm1, %v649_v37  ;;  %v643_v41 = vadd.f32 %v933_v38, %v820_v27  ;;  %v910_v42 = vpop.f32.mrb[4].mxu0  ;;  %v466_v43 = vpop.f32.mrb[5].mxu1 }
 0x15b   : > { %v652_v44 = vmax.f32 %v644_v39, 0.0  ;;  %v934_v45 = vadd.f32 %v910_v42, %v892_v40  ;;  %v607_v46 = vpop.f32.mrb[5].mxu0 }
 0x15c   : > { %v651_v47 = vmax.f32 %v643_v41, 0.0  ;;  %v935_v48 = vadd.f32 %v607_v46, %v466_v43 }
 0x15d   : > { %661 = vst.msk [vmem:[%s1480_s22 + $0x18] sm:$0xff] %vm657_vm1, %v652_v44  ;;  %v646_v49 = vadd.f32 %v934_v45, %v820_v27  ;;  %v895_v50 = vpop.f32.mrb[6].mxu1 }
 0x15e   : > { %660 = vst.msk [vmem:[%s1480_s22 + $0x10] sm:$0xff] %vm657_vm1, %v651_v47  ;;  %v645_v51 = vadd.f32 %v935_v48, %v820_v27  ;;  %v913_v52 = vpop.f32.mrb[6].mxu0  ;;  %v476_v53 = vpop.f32.mrb[7].mxu1 }
 0x15f   : > { %v654_v54 = vmax.f32 %v646_v49, 0.0  ;;  %v936_v55 = vadd.f32 %v913_v52, %v895_v50  ;;  %v617_v56 = vpop.f32.mrb[7].mxu0 }
 0x160   : > { %v653_v57 = vmax.f32 %v645_v51, 0.0  ;;  %v937_v58 = vadd.f32 %v617_v56, %v476_v53 }
 0x161   : > { %663 = vst.msk [vmem:[%s1480_s22 + $0x28] sm:$0xff] %vm657_vm1, %v654_v54  ;;  %v648_v59 = vadd.f32 %v936_v55, %v820_v27 }
 0x162   : > { %662 = vst.msk [vmem:[%s1480_s22 + $0x20] sm:$0xff] %vm657_vm1, %v653_v57  ;;  %v647_v60 = vadd.f32 %v937_v58, %v820_v27 }
 0x163   : > { %v656_v61 = vmax.f32 %v648_v59, 0.0 }
 0x164   : > { %v655_v62 = vmax.f32 %v647_v60, 0.0 }
 0x165   : > { %665 = vst.msk [vmem:[%s1480_s22 + $0x38] sm:$0xff] %vm657_vm1, %v656_v61 }
 0x166   : > { %664 = vst.msk [vmem:[%s1480_s22 + $0x30] sm:$0xff] %vm657_vm1, %v655_v62 }
 0x167   : > { %1135 = shalt.err (!%p1132_p2)
}
 0x168   : > { %s1136_s28 = scalar_lea.hbm %s1499_s26, 1024  ;;  %s1140_s8 = scalar_lea.hbm %s1557_s3, 2048 }
 0x169   : > { %p1137_p0 = scmp.ne.s32.totalorder %s1499_s26, %s1136_s28  ;;  %p1141_p6 = scmp.lt.u32.totalorder %s1499_s26, %s1557_s3 }
 0x16a   : > { %p1142_p7 = scmp.lt.u32.totalorder %s1140_s8, %s1136_s28  ;;  %p1144_p8 = scmp.lt.u32.totalorder %s1136_s28, %s1499_s26 }
 0x16b   : > { %p1138_p4 = pnand %p1137_p0, %p1572_p12 }
 0x16c   : > { %p1143_p11 = por %p1142_p7, %p1141_p6 }
 0x16d   : > { %p1139_p13 = pneg %p1138_p4 }
 0x16e   : > { %p1145_p1 = por %p1144_p8, %p1143_p11 }
 0x170   : > { %p1146_p10 = pnand %p1145_p1, %p1139_p13 }
 0x172   : > { %1149 = shalt.err (!%p1146_p10)
}
 0x173   : > { %s1216_s22 = smov 128   ;;  %s1217_s24 = smov 8  }
 0x174   : > { %959 = dma.vmem_to_hbm [thread:$0]  (%p1572_p12), %s1501_s11, 1024, %s1499_s26, %s667_s15, %s1216_s22, %s1216_s22, %s1217_s24  }
 0x175 PF: > { %s697_s18 = sand.u32 1, %s1188_s12   ;;  %p1573_p3 = scmp.ne.s32.totalorder %s1565_s23, 0 }
 0x176   : > { %p1574_p5 = scmp.ge.s32.totalorder %s1208_s17, 2  ;;  %s698_s5 = scalar_lea.sflag [#allocation4], %s697_s18 }
 0x178   : > { %p973_p9 = pnand %p1574_p5, %p1573_p3 }
 0x17a   : > { %1183 = dma.done.wait (!%p973_p9), %s698_s5, 1024  }
 0x17b   : > { %1185 = vsyncadd (!%p973_p9), %s698_s5, 4294966272  ;;  %s20_s17 = sadd.s32 1, %s1208_s17   ;;  %s1575_s12 = smov %s1192_s13 }
 0x17c   : > { %p17_p2 = scmp.ge.s32.totalorder %s20_s17, 4   ;;  %s1576_s13 = smov %s1196_s14 }
 0x17d   : > { %s1577_s14 = smov %s1387_s6  ;;  %s1578_s15 = smov %s1204_s16 }
 0x17e   : > { %s1579_s16 = smov %s1581_s25  ;;  %19 = sbr.rel (!%p17_p2) target bundleno = 7 (0x7), region = 87 }
 0x185   :  { %703 = vsyncpa [#allocation3], 1 }
 0x186   :  { %705 = vsyncpa [#allocation3 + $0x1], 1 }
 0x187   :  { %706 = vsyncpa [#allocation6], 1 }
 0x188   :  { %707 = vsyncpa [#allocation4], 1 }
 0x189   :  { %709 = vsyncpa [#allocation4 + $0x1], 1 }

// kernel: _lambda_.15
= control target key start
LH: loop header
LB: loop body
LE: loop exit
PB: predicated region body
PF: predicated region fallthrough
CT: control target
= control target key end

     0   :  { %8 = vsyncpa [#allocation3], 0  ;;  %s1335_s0 = inlined_call_operand.hbm [shape: f32[2,24,48], index: 0, kind: input, shape index: {}]   ;;  %s1336_s1 = inlined_call_operand.hbm [shape: f32[3,48,32], index: 1, kind: input, shape index: {}]   ;;  %s1337_s2 = inlined_call_operand.hbm [shape: f32[1,32], index: 2, kind: input, shape index: {}]   ;;  %s1338_s3 = inlined_call_operand.hbm [shape: f32[2,16,32], index: 3, kind: output, shape index: {}]  }
   0x1   :  { %10 = vsyncpa [#allocation3 + $0x1], 0 }
   0x2   :  { %11 = vsyncpa [#allocation6], 0 }
   0x3   :  { %12 = vsyncpa [#allocation4], 0 }
   0x4   :  { %14 = vsyncpa [#allocation4 + $0x1], 0  ;;  %s1061_s12 = smov 0   ;;  %s1063_s13 = smov 0  }
   0x5   :  { %s1065_s14 = smov 0   ;;  %s1067_s15 = smov 0  }
   0x6   :  { %s1069_s16 = smov 0   ;;  %s1071_s17 = smov 0  }
   0x7 LB: > { %s636_s18 = sadd.s32 4294967295, %s1031_s17   ;;  %s637_s19 = sadd.s32 4294967294, %s1031_s17   ;;  %s1031_s17 = sphi %s1071_s17, %s20_s17   ;;  %s1027_s16 = sphi %s1069_s16, %s1360_s16   ;;  %s1023_s15 = sphi %s1067_s15, %s1359_s15   ;;  %s1019_s14 = sphi %s1065_s14, %s1358_s14   ;;  %s1015_s13 = sphi %s1063_s13, %s1357_s13   ;;  %s1011_s12 = sphi %s1061_s12, %s1356_s12  }
   0x8   : > { %p52_p0 = scmp.ne.s32.totalorder %s1015_s13, %s1011_s12  ;;  %p1095_p1 = scmp.eq.s32.totalorder %s636_s18, 0 }
   0x9   : > { %p1099_p2 = scmp.eq.s32.totalorder %s636_s18, 1  ;;  %p126_p3 = scmp.eq.s32.totalorder %s637_s19, 1 }
   0xa   : > { %s1343_s20 = scalar_select %p1095_p1, 1, 0 }
   0xb   : > { %p1105_p4 = por %p1095_p1, %p52_p0  ;;  %p638_p5 = scmp.ge.s32.totalorder %s1031_s17, 1 }
   0xc   : > { %p1110_p6 = por %p126_p3, %p52_p0  ;;  %p133_p7 = scmp.lt.s32.totalorder %s1031_s17, 3 }
   0xd   : > { %s1345_s22 = scalar_select %p1105_p4, 1, 0 }
   0xe   : > { %s1346_s23 = scalar_select %p1110_p6, 1, 0 }
   0xf   : > { %p1115_p8 = pnand %p638_p5, %p133_p7  ;;  %s1033_s25 = smov [#allocation5]  }
  0x10   : > { %s145_s26 = sshll.u32 %s1033_s25, 4  ;;  %s1034_s28 = smov [#allocation7]   ;;  %s1119_s26 = int_to_ptr.vmem [resolvable:$true] %s145_s26 }
  0x11   : > { %p784_p9 = pneg %p1115_p8  ;;  %s159_s29 = sshll.u32 %s1034_s28, 4  ;;  %s1130_s29 = int_to_ptr.vmem [resolvable:$true] %s159_s29 }
  0x12   : > { %s859_s5 = scalar_lea.hbm %s1336_s1, 2304 }
  0x13   : > { %p1126_p11 = pnand %p784_p9, %p1095_p1  ;;  %p860_p12 = scmp.ne.s32.totalorder %s1336_s1, %s859_s5 }
  0x14   : > { %p866_p5 = scmp.lt.u32.totalorder %s859_s5, %s1336_s1 }
  0x15   : > { %p861_p13 = pneg %p1126_p11 }
  0x17   : > { %p862_p0 = pnand %p861_p13, %p860_p12 }
  0x19   : > { %p863_p3 = pneg %p862_p0 }
  0x1b   : > { %p868_p7 = pnand %p866_p5, %p863_p3 }
  0x1d   : > { %871 = shalt.err (!%p868_p7)
}
  0x1e   : > { %s872_s10 = scalar_lea.vmem %s1119_s26, 2304  ;;  %p880_p1 = scmp.lt.s32.totalorder %s1119_s26, %s1119_s26 }
  0x1f   : > { %p873_p9 = scmp.ne.s32.totalorder %s1119_s26, %s872_s10  ;;  %p881_p12 = scmp.lt.s32.totalorder %s872_s10, %s872_s10 }
  0x21   : > { %p875_p10 = pnand %p873_p9, %p861_p13  ;;  %p882_p0 = por %p881_p12, %p880_p1 }
  0x23   : > { %p876_p6 = pneg %p875_p10 }
  0x25   : > { %p883_p4 = pnand %p882_p0, %p876_p6 }
  0x27   : > { %886 = shalt.err (!%p883_p4)
}
  0x28   : > { %s1035_s11 = smov 128   ;;  %s1036_s18 = smov 8  }
  0x29   : > { %787 = dma.hbm_to_vmem [thread:$0]  (!%p1126_p11), %s1336_s1, 2304, %s1119_s26, [#allocation6], %s1035_s11, %s1035_s11, %s1036_s18  }
  0x2a   : > { %s887_s4 = scalar_lea.hbm %s1337_s2, 16 }
  0x2b   : > { %p888_p1 = scmp.ne.s32.totalorder %s1337_s2, %s887_s4  ;;  %p894_p10 = scmp.lt.u32.totalorder %s887_s4, %s1337_s2 }
  0x2d   : > { %p890_p4 = pnand %p888_p1, %p861_p13 }
  0x2f   : > { %p891_p6 = pneg %p890_p4 }
  0x31   : > { %p896_p3 = pnand %p894_p10, %p891_p6 }
  0x33   : > { %899 = shalt.err (!%p896_p3)
}
  0x34   : > { %s900_s26 = scalar_lea.vmem %s1130_s29, 16  ;;  %s907_s9 = scalar_lea.vmem %s1130_s29, 32 }
  0x35   : > { %p901_p5 = scmp.ne.s32.totalorder %s1130_s29, %s900_s26  ;;  %p908_p12 = scmp.lt.s32.totalorder %s1130_s29, %s1130_s29 }
  0x36   : > { %p909_p0 = scmp.lt.s32.totalorder %s907_s9, %s900_s26 }
  0x37   : > { %p903_p7 = pnand %p901_p5, %p861_p13 }
  0x38   : > { %p910_p1 = por %p909_p0, %p908_p12 }
  0x39   : > { %p904_p9 = pneg %p903_p7 }
  0x3b   : > { %p911_p4 = pnand %p910_p1, %p904_p9 }
  0x3d   : > { %914 = shalt.err (!%p911_p4)
}
  0x3e   : > { %790 = dma.hbm_to_vmem [thread:$0]  (!%p1126_p11), %s1337_s2, 16, %s1130_s29, [#allocation6]  }
  0x3f   : > { %s32_s25 = sadd.s32 1, %s1027_s16  ;;  %s39_s28 = sadd.s32 1, %s1019_s14 }
  0x40   : > { %p34_p13 = scmp.ge.s32.totalorder %s32_s25, 2  ;;  %p46_p6 = scmp.ne.s32.totalorder %s1019_s14, %s1015_s13 }
  0x41   : > { %p47_p10 = scmp.eq.s32.totalorder %s1031_s17, 0  ;;  %p801_p3 = scmp.lt.s32.totalorder %s1031_s17, 2 }
  0x42   : > { %s1362_s25 = smov (%p34_p13, %s32_s25), 0  ;;  %p1198_p7 = por %p1099_p2, %p46_p6 }
  0x43   : > { %p48_p5 = por %p47_p10, %p46_p6  ;;  %s36_s30 = ssub.s32 %s1027_s16, %s1362_s25 }
  0x44   : > { %s1349_s27 = scalar_select %p1198_p7, 1, 0 }
  0x45   : > { %s170_s4 = sand.u32 1, %s1019_s14   ;;  %p37_p9 = scmp.eq.s32.totalorder %s36_s30, 0 }
  0x46   : > { %s769_s29 = smul.u32 24, %s170_s4  ;;  %p1205_p11 = pnand %p801_p3, %p48_p5 }
  0x47   : > { %s1210_s6 = scalar_select %p37_p9, %s1019_s14, %s39_s28  }
  0x48   : > { %s770_s7 = smul.u32 384, %s1027_s16  ;;  %s174_s8 = scalar_lea.vmem [#allocation2], %s769_s29 }
  0x49   : > { %s181_s26 = sshll.u32 %s174_s8, 4  ;;  %s1220_s19 = scalar_lea.sflag [#allocation3], %s170_s4  ;;  %s1218_s26 = int_to_ptr.vmem [resolvable:$true] %s181_s26 }
  0x4a   : > { %s1216_s10 = scalar_lea.hbm %s1335_s0, %s770_s7  ;;  %p917_p12 = pneg %p1205_p11 }
  0x4b   : > { %s915_s30 = scalar_lea.hbm %s1216_s10, 384  ;;  %s920_s7 = scalar_lea.hbm %s1335_s0, 768 }
  0x4c   : > { %p916_p2 = scmp.ne.s32.totalorder %s1216_s10, %s915_s30  ;;  %p921_p4 = scmp.lt.u32.totalorder %s1216_s10, %s1335_s0 }
  0x4d   : > { %p922_p13 = scmp.lt.u32.totalorder %s920_s7, %s915_s30  ;;  %p924_p10 = scmp.lt.u32.totalorder %s915_s30, %s1216_s10 }
  0x4e   : > { %p918_p0 = pnand %p917_p12, %p916_p2 }
  0x4f   : > { %p923_p6 = por %p922_p13, %p921_p4 }
  0x50   : > { %p919_p1 = pneg %p918_p0 }
  0x51   : > { %p925_p3 = por %p924_p10, %p923_p6 }
  0x53   : > { %p926_p5 = pnand %p925_p3, %p919_p1 }
  0x55   : > { %929 = shalt.err (!%p926_p5)
}
  0x56   : > { %s930_s4 = scalar_lea.vmem %s1218_s26, 384  ;;  %s1037_s9 = smov [#allocation2]  }
  0x57   : > { %p931_p9 = scmp.ne.s32.totalorder %s1218_s26, %s930_s4  ;;  %s935_s28 = sshll.u32 %s1037_s9, 4  ;;  %s936_s28 = int_to_ptr.vmem [resolvable:$false] %s935_s28 }
  0x58   : > { %s937_s29 = scalar_lea.vmem %s936_s28, 768  ;;  %p938_p7 = scmp.lt.s32.totalorder %s1218_s26, %s936_s28 }
  0x59   : > { %p933_p2 = pnand %p931_p9, %p917_p12  ;;  %p939_p4 = scmp.lt.s32.totalorder %s937_s29, %s930_s4 }
  0x5b   : > { %p934_p0 = pneg %p933_p2  ;;  %p940_p13 = por %p939_p4, %p938_p7 }
  0x5d   : > { %p941_p6 = pnand %p940_p13, %p934_p0 }
  0x5f   : > { %944 = shalt.err (!%p941_p6)
}
  0x60   : > { %794 = dma.hbm_to_vmem [thread:$0]  (!%p1205_p11), %s1216_s10, 384, %s1218_s26, %s1220_s19, %s1035_s11, %s1035_s11, %s1036_s18  }
  0x61   : > { %193 = sbr.rel (%p1115_p8) target bundleno = 369 (0x171), region = 32  ;;  %s1254_s30 = sand.u32 (!%p1115_p8), 1, %s1015_s13  }
  0x62   : > { %s771_s7 = smul.u32 (!%p1115_p8), 24, %s1254_s30  ;;  %s196_s8 = scalar_lea.sflag (!%p1115_p8), [#allocation3], %s1254_s30 }
  0x63   : > { %p1351_p7 = scmp.ne.s32.totalorder (!%p1115_p8), %s1345_s22, 0 }
  0x64   : > { %s1258_s21 = scalar_lea.vmem (!%p1115_p8), [#allocation2], %s771_s7 }
  0x68   : > { %998 = dma.done.wait (%p1351_p7), %s196_s8, 384  }
  0x69   : > { %1000 = vsyncadd (%p1351_p7), %s196_s8, 4294966912  ;;  %p1352_p11 = scmp.ne.s32.totalorder %s1343_s20, 0 }
  0x6b   : > { %1002 = dma.done.wait (%p1352_p11), [#allocation6], 2320  }
  0x6c   : > { %1004 = vsyncadd (%p1352_p11), [#allocation6], 4294964976  ;;  %v233_v0 = vld [vmem:[#allocation5] sm:$0xff]  ;;  %v234_v1 = vld [vmem:[#allocation5 + $0x8] sm:$0xff]  ;;  %vm248_vm0 = vcmask 392192   ;;  %s646_s20 = sshll.u32 %s1254_s30, 4 }
  0x6d   : > { %v235_v2 = vld [vmem:[#allocation5 + $0x10] sm:$0xff]  ;;  %v741_v3 = vpack.c.bf16 %v234_v1, %v233_v0  ;;  %v236_v4 = vld [vmem:[#allocation5 + $0x18] sm:$0xff]  ;;  %v237_v5 = vld [vmem:[#allocation5 + $0x20] sm:$0xff]  ;;  %s659_s22 = sshll.u32 %s1023_s15, 8  ;;  %s229_s24 = scalar_lea.vmem [#allocation8], %s646_s20  ;;  %vm514_vm1 = vcmask 261120  }
  0x6e   : > { %v238_v6 = vld [vmem:[#allocation5 + $0x28] sm:$0xff]  ;;  %v745_v7 = vpack.c.bf16 %v236_v4, %v235_v2  ;;  %v242_v8 = vld [vmem:[#allocation5 + $0x30] sm:$0xff]  ;;  %v243_v9 = vld [vmem:[#allocation5 + $0x38] sm:$0xff]  ;;  %s533_s11 = sshll.u32 %s229_s24, 4  ;;  %s1284_s26 = scalar_lea.hbm %s1338_s3, %s659_s22  ;;  %s1286_s11 = int_to_ptr.vmem [resolvable:$true] %s533_s11 }
  0x6f   : > { %v231_v10 = vld [vmem:[%s1258_s21] sm:$0xff]  ;;  %742 = vmatprep.subr.bf16.mxu0 %v741_v3  ;;  %v729_v11 = vpack.c.bf16 %v243_v9, %v242_v8  ;;  %v244_v12 = vld [vmem:[#allocation5 + $0x40] sm:$0xff]  ;;  %v749_v14 = vpack.c.bf16 %v238_v6, %v237_v5  ;;  %v247_v17 = vld [vmem:[#allocation5 + $0x58] sm:$0xff]  ;;  %s518_s15 = scalar_lea.sflag [#allocation4], %s1254_s30  ;;  %s945_s10 = scalar_lea.vmem %s1286_s11, 256 }
  0x70   : > { %711 = vmatprep.mubr.msk.f32.mxu0 %vm248_vm0, %v231_v10  ;;  %744 = vmatpush3.bf16.msra.mxu0 %v741_v3  ;;  %v245_v13 = vld [vmem:[#allocation5 + $0x48] sm:$0xff]  ;;  %v246_v16 = vld [vmem:[#allocation5 + $0x50] sm:$0xff]  ;;  %v414_v18 = vld [vmem:[#allocation5 + $0x60] sm:$0xff]  ;;  %p946_p8 = scmp.ne.s32.totalorder %s1286_s11, %s945_s10  ;;  %p1353_p12 = scmp.ne.s32.totalorder %s1349_s27, 0 }
  0x71   : > { %746 = vmatprep.subr.bf16.mxu0 %v745_v7  ;;  %730 = vmatprep.subr.bf16.mxu1 %v729_v11  ;;  %v733_v15 = vpack.c.bf16 %v245_v13, %v244_v12  ;;  %v415_v19 = vld [vmem:[#allocation5 + $0x68] sm:$0xff]  ;;  %v737_v21 = vpack.c.bf16 %v247_v17, %v246_v16  ;;  %v416_v23 = vld [vmem:[#allocation5 + $0x70] sm:$0xff]  ;;  %v417_v24 = vld [vmem:[#allocation5 + $0x78] sm:$0xff]  ;;  %s1038_s19 = smov [#allocation8]  }
  0x72   : > { %732 = vmatpush3.bf16.msra.mxu1 %v729_v11  ;;  %v239_v20 = vld [vmem:[%s1258_s21 + $0x4] sm:$0xff]  ;;  %v753_v22 = vpack.c.bf16 %v415_v19, %v414_v18  ;;  %v757_v26 = vpack.c.bf16 %v417_v24, %v416_v23  ;;  %v418_v27 = vld [vmem:[#allocation5 + $0x80] sm:$0xff]  ;;  %p947_p1 = pnand %p946_p8, %p1353_p12  ;;  %s949_s4 = sshll.u32 %s1038_s19, 4  ;;  %s950_s4 = int_to_ptr.vmem [resolvable:$false] %s949_s4 }
  0x73   : > { %734 = vmatprep.subr.bf16.mxu1 %v733_v15  ;;  %696 = vmatprep.mubr.msk.f32.mxu1 %vm248_vm0, %v239_v20  ;;  %v232_v25 = vld [vmem:[%s1258_s21 + $0x8] sm:$0xff]  ;;  %v419_v28 = vld [vmem:[#allocation5 + $0x88] sm:$0xff]  ;;  %v412_v31 = vld [vmem:[%s1258_s21 + $0x10] sm:$0xff]  ;;  %s951_s9 = scalar_lea.vmem %s950_s4, 512  ;;  %p952_p3 = scmp.lt.s32.totalorder %s1286_s11, %s950_s4 }
  0x74   : > { %748 = vmatpush3.bf16.msra.mxu0 %v745_v7  ;;  %v240_v29 = vld [vmem:[%s1258_s21 + $0xc] sm:$0xff]  ;;  %v761_v30 = vpack.c.bf16 %v419_v28, %v418_v27  ;;  %v653_v35 = vld [vmem:[#allocation7] ss:$0 sm:$0xff]  ;;  %p948_p10 = pneg %p947_p1  ;;  %p953_p5 = scmp.lt.s32.totalorder %s951_s9, %s945_s10 }
  0x75   : > { %750 = vmatprep.subr.bf16.mxu0 %v749_v14 }
  0x76   : > { %736 = vmatpush3.bf16.msra.mxu1 %v733_v15  ;;  %p954_p9 = por %p953_p5, %p952_p3 }
  0x77   : > { %738 = vmatprep.subr.bf16.mxu1 %v737_v21 }
  0x78   : > { %752 = vmatpush3.bf16.msra.mxu0 %v749_v14  ;;  %p955_p2 = pnand %p954_p9, %p948_p10 }
  0x79   : > { %754 = vmatprep.subr.bf16.mxu0 %v753_v22 }
  0x7a   : > { %740 = vmatpush3.bf16.msra.mxu1 %v737_v21 }
  0x7b   : > { %712 = vmatmul.mubr.msk.f32.vlgmr.msra.gmra.mrb[0].mxu0 %vm248_vm0, %v232_v25 }
  0x7c   : > { %756 = vmatpush3.bf16.msra.mxu0 %v753_v22  ;;  %726 = vmatprep.mubr.msk.f32.mxu0 %vm248_vm0, %v232_v25 }
  0x7d   : > { %758 = vmatprep.subr.bf16.mxu0 %v757_v26  ;;  %697 = vmatmul.mubr.msk.f32.vlgmr.msra.gmra.mrb[0].mxu1 %vm248_vm0, %v240_v29 }
  0x80   : > { %760 = vmatpush3.bf16.msra.mxu0 %v757_v26 }
  0x81   : > { %762 = vmatprep.subr.bf16.mxu0 %v761_v30 }
  0x84   : > { %764 = vmatpush3.bf16.msra.mxu0 %v761_v30 }
  0x87   : > { %727 = vmatmul.mubr.msk.f32.vlgmr.msra.gmra.mrb[0].mxu0 %vm248_vm0, %v412_v31 }
 0x150   : > { %v698_v32 = vpop.f32.mrb[0].mxu1 }
 0x151   : > { %v321_v33 = vpop.f32.mrb[1].mxu1 }
 0x15a   : > { %v728_v34 = vpop.f32.mrb[0].mxu0 }
 0x15b   : > { %v765_v36 = vadd.f32 %v728_v34, %v698_v32  ;;  %v492_v37 = vpop.f32.mrb[1].mxu0 }
 0x15c   : > { %v766_v38 = vadd.f32 %v492_v37, %v321_v33 }
 0x15d   : > { %v511_v39 = vadd.f32 %v765_v36, %v653_v35 }
 0x15e   : > { %v510_v40 = vadd.f32 %v766_v38, %v653_v35 }
 0x15f   : > { %v513_v41 = vmax.f32 %v511_v39, 0.0 }
 0x160   : > { %v512_v42 = vmax.f32 %v510_v40, 0.0 }
 0x161   : > { %516 = vst.msk [vmem:[%s229_s24 + $0x8] sm:$0xff] %vm514_vm1, %v513_v41 }
 0x162   : > { %515 = vst.msk [vmem:[%s229_s24] sm:$0xff] %vm514_vm1, %v512_v42 }
 0x163   : > { %958 = shalt.err (!%p955_p2)
}
 0x164   : > { %s959_s28 = scalar_lea.hbm %s1284_s26, 256  ;;  %s963_s8 = scalar_lea.hbm %s1338_s3, 512 }
 0x165   : > { %p960_p0 = scmp.ne.s32.totalorder %s1284_s26, %s959_s28  ;;  %p964_p6 = scmp.lt.u32.totalorder %s1284_s26, %s1338_s3 }
 0x166   : > { %p965_p7 = scmp.lt.u32.totalorder %s963_s8, %s959_s28  ;;  %p967_p8 = scmp.lt.u32.totalorder %s959_s28, %s1284_s26 }
 0x167   : > { %p961_p4 = pnand %p960_p0, %p1353_p12 }
 0x168   : > { %p966_p11 = por %p965_p7, %p964_p6 }
 0x169   : > { %p962_p13 = pneg %p961_p4 }
 0x16a   : > { %p968_p1 = por %p967_p8, %p966_p11 }
 0x16c   : > { %p969_p10 = pnand %p968_p1, %p962_p13 }
 0x16e   : > { %972 = shalt.err (!%p969_p10)
}
 0x16f   : > { %s1039_s22 = smov 128   ;;  %s1040_s24 = smov 8  }
 0x170   : > { %782 = dma.vmem_to_hbm [thread:$0]  (%p1353_p12), %s1286_s11, 256, %s1284_s26, %s518_s15, %s1039_s22, %s1039_s22, %s1040_s24  }
 0x171 PF: > { %s548_s18 = sand.u32 1, %s1011_s12   ;;  %p1354_p3 = scmp.ne.s32.totalorder %s1346_s23, 0 }
 0x172   : > { %p1355_p5 = scmp.ge.s32.totalorder %s1031_s17, 2  ;;  %s549_s5 = scalar_lea.sflag [#allocation4], %s548_s18 }
 0x174   : > { %p796_p9 = pnand %p1355_p5, %p1354_p3 }
 0x176   : > { %1006 = dma.done.wait (!%p796_p9), %s549_s5, 256  }
 0x177   : > { %1008 = vsyncadd (!%p796_p9), %s549_s5, 4294967040  ;;  %s20_s17 = sadd.s32 1, %s1031_s17   ;;  %s1356_s12 = smov %s1015_s13 }
 0x178   : > { %p17_p2 = scmp.ge.s32.totalorder %s20_s17, 4   ;;  %s1357_s13 = smov %s1019_s14 }
 0x179   : > { %s1358_s14 = smov %s1210_s6  ;;  %s1359_s15 = smov %s1027_s16 }
 0x17a   : > { %s1360_s16 = smov %s1362_s25  ;;  %19 = sbr.rel (!%p17_p2) target bundleno = 7 (0x7), region = 87 }
 0x181   :  { %554 = vsyncpa [#allocation3], 1 }
 0x182   :  { %556 = vsyncpa [#allocation3 + $0x1], 1 }
 0x183   :  { %557 = vsyncpa [#allocation6], 1 }
 0x184   :  { %558 = vsyncpa [#allocation4], 1 }
 0x185   :  { %560 = vsyncpa [#allocation4 + $0x1], 1 }

// kernel: _lambda_.16
= control target key start
LH: loop header
LB: loop body
LE: loop exit
PB: predicated region body
PF: predicated region fallthrough
CT: control target
= control target key end

     0   :  { %6 = vsyncpa [#allocation3], 0  ;;  %s596_s0 = inlined_call_operand.hbm [shape: f32[2,4,2,64], index: 0, kind: input, shape index: {}]   ;;  %s597_s1 = inlined_call_operand.hbm [shape: f32[2,2,2,32], index: 1, kind: output, shape index: {}]  }
   0x1   :  { %8 = vsyncpa [#allocation3 + $0x1], 0 }
   0x2   :  { %9 = vsyncpa [#allocation4], 0 }
   0x3   :  { %11 = vsyncpa [#allocation4 + $0x1], 0  ;;  %s433_s6 = smov 0   ;;  %s435_s7 = smov 0  }
   0x4   :  { %s437_s8 = smov 0   ;;  %s439_s9 = smov 0  }
   0x5 LB: > { %s454_s10 = sadd.s32 4294967295, %s414_s9   ;;  %s251_s11 = sadd.s32 4294967294, %s414_s9   ;;  %s414_s9 = sphi %s439_s9, %s610_s9   ;;  %s410_s8 = sphi %s437_s8, %s609_s8   ;;  %s406_s7 = sphi %s435_s7, %s608_s7   ;;  %s402_s6 = sphi %s433_s6, %s607_s6  }
   0x6   : > { %s458_s12 = sadd.s32 1, %s414_s9   ;;  %s24_s13 = sadd.s32 1, %s410_s8 }
   0x7   : > { %s21_s14 = ssub.s32 %s414_s9, %s458_s12  ;;  %p31_p0 = scmp.ne.s32.totalorder %s410_s8, %s406_s7 }
   0x8   : > { %p22_p1 = scmp.eq.s32.totalorder %s21_s14, 0  ;;  %p32_p2 = scmp.eq.s32.totalorder %s414_s9, 0 }
   0x9   : > { %p37_p3 = scmp.ne.s32.totalorder %s406_s7, %s402_s6  ;;  %p38_p4 = scmp.eq.s32.totalorder %s454_s10, 0 }
   0xa   : > { %s470_s15 = scalar_select %p22_p1, %s410_s8, %s24_s13  }
   0xb   : > { %p472_p5 = por %p32_p2, %p31_p0  ;;  %p476_p6 = por %p38_p4, %p37_p3 }
   0xc   : > { %p61_p7 = scmp.eq.s32.totalorder %s454_s10, 1  ;;  %p67_p8 = scmp.eq.s32.totalorder %s251_s11, 1 }
   0xd   : > { %p279_p10 = scmp.lt.s32.totalorder %s414_s9, 2  ;;  %s87_s20 = sand.u32 1, %s410_s8  }
   0xe   : > { %p483_p11 = por %p61_p7, %p31_p0  ;;  %p487_p12 = por %p67_p8, %p37_p3 }
   0xf   : > { %s265_s21 = sshll.u32 %s414_s9, 7  ;;  %s254_s22 = sshll.u32 %s87_s20, 3 }
  0x10   : > { %s601_s18 = scalar_select %p483_p11, 1, 0 }
  0x11   : > { %s602_s19 = scalar_select %p487_p12, 1, 0 }
  0x12   : > { %s496_s25 = scalar_lea.hbm %s596_s0, %s265_s21  ;;  %s91_s26 = scalar_lea.vmem [#allocation2], %s254_s22 }
  0x13   : > { %s98_s27 = sshll.u32 %s91_s26, 4  ;;  %p500_p13 = pnand %p279_p10, %p472_p5  ;;  %s504_s27 = int_to_ptr.vmem [resolvable:$true] %s98_s27 }
  0x14   : > { %s506_s29 = scalar_lea.sflag [#allocation3], %s87_s20  ;;  %s318_s30 = scalar_lea.hbm %s496_s25, 128 }
  0x15   : > { %p319_p0 = scmp.ne.s32.totalorder %s496_s25, %s318_s30  ;;  %p320_p1 = pneg %p500_p13 }
  0x16   : > { %s323_s4 = scalar_lea.hbm %s596_s0, 256  ;;  %p324_p4 = scmp.lt.u32.totalorder %s496_s25, %s596_s0 }
  0x17   : > { %p321_p2 = pnand %p320_p1, %p319_p0  ;;  %p325_p5 = scmp.lt.u32.totalorder %s323_s4, %s318_s30 }
  0x18   : > { %p327_p8 = scmp.lt.u32.totalorder %s318_s30, %s496_s25 }
  0x19   : > { %p322_p3 = pneg %p321_p2  ;;  %p326_p7 = por %p325_p5, %p324_p4 }
  0x1b   : > { %p328_p10 = por %p327_p8, %p326_p7 }
  0x1d   : > { %p329_p9 = pnand %p328_p10, %p322_p3 }
  0x1f   : > { %332 = shalt.err (!%p329_p9)
}
  0x20   : > { %s333_s13 = scalar_lea.vmem %s504_s27, 128  ;;  %s416_s14 = smov [#allocation2]  }
  0x21   : > { %p334_p0 = scmp.ne.s32.totalorder %s504_s27, %s333_s13  ;;  %s338_s16 = sshll.u32 %s416_s14, 4  ;;  %s339_s16 = int_to_ptr.vmem [resolvable:$false] %s338_s16 }
  0x22   : > { %s340_s20 = scalar_lea.vmem %s339_s16, 256  ;;  %p341_p11 = scmp.lt.s32.totalorder %s504_s27, %s339_s16 }
  0x23   : > { %p336_p2 = pnand %p334_p0, %p320_p1  ;;  %p342_p4 = scmp.lt.s32.totalorder %s340_s20, %s333_s13 }
  0x25   : > { %p337_p12 = pneg %p336_p2  ;;  %p343_p5 = por %p342_p4, %p341_p11 }
  0x27   : > { %p344_p7 = pnand %p343_p5, %p337_p12 }
  0x29   : > { %347 = shalt.err (!%p344_p7)
}
  0x2a   : > { %s417_s21 = smov 32   ;;  %s418_s22 = smov 2  }
  0x2b   : > { %274 = dma.hbm_to_vmem [thread:$0]  (!%p500_p13), %s496_s25, 128, %s504_s27, %s506_s29, %s417_s21, %s417_s21, %s418_s22  }
  0x2c   : > { %p257_p9 = scmp.ge.s32.totalorder %s414_s9, 1  ;;  %p106_p1 = scmp.lt.s32.totalorder %s414_s9, 3 }
  0x2e   : > { %p107_p3 = pnand %p257_p9, %p106_p1 }
  0x2f   : > { %s537_s23 = sand.u32 (!%p107_p3), 1, %s406_s7  }
  0x30   : > { %110 = sbr.rel (%p107_p3) target bundleno = 195 (0xc3), region = 24  ;;  %s258_s24 = sshll.u32 (!%p107_p3), %s537_s23, 3 }
  0x31   : > { %s113_s26 = scalar_lea.sflag (!%p107_p3), [#allocation3], %s537_s23  ;;  %s116_s30 = scalar_lea.vmem (!%p107_p3), [#allocation2], %s258_s24 }
  0x37   : > { %393 = dma.done.wait (%p476_p6), %s113_s26, 128  }
  0x38   : > { %395 = vsyncadd (%p476_p6), %s113_s26, 4294967168  ;;  %v137_v0 = vld [vmem:[%s116_s30 + $0x4] sm:$0x3]  ;;  %v135_v1 = vld [vmem:[%s116_s30] sm:$0x3]  ;;  %s419_s25 = smov 96  }
  0x39   : > { %147 = vrot.lane.b32.xlu1 %v137_v0, %s419_s25  ;;  %143 = vrot.lane.b32.xlu0 %v135_v1, %s419_s25  ;;  %v138_v2 = vld [vmem:[%s116_s30 + $0x6] sm:$0x3]  ;;  %v136_v3 = vld [vmem:[%s116_s30 + $0x2] sm:$0x3]  ;;  %s259_s27 = sshll.u32 %s537_s23, 2  ;;  %s266_s28 = sshll.u32 %s454_s10, 6 }
  0x3a   : > { %s134_s29 = scalar_lea.vmem [#allocation5], %s259_s27  ;;  %vm161_vm0 = vcmask 254976   ;;  %s550_s4 = scalar_lea.hbm %s597_s1, %s266_s28 }
  0x3b   : > { %s178_s2 = sshll.u32 %s134_s29, 4  ;;  %s165_s10 = scalar_lea.sflag [#allocation4], %s537_s23  ;;  %s552_s2 = int_to_ptr.vmem [resolvable:$true] %s178_s2 }
  0x3c   : > { %s348_s5 = scalar_lea.vmem %s552_s2, 64  ;;  %p604_p11 = scmp.ne.s32.totalorder %s601_s18, 0 }
  0x3d   : > { %149 = vrot.lane.b32.xlu1 %v138_v2, %s419_s25  ;;  %145 = vrot.lane.b32.xlu0 %v136_v3, %s419_s25  ;;  %p349_p6 = scmp.ne.s32.totalorder %s552_s2, %s348_s5  ;;  %s420_s11 = smov [#allocation5]  }
  0x3e   : > { %s352_s13 = sshll.u32 %s420_s11, 4  ;;  %s353_s13 = int_to_ptr.vmem [resolvable:$false] %s352_s13 }
  0x3f   : > { %p350_p12 = pnand %p349_p6, %p604_p11  ;;  %s354_s14 = scalar_lea.vmem %s353_s13, 128 }
  0x40   : > { %p355_p8 = scmp.lt.s32.totalorder %s552_s2, %s353_s13  ;;  %p356_p10 = scmp.lt.s32.totalorder %s354_s14, %s348_s5 }
  0x41   : > { %p351_p13 = pneg %p350_p12 }
  0x42   : > { %p357_p0 = por %p356_p10, %p355_p8 }
  0x44   : > { %p358_p2 = pnand %p357_p0, %p351_p13 }
  0xab   : > { %v148_v4 = vpop.permute.xlu1 %147  ;;  %v144_v5 = vpop.permute.xlu0 %143 }
  0xac   : > { %v157_v8 = vmax.f32 %v137_v0, %v148_v4  ;;  %v155_v9 = vmax.f32 %v135_v1, %v144_v5 }
  0xaf   : > { %v150_v6 = vpop.permute.xlu1 %149  ;;  %v146_v7 = vpop.permute.xlu0 %145 }
  0xb0   : > { %v158_v10 = vmax.f32 %v138_v2, %v150_v6  ;;  %v156_v11 = vmax.f32 %v136_v3, %v146_v7 }
  0xb2   : > { %v160_v12 = vmax.f32 %v157_v8, %v158_v10  ;;  %v159_v13 = vmax.f32 %v155_v9, %v156_v11 }
  0xb4   : > { %163 = vst.msk [vmem:[%s134_s29 + $0x2] sm:$0x3] %vm161_vm0, %v160_v12  ;;  %162 = vst.msk [vmem:[%s134_s29] sm:$0x3] %vm161_vm0, %v159_v13 }
  0xb5   : > { %361 = shalt.err (!%p358_p2)
}
  0xb6   : > { %s362_s16 = scalar_lea.hbm %s550_s4, 64  ;;  %s366_s22 = scalar_lea.hbm %s597_s1, 128 }
  0xb7   : > { %p363_p4 = scmp.ne.s32.totalorder %s550_s4, %s362_s16  ;;  %p367_p9 = scmp.lt.u32.totalorder %s550_s4, %s597_s1 }
  0xb8   : > { %p368_p1 = scmp.lt.u32.totalorder %s366_s22, %s362_s16  ;;  %p370_p6 = scmp.lt.u32.totalorder %s362_s16, %s550_s4 }
  0xb9   : > { %p364_p5 = pnand %p363_p4, %p604_p11 }
  0xba   : > { %p369_p3 = por %p368_p1, %p367_p9 }
  0xbb   : > { %p365_p7 = pneg %p364_p5 }
  0xbc   : > { %p371_p12 = por %p370_p6, %p369_p3 }
  0xbe   : > { %p372_p13 = pnand %p371_p12, %p365_p7 }
  0xc0   : > { %375 = shalt.err (!%p372_p13)
}
  0xc1   : > { %s421_s30 = smov 32   ;;  %s422_s25 = smov 2  }
  0xc2   : > { %269 = dma.vmem_to_hbm [thread:$0]  (%p604_p11), %s552_s2, 64, %s550_s4, %s165_s10, %s421_s30, %s421_s30, %s422_s25  }
  0xc3 PF: > { %s193_s27 = sand.u32 1, %s402_s6   ;;  %p605_p8 = scmp.ne.s32.totalorder %s602_s19, 0 }
  0xc4   : > { %p606_p10 = scmp.ge.s32.totalorder %s414_s9, 2  ;;  %s194_s28 = scalar_lea.sflag [#allocation4], %s193_s27 }
  0xc6   : > { %p276_p0 = pnand %p606_p10, %p605_p8 }
  0xc8   : > { %397 = dma.done.wait (!%p276_p0), %s194_s28, 64  }
  0xc9   : > { %399 = vsyncadd (!%p276_p0), %s194_s28, 4294967232  ;;  %p14_p2 = scmp.ge.s32.totalorder %s458_s12, 4   ;;  %s607_s6 = smov %s406_s7 }
  0xca   : > { %s608_s7 = smov %s410_s8  ;;  %s609_s8 = smov %s470_s15 }
  0xcb   : > { %s610_s9 = smov %s458_s12  ;;  %16 = sbr.rel (!%p14_p2) target bundleno = 5 (0x5), region = 69 }
  0xd2   :  { %199 = vsyncpa [#allocation3], 1 }
  0xd3   :  { %201 = vsyncpa [#allocation3 + $0x1], 1 }
  0xd4   :  { %202 = vsyncpa [#allocation4], 1 }
  0xd5   :  { %204 = vsyncpa [#allocation4 + $0x1], 1 }

// kernel: _lambda_.17
= control target key start
LH: loop header
LB: loop body
LE: loop exit
PB: predicated region body
PF: predicated region fallthrough
CT: control target
= control target key end

     0   :  { %8 = vsyncpa [#allocation4], 0  ;;  %s439_s0 = inlined_call_operand.hbm [shape: f32[2,128], index: 0, kind: input, shape index: {}]   ;;  %s440_s1 = inlined_call_operand.hbm [shape: f32[128,64], index: 1, kind: input, shape index: {}]   ;;  %s441_s2 = inlined_call_operand.hbm [shape: f32[1,64], index: 2, kind: input, shape index: {}]   ;;  %s442_s3 = inlined_call_operand.hbm [shape: f32[2,64], index: 3, kind: output, shape index: {}]  }
   0x1   :  { %9 = vsyncpa [#allocation7], 0 }
   0x2   :  { %10 = vsyncpa [#allocation5], 0  ;;  %s359_s12 = smov [#allocation6]   ;;  %s265_s16 = scalar_lea.hbm %s440_s1, 2048 }
   0x3   :  { %s26_s13 = sshll.u32 %s359_s12, 4  ;;  %p266_p0 = scmp.ne.s32.totalorder %s440_s1, %s265_s16  ;;  %s27_s13 = int_to_ptr.vmem [resolvable:$true] %s26_s13 }
   0x4   :  { %p269_p1 = scmp.lt.u32.totalorder %s265_s16, %s440_s1 }
   0x6   :  { %p271_p2 = pnand %p269_p1, %p266_p0 }
   0x8   :  { %274 = shalt.err (!%p271_p2)
}
   0x9   :  { %s275_s21 = scalar_lea.vmem %s27_s13, 2048  ;;  %p280_p4 = scmp.lt.s32.totalorder %s27_s13, %s27_s13 }
   0xa   :  { %p276_p3 = scmp.ne.s32.totalorder %s27_s13, %s275_s21  ;;  %p281_p5 = scmp.lt.s32.totalorder %s275_s21, %s275_s21 }
   0xc   :  { %p282_p6 = por %p281_p5, %p280_p4 }
   0xe   :  { %p283_p7 = pnand %p282_p6, %p276_p3 }
  0x10   :  { %286 = shalt.err (!%p283_p7)
}
  0x11   :  { %s360_s22 = smov 128   ;;  %s361_s23 = smov 8  }
  0x12   :  { %32 = dma.hbm_to_vmem [thread:$0]  %s440_s1, 2048, %s27_s13, [#allocation7], %s360_s22, %s360_s22, %s361_s23  }
  0x13   :  { %s362_s26 = smov [#allocation3]   ;;  %s363_s28 = smov [#allocation8]  }
  0x14   :  { %s17_s27 = sshll.u32 %s362_s26, 4  ;;  %s39_s29 = sshll.u32 %s363_s28, 4  ;;  %s18_s27 = int_to_ptr.vmem [resolvable:$true] %s17_s27  ;;  %s40_s29 = int_to_ptr.vmem [resolvable:$true] %s39_s29 }
  0x15   :  { %s287_s5 = scalar_lea.hbm %s439_s0, 32 }
  0x16   :  { %p288_p8 = scmp.ne.s32.totalorder %s439_s0, %s287_s5  ;;  %p291_p9 = scmp.lt.u32.totalorder %s287_s5, %s439_s0 }
  0x18   :  { %p293_p10 = pnand %p291_p9, %p288_p8 }
  0x1a   :  { %296 = shalt.err (!%p293_p10)
}
  0x1b   :  { %s297_s1 = scalar_lea.vmem %s18_s27, 32  ;;  %p302_p12 = scmp.lt.s32.totalorder %s18_s27, %s18_s27 }
  0x1c   :  { %p298_p11 = scmp.ne.s32.totalorder %s18_s27, %s297_s1  ;;  %p303_p13 = scmp.lt.s32.totalorder %s297_s1, %s297_s1 }
  0x1e   :  { %p304_p0 = por %p303_p13, %p302_p12 }
  0x20   :  { %p305_p1 = pnand %p304_p0, %p298_p11 }
  0x22   :  { %308 = shalt.err (!%p305_p1)
}
  0x23   :  { %20 = dma.hbm_to_vmem [thread:$0]  %s439_s0, 32, %s18_s27, [#allocation4]  }
  0x24   :  { %s309_s14 = scalar_lea.hbm %s441_s2, 16 }
  0x25   :  { %p310_p2 = scmp.ne.s32.totalorder %s441_s2, %s309_s14  ;;  %p313_p3 = scmp.lt.u32.totalorder %s309_s14, %s441_s2 }
  0x27   :  { %p315_p4 = pnand %p313_p3, %p310_p2 }
  0x29   :  { %318 = shalt.err (!%p315_p4)
}
  0x2a   :  { %s319_s19 = scalar_lea.vmem %s40_s29, 16  ;;  %s323_s20 = scalar_lea.vmem %s40_s29, 32 }
  0x2b   :  { %p320_p5 = scmp.ne.s32.totalorder %s40_s29, %s319_s19  ;;  %p324_p6 = scmp.lt.s32.totalorder %s40_s29, %s40_s29 }
  0x2c   :  { %p325_p7 = scmp.lt.s32.totalorder %s323_s20, %s319_s19 }
  0x2e   :  { %p326_p8 = por %p325_p7, %p324_p6 }
  0x30   :  { %p327_p9 = pnand %p326_p8, %p320_p5 }
  0x32   :  { %330 = shalt.err (!%p327_p9)
}
  0x33   :  { %42 = dma.hbm_to_vmem [thread:$0]  %s441_s2, 16, %s40_s29, [#allocation7]  }
  0x34   :  { %353 = dma.done.wait [#allocation4], 32  }
  0x35   :  { %354 = vsyncadd [#allocation4], 4294967264 }
  0x36   :  { %355 = dma.done.wait [#allocation7], 2064  }
  0x37   :  { %356 = vsyncadd [#allocation7], 4294965232  ;;  %vm56_vm0 = vcmask 517120   ;;  %v364_v0 = vmov 0.0|0.0   ;;  %v365_v1 = vmov 0.0   ;;  %vm366_vm1 = vmmov 0  }
  0x38   :  { %232 = vmatprep.subr.bf16.mxu0 %v364_v0  ;;  %57 = vst.msk [vmem:[#allocation2] sm:$0x3] %vm56_vm0, %v365_v1  ;;  %229 = vmatprep.mubr.msk.f32.mxu0 %vm366_vm1, %v365_v1  ;;  %v60_v2 = vld [vmem:[#allocation6] sm:$0xff]  ;;  %v61_v3 = vld [vmem:[#allocation6 + $0x8] sm:$0xff]  ;;  %v62_v4 = vld [vmem:[#allocation6 + $0x10] sm:$0xff]  ;;  %s367_s2 = smov [#allocation9]  }
  0x39   :  { %v233_v5 = vpack.c.bf16 %v61_v3, %v60_v2  ;;  %v63_v6 = vld [vmem:[#allocation6 + $0x18] sm:$0xff]  ;;  %v64_v8 = vld [vmem:[#allocation6 + $0x20] sm:$0xff]  ;;  %v65_v9 = vld [vmem:[#allocation6 + $0x28] sm:$0xff]  ;;  %s169_s22 = sshll.u32 %s367_s2, 4  ;;  %s170_s22 = int_to_ptr.vmem [resolvable:$true] %s169_s22 }
  0x3a   :  { %v236_v7 = vpack.c.bf16 %v63_v6, %v62_v4  ;;  %v239_v10 = vpack.c.bf16 %v65_v9, %v64_v8  ;;  %v66_v11 = vld [vmem:[#allocation6 + $0x30] sm:$0xff]  ;;  %v67_v12 = vld [vmem:[#allocation6 + $0x38] sm:$0xff]  ;;  %v68_v14 = vld [vmem:[#allocation6 + $0x40] sm:$0xff]  ;;  %s331_s23 = scalar_lea.vmem %s170_s22, 32  ;;  %p336_p11 = scmp.lt.s32.totalorder %s170_s22, %s170_s22 }
  0x3b   :  { %234 = vmatpush3.bf16.msra.mxu0 %v233_v5  ;;  %v242_v13 = vpack.c.bf16 %v67_v12, %v66_v11  ;;  %v69_v15 = vld [vmem:[#allocation6 + $0x48] sm:$0xff]  ;;  %v70_v17 = vld [vmem:[#allocation6 + $0x50] sm:$0xff]  ;;  %v71_v18 = vld [vmem:[#allocation6 + $0x58] sm:$0xff]  ;;  %p332_p10 = scmp.ne.s32.totalorder %s170_s22, %s331_s23  ;;  %p337_p12 = scmp.lt.s32.totalorder %s331_s23, %s331_s23 }
  0x3c   :  { %235 = vmatprep.subr.bf16.mxu0 %v364_v0  ;;  %v245_v16 = vpack.c.bf16 %v69_v15, %v68_v14  ;;  %v248_v19 = vpack.c.bf16 %v71_v18, %v70_v17  ;;  %v72_v20 = vld [vmem:[#allocation6 + $0x60] sm:$0xff]  ;;  %v73_v21 = vld [vmem:[#allocation6 + $0x68] sm:$0xff]  ;;  %v74_v23 = vld [vmem:[#allocation6 + $0x70] sm:$0xff] }
  0x3d   :  { %v251_v22 = vpack.c.bf16 %v73_v21, %v72_v20  ;;  %v75_v24 = vld [vmem:[#allocation6 + $0x78] sm:$0xff]  ;;  %v179_v31 = vld [vmem:[#allocation8] ss:$0 sm:$0xff]  ;;  %p338_p13 = por %p337_p12, %p336_p11 }
  0x3e   :  { %v254_v25 = vpack.c.bf16 %v75_v24, %v74_v23  ;;  %v59_v26 = vld [vmem:[#allocation3] sm:$0x3] }
  0x3f   :  { %237 = vmatpush3.bf16.msra.mxu0 %v236_v7  ;;  %v58_v27 = vld [vmem:[#allocation2] sm:$0x3]  ;;  %p339_p0 = pnand %p338_p13, %p332_p10 }
  0x40   :  { %238 = vmatprep.subr.bf16.mxu0 %v364_v0 }
  0x43   :  { %240 = vmatpush3.bf16.msra.mxu0 %v239_v10 }
  0x44   :  { %241 = vmatprep.subr.bf16.mxu0 %v364_v0 }
  0x47   :  { %243 = vmatpush3.bf16.msra.mxu0 %v242_v13 }
  0x48   :  { %244 = vmatprep.subr.bf16.mxu0 %v364_v0 }
  0x4b   :  { %246 = vmatpush3.bf16.msra.mxu0 %v245_v16 }
  0x4c   :  { %247 = vmatprep.subr.bf16.mxu0 %v364_v0 }
  0x4f   :  { %249 = vmatpush3.bf16.msra.mxu0 %v248_v19 }
  0x50   :  { %250 = vmatprep.subr.bf16.mxu0 %v364_v0 }
  0x53   :  { %252 = vmatpush3.bf16.msra.mxu0 %v251_v22 }
  0x54   :  { %253 = vmatprep.subr.bf16.mxu0 %v364_v0 }
  0x57   :  { %255 = vmatpush3.bf16.msra.mxu0 %v254_v25 }
  0x5a   :  { %230 = vmatmul.mubr.f32.vlgmr.msra.gmra.mrb[0].mxu0 %v59_v26 }
 0x12d   :  { %v142_v28 = vpop.f32.mrb[0].mxu0 }
 0x12e   :  { %v146_v29 = vadd.f32 %v142_v28, %v58_v27  ;;  %v231_v30 = vpop.f32.mrb[1].mxu0 }
 0x130   :  { %148 = vst.msk [vmem:[#allocation2] sm:$0x3] %vm56_vm0, %v146_v29 }
 0x137   :  { %v152_v32 = vld [vmem:[#allocation2] sm:$0x3] }
 0x138   :  { %v160_v33 = vadd.f32 %v179_v31, %v152_v32 }
 0x13a   :  { %v161_v34 = vmax.f32 %v160_v33, 0.0 }
 0x13c   :  { %162 = vst.msk [vmem:[#allocation9] sm:$0x3] %vm56_vm0, %v161_v34 }
 0x13d   :  { %342 = shalt.err (!%p339_p0)
}
 0x13e   :  { %s343_s26 = scalar_lea.hbm %s442_s3, 32 }
 0x13f   :  { %p344_p1 = scmp.ne.s32.totalorder %s442_s3, %s343_s26  ;;  %p347_p2 = scmp.lt.u32.totalorder %s343_s26, %s442_s3 }
 0x141   :  { %p349_p3 = pnand %p347_p2, %p344_p1 }
 0x143   :  { %352 = shalt.err (!%p349_p3)
}
 0x144   :  { %172 = dma.vmem_to_hbm [thread:$0]  %s170_s22, 32, %s442_s3, [#allocation5]  }
 0x145   :  { %357 = dma.done.wait [#allocation5], 32  }
 0x146   :  { %358 = vsyncadd [#allocation5], 4294967264 }
 0x147   :  { %176 = vsyncpa [#allocation4], 1 }
 0x148   :  { %177 = vsyncpa [#allocation7], 1 }
 0x149   :  { %178 = vsyncpa [#allocation5], 1 }

// kernel: _lambda_.18
= control target key start
LH: loop header
LB: loop body
LE: loop exit
PB: predicated region body
PF: predicated region fallthrough
CT: control target
= control target key end

     0   :  { %8 = vsyncpa [#allocation4], 0  ;;  %s400_s0 = inlined_call_operand.hbm [shape: f32[2,64], index: 0, kind: input, shape index: {}]   ;;  %s401_s1 = inlined_call_operand.hbm [shape: f32[64,64], index: 1, kind: input, shape index: {}]   ;;  %s402_s2 = inlined_call_operand.hbm [shape: f32[1,64], index: 2, kind: input, shape index: {}]   ;;  %s403_s3 = inlined_call_operand.hbm [shape: f32[2,64], index: 3, kind: output, shape index: {}]  }
   0x1   :  { %9 = vsyncpa [#allocation7], 0 }
   0x2   :  { %10 = vsyncpa [#allocation5], 0  ;;  %s320_s12 = smov [#allocation6]   ;;  %s226_s16 = scalar_lea.hbm %s401_s1, 1024 }
   0x3   :  { %s26_s13 = sshll.u32 %s320_s12, 4  ;;  %p227_p0 = scmp.ne.s32.totalorder %s401_s1, %s226_s16  ;;  %s27_s13 = int_to_ptr.vmem [resolvable:$true] %s26_s13 }
   0x4   :  { %p230_p1 = scmp.lt.u32.totalorder %s226_s16, %s401_s1 }
   0x6   :  { %p232_p2 = pnand %p230_p1, %p227_p0 }
   0x8   :  { %235 = shalt.err (!%p232_p2)
}
   0x9   :  { %s236_s21 = scalar_lea.vmem %s27_s13, 1024  ;;  %p241_p4 = scmp.lt.s32.totalorder %s27_s13, %s27_s13 }
   0xa   :  { %p237_p3 = scmp.ne.s32.totalorder %s27_s13, %s236_s21  ;;  %p242_p5 = scmp.lt.s32.totalorder %s236_s21, %s236_s21 }
   0xc   :  { %p243_p6 = por %p242_p5, %p241_p4 }
   0xe   :  { %p244_p7 = pnand %p243_p6, %p237_p3 }
  0x10   :  { %247 = shalt.err (!%p244_p7)
}
  0x11   :  { %s321_s22 = smov 128   ;;  %s322_s23 = smov 8  }
  0x12   :  { %32 = dma.hbm_to_vmem [thread:$0]  %s401_s1, 1024, %s27_s13, [#allocation7], %s321_s22, %s321_s22, %s322_s23  }
  0x13   :  { %s323_s26 = smov [#allocation3]   ;;  %s324_s28 = smov [#allocation8]  }
  0x14   :  { %s17_s27 = sshll.u32 %s323_s26, 4  ;;  %s39_s29 = sshll.u32 %s324_s28, 4  ;;  %s18_s27 = int_to_ptr.vmem [resolvable:$true] %s17_s27  ;;  %s40_s29 = int_to_ptr.vmem [resolvable:$true] %s39_s29 }
  0x15   :  { %s248_s5 = scalar_lea.hbm %s400_s0, 32 }
  0x16   :  { %p249_p8 = scmp.ne.s32.totalorder %s400_s0, %s248_s5  ;;  %p252_p9 = scmp.lt.u32.totalorder %s248_s5, %s400_s0 }
  0x18   :  { %p254_p10 = pnand %p252_p9, %p249_p8 }
  0x1a   :  { %257 = shalt.err (!%p254_p10)
}
  0x1b   :  { %s258_s1 = scalar_lea.vmem %s18_s27, 32  ;;  %p263_p12 = scmp.lt.s32.totalorder %s18_s27, %s18_s27 }
  0x1c   :  { %p259_p11 = scmp.ne.s32.totalorder %s18_s27, %s258_s1  ;;  %p264_p13 = scmp.lt.s32.totalorder %s258_s1, %s258_s1 }
  0x1e   :  { %p265_p0 = por %p264_p13, %p263_p12 }
  0x20   :  { %p266_p1 = pnand %p265_p0, %p259_p11 }
  0x22   :  { %269 = shalt.err (!%p266_p1)
}
  0x23   :  { %20 = dma.hbm_to_vmem [thread:$0]  %s400_s0, 32, %s18_s27, [#allocation4]  }
  0x24   :  { %s270_s14 = scalar_lea.hbm %s402_s2, 16 }
  0x25   :  { %p271_p2 = scmp.ne.s32.totalorder %s402_s2, %s270_s14  ;;  %p274_p3 = scmp.lt.u32.totalorder %s270_s14, %s402_s2 }
  0x27   :  { %p276_p4 = pnand %p274_p3, %p271_p2 }
  0x29   :  { %279 = shalt.err (!%p276_p4)
}
  0x2a   :  { %s280_s19 = scalar_lea.vmem %s40_s29, 16  ;;  %s284_s20 = scalar_lea.vmem %s40_s29, 32 }
  0x2b   :  { %p281_p5 = scmp.ne.s32.totalorder %s40_s29, %s280_s19  ;;  %p285_p6 = scmp.lt.s32.totalorder %s40_s29, %s40_s29 }
  0x2c   :  { %p286_p7 = scmp.lt.s32.totalorder %s284_s20, %s280_s19 }
  0x2e   :  { %p287_p8 = por %p286_p7, %p285_p6 }
  0x30   :  { %p288_p9 = pnand %p287_p8, %p281_p5 }
  0x32   :  { %291 = shalt.err (!%p288_p9)
}
  0x33   :  { %42 = dma.hbm_to_vmem [thread:$0]  %s402_s2, 16, %s40_s29, [#allocation7]  }
  0x34   :  { %314 = dma.done.wait [#allocation4], 32  }
  0x35   :  { %315 = vsyncadd [#allocation4], 4294967264 }
  0x36   :  { %316 = dma.done.wait [#allocation7], 1040  }
  0x37   :  { %317 = vsyncadd [#allocation7], 4294966256  ;;  %vm56_vm0 = vcmask 517120   ;;  %v325_v0 = vmov 0.0|0.0   ;;  %v326_v1 = vmov 0.0   ;;  %vm327_vm1 = vmmov 0  }
  0x38   :  { %205 = vmatprep.subr.bf16.mxu0 %v325_v0  ;;  %57 = vst.msk [vmem:[#allocation2] sm:$0x3] %vm56_vm0, %v326_v1  ;;  %202 = vmatprep.mubr.msk.f32.mxu0 %vm327_vm1, %v326_v1  ;;  %v60_v2 = vld [vmem:[#allocation6] sm:$0xff]  ;;  %v61_v3 = vld [vmem:[#allocation6 + $0x8] sm:$0xff]  ;;  %v62_v4 = vld [vmem:[#allocation6 + $0x10] sm:$0xff]  ;;  %vm68_vm2 = vcmask 523264  }
  0x39   :  { %v206_v5 = vpack.c.bf16 %v61_v3, %v60_v2  ;;  %v63_v6 = vld [vmem:[#allocation6 + $0x18] sm:$0xff]  ;;  %v64_v8 = vld [vmem:[#allocation6 + $0x20] sm:$0xff]  ;;  %v65_v9 = vld [vmem:[#allocation6 + $0x28] sm:$0xff]  ;;  %s328_s2 = smov [#allocation9]  }
  0x3a   :  { %v209_v7 = vpack.c.bf16 %v63_v6, %v62_v4  ;;  %v212_v10 = vpack.c.bf16 %v65_v9, %v64_v8  ;;  %v66_v11 = vld [vmem:[#allocation6 + $0x30] sm:$0xff]  ;;  %v67_v12 = vld [vmem:[#allocation6 + $0x38] sm:$0xff]  ;;  %v176_v19 = vld [vmem:[#allocation8] ss:$0 sm:$0xff]  ;;  %s165_s22 = sshll.u32 %s328_s2, 4  ;;  %s166_s22 = int_to_ptr.vmem [resolvable:$true] %s165_s22 }
  0x3b   :  { %207 = vmatpush3.bf16.msra.mxu0 %v206_v5  ;;  %v215_v13 = vpack.c.bf16 %v67_v12, %v66_v11  ;;  %v59_v14 = vld [vmem:[#allocation3] sm:$0x3]  ;;  %s292_s23 = scalar_lea.vmem %s166_s22, 32  ;;  %p297_p11 = scmp.lt.s32.totalorder %s166_s22, %s166_s22 }
  0x3c   :  { %208 = vmatprep.subr.bf16.mxu0 %v325_v0  ;;  %p293_p10 = scmp.ne.s32.totalorder %s166_s22, %s292_s23  ;;  %p298_p12 = scmp.lt.s32.totalorder %s292_s23, %s292_s23 }
  0x3e   :  { %p299_p13 = por %p298_p12, %p297_p11 }
  0x3f   :  { %210 = vmatpush3.bf16.msra.mxu0 %v209_v7  ;;  %v58_v15 = vld [vmem:[#allocation2] sm:$0x3] }
  0x40   :  { %211 = vmatprep.subr.bf16.mxu0 %v325_v0  ;;  %p300_p0 = pnand %p299_p13, %p293_p10 }
  0x43   :  { %213 = vmatpush3.bf16.msra.mxu0 %v212_v10 }
  0x44   :  { %214 = vmatprep.subr.bf16.mxu0 %v325_v0 }
  0x47   :  { %216 = vmatpush3.bf16.msra.mxu0 %v215_v13 }
  0x4a   :  { %203 = vmatmul.mubr.msk.f32.vlgmr.msra.gmra.mrb[0].mxu0 %vm68_vm2, %v59_v14 }
 0x11d   :  { %v138_v16 = vpop.f32.mrb[0].mxu0 }
 0x11e   :  { %v142_v17 = vadd.f32 %v138_v16, %v58_v15  ;;  %v204_v18 = vpop.f32.mrb[1].mxu0 }
 0x120   :  { %144 = vst.msk [vmem:[#allocation2] sm:$0x3] %vm56_vm0, %v142_v17 }
 0x127   :  { %v148_v20 = vld [vmem:[#allocation2] sm:$0x3] }
 0x128   :  { %v156_v21 = vadd.f32 %v176_v19, %v148_v20 }
 0x12a   :  { %v157_v22 = vmax.f32 %v156_v21, 0.0 }
 0x12c   :  { %158 = vst.msk [vmem:[#allocation9] sm:$0x3] %vm56_vm0, %v157_v22 }
 0x12d   :  { %303 = shalt.err (!%p300_p0)
}
 0x12e   :  { %s304_s26 = scalar_lea.hbm %s403_s3, 32 }
 0x12f   :  { %p305_p1 = scmp.ne.s32.totalorder %s403_s3, %s304_s26  ;;  %p308_p2 = scmp.lt.u32.totalorder %s304_s26, %s403_s3 }
 0x131   :  { %p310_p3 = pnand %p308_p2, %p305_p1 }
 0x133   :  { %313 = shalt.err (!%p310_p3)
}
 0x134   :  { %168 = dma.vmem_to_hbm [thread:$0]  %s166_s22, 32, %s403_s3, [#allocation5]  }
 0x135   :  { %318 = dma.done.wait [#allocation5], 32  }
 0x136   :  { %319 = vsyncadd [#allocation5], 4294967264 }
 0x137   :  { %172 = vsyncpa [#allocation4], 1 }
 0x138   :  { %173 = vsyncpa [#allocation7], 1 }
 0x139   :  { %174 = vsyncpa [#allocation5], 1 }

// kernel: _lambda_.19
= control target key start
LH: loop header
LB: loop body
LE: loop exit
PB: predicated region body
PF: predicated region fallthrough
CT: control target
= control target key end

     0   :  { %8 = vsyncpa [#allocation4], 0  ;;  %s399_s0 = inlined_call_operand.hbm [shape: f32[2,64], index: 0, kind: input, shape index: {}]   ;;  %s400_s1 = inlined_call_operand.hbm [shape: f32[64,10], index: 1, kind: input, shape index: {}]   ;;  %s401_s2 = inlined_call_operand.hbm [shape: f32[1,10], index: 2, kind: input, shape index: {}]   ;;  %s402_s3 = inlined_call_operand.hbm [shape: f32[2,10], index: 3, kind: output, shape index: {}]  }
   0x1   :  { %9 = vsyncpa [#allocation7], 0 }
   0x2   :  { %10 = vsyncpa [#allocation5], 0  ;;  %s319_s12 = smov [#allocation6]   ;;  %s225_s16 = scalar_lea.hbm %s400_s1, 1024 }
   0x3   :  { %s26_s13 = sshll.u32 %s319_s12, 4  ;;  %p226_p0 = scmp.ne.s32.totalorder %s400_s1, %s225_s16  ;;  %s27_s13 = int_to_ptr.vmem [resolvable:$true] %s26_s13 }
   0x4   :  { %p229_p1 = scmp.lt.u32.totalorder %s225_s16, %s400_s1 }
   0x6   :  { %p231_p2 = pnand %p229_p1, %p226_p0 }
   0x8   :  { %234 = shalt.err (!%p231_p2)
}
   0x9   :  { %s235_s21 = scalar_lea.vmem %s27_s13, 1024  ;;  %p240_p4 = scmp.lt.s32.totalorder %s27_s13, %s27_s13 }
   0xa   :  { %p236_p3 = scmp.ne.s32.totalorder %s27_s13, %s235_s21  ;;  %p241_p5 = scmp.lt.s32.totalorder %s235_s21, %s235_s21 }
   0xc   :  { %p242_p6 = por %p241_p5, %p240_p4 }
   0xe   :  { %p243_p7 = pnand %p242_p6, %p236_p3 }
  0x10   :  { %246 = shalt.err (!%p243_p7)
}
  0x11   :  { %s320_s22 = smov 128   ;;  %s321_s23 = smov 8  }
  0x12   :  { %32 = dma.hbm_to_vmem [thread:$0]  %s400_s1, 1024, %s27_s13, [#allocation7], %s320_s22, %s320_s22, %s321_s23  }
  0x13   :  { %s322_s26 = smov [#allocation3]   ;;  %s323_s28 = smov [#allocation8]  }
  0x14   :  { %s17_s27 = sshll.u32 %s322_s26, 4  ;;  %s39_s29 = sshll.u32 %s323_s28, 4  ;;  %s18_s27 = int_to_ptr.vmem [resolvable:$true] %s17_s27  ;;  %s40_s29 = int_to_ptr.vmem [resolvable:$true] %s39_s29 }
  0x15   :  { %s247_s5 = scalar_lea.hbm %s399_s0, 32 }
  0x16   :  { %p248_p8 = scmp.ne.s32.totalorder %s399_s0, %s247_s5  ;;  %p251_p9 = scmp.lt.u32.totalorder %s247_s5, %s399_s0 }
  0x18   :  { %p253_p10 = pnand %p251_p9, %p248_p8 }
  0x1a   :  { %256 = shalt.err (!%p253_p10)
}
  0x1b   :  { %s257_s1 = scalar_lea.vmem %s18_s27, 32  ;;  %p262_p12 = scmp.lt.s32.totalorder %s18_s27, %s18_s27 }
  0x1c   :  { %p258_p11 = scmp.ne.s32.totalorder %s18_s27, %s257_s1  ;;  %p263_p13 = scmp.lt.s32.totalorder %s257_s1, %s257_s1 }
  0x1e   :  { %p264_p0 = por %p263_p13, %p262_p12 }
  0x20   :  { %p265_p1 = pnand %p264_p0, %p258_p11 }
  0x22   :  { %268 = shalt.err (!%p265_p1)
}
  0x23   :  { %20 = dma.hbm_to_vmem [thread:$0]  %s399_s0, 32, %s18_s27, [#allocation4]  }
  0x24   :  { %s269_s14 = scalar_lea.hbm %s401_s2, 16 }
  0x25   :  { %p270_p2 = scmp.ne.s32.totalorder %s401_s2, %s269_s14  ;;  %p273_p3 = scmp.lt.u32.totalorder %s269_s14, %s401_s2 }
  0x27   :  { %p275_p4 = pnand %p273_p3, %p270_p2 }
  0x29   :  { %278 = shalt.err (!%p275_p4)
}
  0x2a   :  { %s279_s19 = scalar_lea.vmem %s40_s29, 16  ;;  %s283_s20 = scalar_lea.vmem %s40_s29, 32 }
  0x2b   :  { %p280_p5 = scmp.ne.s32.totalorder %s40_s29, %s279_s19  ;;  %p284_p6 = scmp.lt.s32.totalorder %s40_s29, %s40_s29 }
  0x2c   :  { %p285_p7 = scmp.lt.s32.totalorder %s283_s20, %s279_s19 }
  0x2e   :  { %p286_p8 = por %p285_p7, %p284_p6 }
  0x30   :  { %p287_p9 = pnand %p286_p8, %p280_p5 }
  0x32   :  { %290 = shalt.err (!%p287_p9)
}
  0x33   :  { %42 = dma.hbm_to_vmem [thread:$0]  %s401_s2, 16, %s40_s29, [#allocation7]  }
  0x34   :  { %313 = dma.done.wait [#allocation4], 32  }
  0x35   :  { %314 = vsyncadd [#allocation4], 4294967264 }
  0x36   :  { %315 = dma.done.wait [#allocation7], 1040  }
  0x37   :  { %316 = vsyncadd [#allocation7], 4294966256  ;;  %vm56_vm0 = vcmask 74752   ;;  %v324_v0 = vmov 0.0|0.0   ;;  %v325_v1 = vmov 0.0   ;;  %vm326_vm1 = vmmov 0  }
  0x38   :  { %204 = vmatprep.subr.bf16.mxu0 %v324_v0  ;;  %57 = vst.msk [vmem:[#allocation2] sm:$0x3] %vm56_vm0, %v325_v1  ;;  %201 = vmatprep.mubr.msk.f32.mxu0 %vm326_vm1, %v325_v1  ;;  %v60_v2 = vld [vmem:[#allocation6] sm:$0xff]  ;;  %v61_v3 = vld [vmem:[#allocation6 + $0x8] sm:$0xff]  ;;  %v62_v4 = vld [vmem:[#allocation6 + $0x10] sm:$0xff]  ;;  %vm68_vm2 = vcmask 523264  }
  0x39   :  { %v205_v5 = vpack.c.bf16 %v61_v3, %v60_v2  ;;  %v63_v6 = vld [vmem:[#allocation6 + $0x18] sm:$0xff]  ;;  %v64_v8 = vld [vmem:[#allocation6 + $0x20] sm:$0xff]  ;;  %v65_v9 = vld [vmem:[#allocation6 + $0x28] sm:$0xff]  ;;  %s327_s2 = smov [#allocation9]  }
  0x3a   :  { %v208_v7 = vpack.c.bf16 %v63_v6, %v62_v4  ;;  %v211_v10 = vpack.c.bf16 %v65_v9, %v64_v8  ;;  %v66_v11 = vld [vmem:[#allocation6 + $0x30] sm:$0xff]  ;;  %v67_v12 = vld [vmem:[#allocation6 + $0x38] sm:$0xff]  ;;  %v175_v19 = vld [vmem:[#allocation8] ss:$0 sm:$0xff]  ;;  %s164_s22 = sshll.u32 %s327_s2, 4  ;;  %s165_s22 = int_to_ptr.vmem [resolvable:$true] %s164_s22 }
  0x3b   :  { %206 = vmatpush3.bf16.msra.mxu0 %v205_v5  ;;  %v214_v13 = vpack.c.bf16 %v67_v12, %v66_v11  ;;  %v59_v14 = vld [vmem:[#allocation3] sm:$0x3]  ;;  %s291_s23 = scalar_lea.vmem %s165_s22, 32  ;;  %p296_p11 = scmp.lt.s32.totalorder %s165_s22, %s165_s22 }
  0x3c   :  { %207 = vmatprep.subr.bf16.mxu0 %v324_v0  ;;  %p292_p10 = scmp.ne.s32.totalorder %s165_s22, %s291_s23  ;;  %p297_p12 = scmp.lt.s32.totalorder %s291_s23, %s291_s23 }
  0x3e   :  { %p298_p13 = por %p297_p12, %p296_p11 }
  0x3f   :  { %209 = vmatpush3.bf16.msra.mxu0 %v208_v7  ;;  %v58_v15 = vld [vmem:[#allocation2] sm:$0x3] }
  0x40   :  { %210 = vmatprep.subr.bf16.mxu0 %v324_v0  ;;  %p299_p0 = pnand %p298_p13, %p292_p10 }
  0x43   :  { %212 = vmatpush3.bf16.msra.mxu0 %v211_v10 }
  0x44   :  { %213 = vmatprep.subr.bf16.mxu0 %v324_v0 }
  0x47   :  { %215 = vmatpush3.bf16.msra.mxu0 %v214_v13 }
  0x4a   :  { %202 = vmatmul.mubr.msk.f32.vlgmr.msra.gmra.mrb[0].mxu0 %vm68_vm2, %v59_v14 }
 0x11d   :  { %v138_v16 = vpop.f32.mrb[0].mxu0 }
 0x11e   :  { %v142_v17 = vadd.f32 %v138_v16, %v58_v15  ;;  %v203_v18 = vpop.f32.mrb[1].mxu0 }
 0x120   :  { %144 = vst.msk [vmem:[#allocation2] sm:$0x3] %vm56_vm0, %v142_v17 }
 0x127   :  { %v148_v20 = vld [vmem:[#allocation2] sm:$0x3] }
 0x128   :  { %v156_v21 = vadd.f32 %v175_v19, %v148_v20 }
 0x12a   :  { %157 = vst.msk [vmem:[#allocation9] sm:$0x3] %vm56_vm0, %v156_v21 }
 0x12b   :  { %302 = shalt.err (!%p299_p0)
}
 0x12c   :  { %s303_s26 = scalar_lea.hbm %s402_s3, 32 }
 0x12d   :  { %p304_p1 = scmp.ne.s32.totalorder %s402_s3, %s303_s26  ;;  %p307_p2 = scmp.lt.u32.totalorder %s303_s26, %s402_s3 }
 0x12f   :  { %p309_p3 = pnand %p307_p2, %p304_p1 }
 0x131   :  { %312 = shalt.err (!%p309_p3)
}
 0x132   :  { %167 = dma.vmem_to_hbm [thread:$0]  %s165_s22, 32, %s402_s3, [#allocation5]  }
 0x133   :  { %317 = dma.done.wait [#allocation5], 32  }
 0x134   :  { %318 = vsyncadd [#allocation5], 4294967264 }
 0x135   :  { %171 = vsyncpa [#allocation4], 1 }
 0x136   :  { %172 = vsyncpa [#allocation7], 1 }
 0x137   :  { %173 = vsyncpa [#allocation5], 1 }

</bundles_post_ra>
